<compile_context>
chip_gen: v7x
topology: tpu7x:2x2x1
jax: 0.10.0
libtpu: 0.0.40
codegen_flags: <defaults>
</compile_context>

<pallas_src>
import functools

import jax
import jax.numpy as jnp
from jax.experimental import pallas as pl
from jax.experimental.pallas import tpu as pltpu

_EPS = 1e-5

# (name, stride, padding) for the 6 ConvTranspose1d layers of ECG_Decoder.
_LAYER_SPECS = [("l1", 1, 0), ("l2", 2, 1), ("l3", 2, 1),
                ("l4", 2, 1), ("l5", 2, 1), ("l6", 2, 1)]
_KERNEL_SIZES = [10, 4, 4, 4, 4, 4]


# ----------------------------- fused Pallas kernel -----------------------------
def _make_decoder_kernel(plan):
    """Builds the fused decoder kernel for a static layer plan.

    Activation layout inside the kernel: (channels, positions) per batch element, so the
    growing position axis is the lane axis and the final layer directly emits the NCW row.
    """
    layers = plan["layers"]            # tuple of (row0, row1, cin, cout, L_in)

    def kernel(xk_ref, m1_ref, wcat_ref, bias_ref, *rest):
        scat_refs, o_ref = rest[:-1], rest[-1]
        m1 = m1_ref[...]                                   # (c1, nz*K1), BN scale folded
        wcat = wcat_ref[...]                               # packed tap matrices
        bias = bias_ref[...]                               # (c1, 5) packed BN shifts
        scats = [r[...].astype(jnp.float32) for r in scat_refs]   # exact 0/1, bf16 -> f32

        n_batch = xk_ref.shape[0]
        # Tiny static batch -> unrolled Python loop; everything stays resident in VMEM.
        # (When batching grows, switch to grid=(cdiv(B, TB),) with constant-index weight
        #  BlockSpecs + dimension_semantics=("parallel",) so v7x's 2nd TensorCore helps.)
        for b in range(n_batch):
            # ---- layer 1: ConvTranspose1d(nz, c1, 10, 1, 0) + folded BN + ReLU ----
            h = jnp.dot(m1, xk_ref[b], preferred_element_type=jnp.float32)   # (c1, 10)
            h = jnp.maximum(h + bias[:, 0:1], 0.0)

            # ---- layers 2..6: ConvTranspose1d(cin, cout, 4, 2, 1) in sub-pixel form ----
            for li, (r0, r1, cin, cout, L) in enumerate(layers):
                wc = wcat[r0:r1, 0:cin]                                      # (4*cout, cin)
                p = jnp.dot(wc, h, preferred_element_type=jnp.float32)       # (4*cout, L)
                s = scats[li]                                                # (4L, 2L)
                y = jnp.dot(p[0 * cout:1 * cout, :], s[0 * L:1 * L, :],
                            preferred_element_type=jnp.float32)
                y = y + jnp.dot(p[1 * cout:2 * cout, :], s[1 * L:2 * L, :],
                                preferred_element_type=jnp.float32)
                y = y + jnp.dot(p[2 * cout:3 * cout, :], s[2 * L:3 * L, :],
                                preferred_element_type=jnp.float32)
                y = y + jnp.dot(p[3 * cout:4 * cout, :], s[3 * L:4 * L, :],
                                preferred_element_type=jnp.float32)          # (cout, 2L)
                if li + 1 < len(layers):
                    h = jnp.maximum(y + bias[0:cout, li + 1:li + 2], 0.0)    # folded BN + ReLU
                else:
                    o_ref[b] = jnp.tanh(y)                                   # (nc, 320) NCW row

    return kernel


def ecg_decoder_forward(arrays, x, *, plan):
    """Single fused pallas_call for the whole decoder.  x: (B, nz, 1).  Out: (B, nc, 320)."""
    assert x.shape[-1] == 1, "ECG_Decoder expects a length-1 latent (B, nz, 1)"
    B = x.shape[0]
    nz_, k1 = plan["nz"], plan["k1"]
    nc_out = plan["layers"][-1][3]
    l_out = plan["l_out"]

    # Tiny wrapper-side expansion: xk[b] = kron(x[b], I_K1), so layer 1 is a single in-kernel
    # matmul that lands directly in (channels, positions) layout (no in-kernel reshape).
    x_flat = x.reshape(B, nz_).astype(jnp.float32)
    eye = jnp.eye(k1, dtype=jnp.float32)
    xk = (x_flat[:, :, None, None] * eye[None, None, :, :]).reshape(B, nz_ * k1, k1)

    kernel = _make_decoder_kernel(plan)
    n_in = 1 + len(arrays)
    out = pl.pallas_call(
        kernel,
        out_shape=jax.ShapeDtypeStruct((B, nc_out, l_out), jnp.float32),
        in_specs=[pl.BlockSpec(memory_space=pltpu.MemorySpace.VMEM)] * n_in,
        out_specs=pl.BlockSpec(memory_space=pltpu.MemorySpace.VMEM),
        compiler_params=pltpu.CompilerParams(vmem_limit_bytes=16 * 1024 * 1024),
    )(xk, *arrays)
    return out                                   # already PyTorch NCW layout


# --------------------- one-time weight preparation (outside kernel) ---------------------
def _bn_fold(params, name, eps):
    g, b = params[name + "_bn_g"], params[name + "_bn_b"]
    m, v = params[name + "_bn_m"], params[name + "_bn_v"]
    scale = g / jnp.sqrt(v + eps)
    shift = b - m * scale
    return scale, shift


def prepare_operands(params, eps=_EPS):
    """Fold eval-mode BN, build compact sub-pixel operands + static slicing plan. Run once."""
    # ---- layer 1 (stride 1, pad 0, L_in = 1): a single matmul onto (c1, K1) ----
    w1 = params["l1_w"]                                 # (nz, c1, 10)
    nz_, c1, k1 = w1.shape
    scale1, shift1 = _bn_fold(params, "l1", eps)
    # m1t[co, c*K1 + l] = w1[c, co, l] * scale1[co]
    m1t = (jnp.transpose(w1, (1, 0, 2)).reshape(c1, nz_ * k1)
           * scale1[:, None]).astype(jnp.float32)

    # ---- layers 2..6 (stride 2, K 4, pad 1): tap matrices + exact 0/1 scatter matrices ----
    names = ["l2", "l3", "l4", "l5", "l6"]
    wcat_blocks, scat_mats, shifts, plan_rows = [], [], [shift1], []
    L, row, width = k1, 0, c1
    for i, name in enumerate(names):
        w = params[name + "_w"]                         # (cin, cout, 4)
        cin, cout, K = w.shape
        assert K == 4
        if i + 1 < len(names):
            scale, shift = _bn_fold(params, name, eps)
            shifts.append(shift)
        else:
            scale = jnp.ones((cout,), jnp.float32)      # last layer: no BN (Tanh in kernel)
        # tap order [k=1, k=3, k=2, k=0]; each (cout, cin), BN scale folded per output row.
        taps = [w[:, :, k].T * scale[:, None] for k in (1, 3, 2, 0)]
        blk = jnp.concatenate(taps, axis=0)                              # (4*cout, cin)
        wcat_blocks.append(jnp.pad(blk, ((0, 0), (0, width - cin))))     # lane-pad

        # scatter: S_k^T (L, 2L) places tap-k contribution at its output position.
        Lo, ar = 2 * L, jnp.arange(L)
        s1 = jnp.zeros((L, Lo), jnp.float32).at[ar, 2 * ar].set(1.0)                 # j = 2m
        s3 = jnp.zeros((L, Lo), jnp.float32).at[ar[:-1], 2 * ar[:-1] + 2].set(1.0)   # j = 2m+2
        s2 = jnp.zeros((L, Lo), jnp.float32).at[ar, 2 * ar + 1].set(1.0)             # j = 2m+1
        s0 = jnp.zeros((L, Lo), jnp.float32).at[ar[1:], 2 * ar[1:] - 1].set(1.0)     # j = 2m-1
        scat_mats.append(jnp.concatenate([s1, s3, s2, s0], axis=0).astype(jnp.bfloat16))

        plan_rows.append((row, row + 4 * cout, int(cin), int(cout), int(L)))
        row += 4 * cout
        L = Lo

    wcat_pack = jnp.concatenate(wcat_blocks, axis=0).astype(jnp.float32)
    bias_pack = jnp.zeros((c1, len(shifts)), jnp.float32)
    for j, s in enumerate(shifts):
        bias_pack = bias_pack.at[: s.shape[0], j].set(s)

    plan = {"nz": int(nz_), "c1": int(c1), "k1": int(k1),
            "layers": tuple(plan_rows), "l_out": int(L)}
    arrays = (m1t, wcat_pack, bias_pack, *scat_mats)
    return arrays, plan


# ------------------------------- params & reference -------------------------------
def init_params(key, nz, ngf, nc):
    chans = [nz, ngf * 16, ngf * 8, ngf * 4, ngf * 2, ngf, nc]
    params = {}
    for idx in range(6):
        cin, cout, K = chans[idx], chans[idx + 1], _KERNEL_SIZES[idx]
        key, kw = jax.random.split(key)
        bound = 1.0 / float(cin * K) ** 0.5
        params[f"l{idx + 1}_w"] = jax.random.uniform(
            kw, (cin, cout, K), jnp.float32, -bound, bound)   # ConvTranspose1d layout (Cin,Cout,K)
        if idx < 5:   # BatchNorm1d params / running stats (non-trivial so BN is exercised)
            key, kg, kb, km, kv = jax.random.split(key, 5)
            params[f"l{idx + 1}_bn_g"] = jax.random.uniform(kg, (cout,), jnp.float32, 0.5, 1.5)
            params[f"l{idx + 1}_bn_b"] = 0.1 * jax.random.normal(kb, (cout,), jnp.float32)
            params[f"l{idx + 1}_bn_m"] = 0.1 * jax.random.normal(km, (cout,), jnp.float32)
            params[f"l{idx + 1}_bn_v"] = jax.random.uniform(kv, (cout,), jnp.float32, 0.5, 1.5)
    return params


def _conv_transpose1d_ref(x, w, stride, padding):
    """PyTorch-semantics ConvTranspose1d via XLA (for correctness checking)."""
    K = w.shape[-1]
    w_oiw = jnp.transpose(jnp.flip(w, axis=-1), (1, 0, 2))   # (Cout, Cin, K), flipped
    return jax.lax.conv_general_dilated(
        x, w_oiw, window_strides=(1,),
        padding=[(K - 1 - padding, K - 1 - padding)],
        lhs_dilation=(stride,),
        dimension_numbers=("NCW", "OIW", "NCW"),
        precision=jax.lax.Precision.HIGHEST)


def ecg_decoder_reference(params, x):
    h = x
    for idx, (name, stride, pad) in enumerate(_LAYER_SPECS):
        h = _conv_transpose1d_ref(h, params[name + "_w"], stride, pad)
        if idx < len(_LAYER_SPECS) - 1:
            g = params[name + "_bn_g"][None, :, None]
            b = params[name + "_bn_b"][None, :, None]
            m = params[name + "_bn_m"][None, :, None]
            v = params[name + "_bn_v"][None, :, None]
            h = (h - m) / jnp.sqrt(v + _EPS) * g + b
            h = jnp.maximum(h, 0.0)
        else:
            h = jnp.tanh(h)
    return h


# ---------------------------------------- main ----------------------------------------
if __name__ == "__main__":
    nz, ngf, nc = 8, 4, 1          # opt.nz, opt.ngf, opt.nc (small)
    B, l_in = 2, 1                 # latent (B, nz, 1) -> output (B, nc, 320)

    key = jax.random.PRNGKey(0)
    kp, kx = jax.random.split(key)
    params = init_params(kp, nz, ngf, nc)
    x = jax.random.normal(kx, (B, nz, l_in), dtype=jnp.float32)

    arrays, plan = prepare_operands(params)         # one-time prep, outside the hot path
    fwd = jax.jit(functools.partial(ecg_decoder_forward, plan=plan))
    out = jax.block_until_ready(fwd(arrays, x))

    ref = jax.block_until_ready(ecg_decoder_reference(params, x))
    assert out.shape == ref.shape == (B, nc, plan["l_out"]), f"unexpected output shape {out.shape}"
    err = float(jnp.max(jnp.abs(out - ref)))
    assert err < 2e-3, f"max abs err {err}"

    print("KERNEL_OK")
</pallas_src>

<mosaic_0001>
module attributes {stable_mosaic.version = 11 : i64} {
  func.func @kernel(%arg0: memref<2x80x10xf32, #tpu.memory_space<vmem>>, %arg1: memref<64x80xf32, #tpu.memory_space<vmem>>, %arg2: memref<244x64xf32, #tpu.memory_space<vmem>>, %arg3: memref<64x5xf32, #tpu.memory_space<vmem>>, %arg4: memref<40x20xbf16, #tpu.memory_space<vmem>>, %arg5: memref<80x40xbf16, #tpu.memory_space<vmem>>, %arg6: memref<160x80xbf16, #tpu.memory_space<vmem>>, %arg7: memref<320x160xbf16, #tpu.memory_space<vmem>>, %arg8: memref<640x320xbf16, #tpu.memory_space<vmem>>, %arg9: memref<2x1x320xf32, #tpu.memory_space<vmem>>) attributes {dimension_semantics = [], scalar_prefetch = 0 : i64, scratch_operands = 0 : i64, tpu.core_type = #tpu.core_type<tc>} {
    %c0 = arith.constant 0 : index
    %c0_0 = arith.constant 0 : index
    %0 = vector.load %arg1[%c0, %c0_0] : memref<64x80xf32, #tpu.memory_space<vmem>>, vector<64x80xf32>
    %c0_1 = arith.constant 0 : index
    %c0_2 = arith.constant 0 : index
    %1 = vector.load %arg2[%c0_1, %c0_2] : memref<244x64xf32, #tpu.memory_space<vmem>>, vector<244x64xf32>
    %c0_3 = arith.constant 0 : index
    %c0_4 = arith.constant 0 : index
    %2 = vector.load %arg3[%c0_3, %c0_4] : memref<64x5xf32, #tpu.memory_space<vmem>>, vector<64x5xf32>
    %c0_5 = arith.constant 0 : index
    %c0_6 = arith.constant 0 : index
    %3 = vector.load %arg4[%c0_5, %c0_6] : memref<40x20xbf16, #tpu.memory_space<vmem>>, vector<40x20xbf16>
    %4 = arith.extf %3 : vector<40x20xbf16> to vector<40x20xf32>
    %c0_7 = arith.constant 0 : index
    %c0_8 = arith.constant 0 : index
    %5 = vector.load %arg5[%c0_7, %c0_8] : memref<80x40xbf16, #tpu.memory_space<vmem>>, vector<80x40xbf16>
    %6 = arith.extf %5 : vector<80x40xbf16> to vector<80x40xf32>
    %c0_9 = arith.constant 0 : index
    %c0_10 = arith.constant 0 : index
    %7 = vector.load %arg6[%c0_9, %c0_10] : memref<160x80xbf16, #tpu.memory_space<vmem>>, vector<160x80xbf16>
    %8 = arith.extf %7 : vector<160x80xbf16> to vector<160x80xf32>
    %c0_11 = arith.constant 0 : index
    %c0_12 = arith.constant 0 : index
    %9 = vector.load %arg7[%c0_11, %c0_12] : memref<320x160xbf16, #tpu.memory_space<vmem>>, vector<320x160xbf16>
    %10 = arith.extf %9 : vector<320x160xbf16> to vector<320x160xf32>
    %c0_13 = arith.constant 0 : index
    %c0_14 = arith.constant 0 : index
    %11 = vector.load %arg8[%c0_13, %c0_14] : memref<640x320xbf16, #tpu.memory_space<vmem>>, vector<640x320xbf16>
    %12 = arith.extf %11 : vector<640x320xbf16> to vector<640x320xf32>
    %c0_15 = arith.constant 0 : index
    %c0_16 = arith.constant 0 : index
    %c0_17 = arith.constant 0 : index
    %13 = vector.load %arg0[%c0_15, %c0_16, %c0_17] : memref<2x80x10xf32, #tpu.memory_space<vmem>>, vector<1x80x10xf32>
    %14 = vector.shape_cast %13 : vector<1x80x10xf32> to vector<80x10xf32>
    %cst = arith.constant dense<0.000000e+00> : vector<64x10xf32>
    %15 = tpu.matmul %0, %14, %cst {dimension_numbers = #tpu.dot_dimension_numbers<[1], [0], [0], [1], [0, 0, 1, 1], [], []>} : vector<64x80xf32>, vector<80x10xf32>, vector<64x10xf32> -> vector<64x10xf32>
    %16 = vector.extract_strided_slice %2 {offsets = [0, 0], sizes = [64, 1], strides = [1, 1]} : vector<64x5xf32> to vector<64x1xf32>
    %17 = vector.broadcast %16 : vector<64x1xf32> to vector<64x10xf32>
    %18 = arith.addf %15, %17 : vector<64x10xf32>
    %cst_18 = arith.constant 0.000000e+00 : f32
    %19 = vector.broadcast %cst_18 : f32 to vector<64x10xf32>
    %20 = arith.maximumf %18, %19 : vector<64x10xf32>
    %21 = vector.extract_strided_slice %1 {offsets = [0, 0], sizes = [128, 64], strides = [1, 1]} : vector<244x64xf32> to vector<128x64xf32>
    %cst_19 = arith.constant dense<0.000000e+00> : vector<128x10xf32>
    %22 = tpu.matmul %21, %20, %cst_19 {dimension_numbers = #tpu.dot_dimension_numbers<[1], [0], [0], [1], [0, 0, 1, 1], [], []>} : vector<128x64xf32>, vector<64x10xf32>, vector<128x10xf32> -> vector<128x10xf32>
    %23 = vector.extract_strided_slice %22 {offsets = [0, 0], sizes = [32, 10], strides = [1, 1]} : vector<128x10xf32> to vector<32x10xf32>
    %24 = vector.extract_strided_slice %4 {offsets = [0, 0], sizes = [10, 20], strides = [1, 1]} : vector<40x20xf32> to vector<10x20xf32>
    %cst_20 = arith.constant dense<0.000000e+00> : vector<32x20xf32>
    %25 = tpu.matmul %23, %24, %cst_20 {dimension_numbers = #tpu.dot_dimension_numbers<[1], [0], [0], [1], [0, 0, 1, 1], [], []>} : vector<32x10xf32>, vector<10x20xf32>, vector<32x20xf32> -> vector<32x20xf32>
    %26 = vector.extract_strided_slice %22 {offsets = [32, 0], sizes = [32, 10], strides = [1, 1]} : vector<128x10xf32> to vector<32x10xf32>
    %27 = vector.extract_strided_slice %4 {offsets = [10, 0], sizes = [10, 20], strides = [1, 1]} : vector<40x20xf32> to vector<10x20xf32>
    %cst_21 = arith.constant dense<0.000000e+00> : vector<32x20xf32>
    %28 = tpu.matmul %26, %27, %cst_21 {dimension_numbers = #tpu.dot_dimension_numbers<[1], [0], [0], [1], [0, 0, 1, 1], [], []>} : vector<32x10xf32>, vector<10x20xf32>, vector<32x20xf32> -> vector<32x20xf32>
    %29 = arith.addf %25, %28 : vector<32x20xf32>
    %30 = vector.extract_strided_slice %22 {offsets = [64, 0], sizes = [32, 10], strides = [1, 1]} : vector<128x10xf32> to vector<32x10xf32>
    %31 = vector.extract_strided_slice %4 {offsets = [20, 0], sizes = [10, 20], strides = [1, 1]} : vector<40x20xf32> to vector<10x20xf32>
    %cst_22 = arith.constant dense<0.000000e+00> : vector<32x20xf32>
    %32 = tpu.matmul %30, %31, %cst_22 {dimension_numbers = #tpu.dot_dimension_numbers<[1], [0], [0], [1], [0, 0, 1, 1], [], []>} : vector<32x10xf32>, vector<10x20xf32>, vector<32x20xf32> -> vector<32x20xf32>
    %33 = arith.addf %29, %32 : vector<32x20xf32>
    %34 = vector.extract_strided_slice %22 {offsets = [96, 0], sizes = [32, 10], strides = [1, 1]} : vector<128x10xf32> to vector<32x10xf32>
    %35 = vector.extract_strided_slice %4 {offsets = [30, 0], sizes = [10, 20], strides = [1, 1]} : vector<40x20xf32> to vector<10x20xf32>
    %cst_23 = arith.constant dense<0.000000e+00> : vector<32x20xf32>
    %36 = tpu.matmul %34, %35, %cst_23 {dimension_numbers = #tpu.dot_dimension_numbers<[1], [0], [0], [1], [0, 0, 1, 1], [], []>} : vector<32x10xf32>, vector<10x20xf32>, vector<32x20xf32> -> vector<32x20xf32>
    %37 = arith.addf %33, %36 : vector<32x20xf32>
    %38 = vector.extract_strided_slice %2 {offsets = [0, 1], sizes = [32, 1], strides = [1, 1]} : vector<64x5xf32> to vector<32x1xf32>
    %39 = vector.broadcast %38 : vector<32x1xf32> to vector<32x20xf32>
    %40 = arith.addf %37, %39 : vector<32x20xf32>
    %cst_24 = arith.constant 0.000000e+00 : f32
    %41 = vector.broadcast %cst_24 : f32 to vector<32x20xf32>
    %42 = arith.maximumf %40, %41 : vector<32x20xf32>
    %43 = vector.extract_strided_slice %1 {offsets = [128, 0], sizes = [64, 32], strides = [1, 1]} : vector<244x64xf32> to vector<64x32xf32>
    %cst_25 = arith.constant dense<0.000000e+00> : vector<64x20xf32>
    %44 = tpu.matmul %43, %42, %cst_25 {dimension_numbers = #tpu.dot_dimension_numbers<[1], [0], [0], [1], [0, 0, 1, 1], [], []>} : vector<64x32xf32>, vector<32x20xf32>, vector<64x20xf32> -> vector<64x20xf32>
    %45 = vector.extract_strided_slice %44 {offsets = [0, 0], sizes = [16, 20], strides = [1, 1]} : vector<64x20xf32> to vector<16x20xf32>
    %46 = vector.extract_strided_slice %6 {offsets = [0, 0], sizes = [20, 40], strides = [1, 1]} : vector<80x40xf32> to vector<20x40xf32>
    %cst_26 = arith.constant dense<0.000000e+00> : vector<16x40xf32>
    %47 = tpu.matmul %45, %46, %cst_26 {dimension_numbers = #tpu.dot_dimension_numbers<[1], [0], [0], [1], [0, 0, 1, 1], [], []>} : vector<16x20xf32>, vector<20x40xf32>, vector<16x40xf32> -> vector<16x40xf32>
    %48 = vector.extract_strided_slice %44 {offsets = [16, 0], sizes = [16, 20], strides = [1, 1]} : vector<64x20xf32> to vector<16x20xf32>
    %49 = vector.extract_strided_slice %6 {offsets = [20, 0], sizes = [20, 40], strides = [1, 1]} : vector<80x40xf32> to vector<20x40xf32>
    %cst_27 = arith.constant dense<0.000000e+00> : vector<16x40xf32>
    %50 = tpu.matmul %48, %49, %cst_27 {dimension_numbers = #tpu.dot_dimension_numbers<[1], [0], [0], [1], [0, 0, 1, 1], [], []>} : vector<16x20xf32>, vector<20x40xf32>, vector<16x40xf32> -> vector<16x40xf32>
    %51 = arith.addf %47, %50 : vector<16x40xf32>
    %52 = vector.extract_strided_slice %44 {offsets = [32, 0], sizes = [16, 20], strides = [1, 1]} : vector<64x20xf32> to vector<16x20xf32>
    %53 = vector.extract_strided_slice %6 {offsets = [40, 0], sizes = [20, 40], strides = [1, 1]} : vector<80x40xf32> to vector<20x40xf32>
    %cst_28 = arith.constant dense<0.000000e+00> : vector<16x40xf32>
    %54 = tpu.matmul %52, %53, %cst_28 {dimension_numbers = #tpu.dot_dimension_numbers<[1], [0], [0], [1], [0, 0, 1, 1], [], []>} : vector<16x20xf32>, vector<20x40xf32>, vector<16x40xf32> -> vector<16x40xf32>
    %55 = arith.addf %51, %54 : vector<16x40xf32>
    %56 = vector.extract_strided_slice %44 {offsets = [48, 0], sizes = [16, 20], strides = [1, 1]} : vector<64x20xf32> to vector<16x20xf32>
    %57 = vector.extract_strided_slice %6 {offsets = [60, 0], sizes = [20, 40], strides = [1, 1]} : vector<80x40xf32> to vector<20x40xf32>
    %cst_29 = arith.constant dense<0.000000e+00> : vector<16x40xf32>
    %58 = tpu.matmul %56, %57, %cst_29 {dimension_numbers = #tpu.dot_dimension_numbers<[1], [0], [0], [1], [0, 0, 1, 1], [], []>} : vector<16x20xf32>, vector<20x40xf32>, vector<16x40xf32> -> vector<16x40xf32>
    %59 = arith.addf %55, %58 : vector<16x40xf32>
    %60 = vector.extract_strided_slice %2 {offsets = [0, 2], sizes = [16, 1], strides = [1, 1]} : vector<64x5xf32> to vector<16x1xf32>
    %61 = vector.broadcast %60 : vector<16x1xf32> to vector<16x40xf32>
    %62 = arith.addf %59, %61 : vector<16x40xf32>
    %cst_30 = arith.constant 0.000000e+00 : f32
    %63 = vector.broadcast %cst_30 : f32 to vector<16x40xf32>
    %64 = arith.maximumf %62, %63 : vector<16x40xf32>
    %65 = vector.extract_strided_slice %1 {offsets = [192, 0], sizes = [32, 16], strides = [1, 1]} : vector<244x64xf32> to vector<32x16xf32>
    %cst_31 = arith.constant dense<0.000000e+00> : vector<32x40xf32>
    %66 = tpu.matmul %65, %64, %cst_31 {dimension_numbers = #tpu.dot_dimension_numbers<[1], [0], [0], [1], [0, 0, 1, 1], [], []>} : vector<32x16xf32>, vector<16x40xf32>, vector<32x40xf32> -> vector<32x40xf32>
    %67 = vector.extract_strided_slice %66 {offsets = [0, 0], sizes = [8, 40], strides = [1, 1]} : vector<32x40xf32> to vector<8x40xf32>
    %68 = vector.extract_strided_slice %8 {offsets = [0, 0], sizes = [40, 80], strides = [1, 1]} : vector<160x80xf32> to vector<40x80xf32>
    %cst_32 = arith.constant dense<0.000000e+00> : vector<8x80xf32>
    %69 = tpu.matmul %67, %68, %cst_32 {dimension_numbers = #tpu.dot_dimension_numbers<[1], [0], [0], [1], [0, 0, 1, 1], [], []>} : vector<8x40xf32>, vector<40x80xf32>, vector<8x80xf32> -> vector<8x80xf32>
    %70 = vector.extract_strided_slice %66 {offsets = [8, 0], sizes = [8, 40], strides = [1, 1]} : vector<32x40xf32> to vector<8x40xf32>
    %71 = vector.extract_strided_slice %8 {offsets = [40, 0], sizes = [40, 80], strides = [1, 1]} : vector<160x80xf32> to vector<40x80xf32>
    %cst_33 = arith.constant dense<0.000000e+00> : vector<8x80xf32>
    %72 = tpu.matmul %70, %71, %cst_33 {dimension_numbers = #tpu.dot_dimension_numbers<[1], [0], [0], [1], [0, 0, 1, 1], [], []>} : vector<8x40xf32>, vector<40x80xf32>, vector<8x80xf32> -> vector<8x80xf32>
    %73 = arith.addf %69, %72 : vector<8x80xf32>
    %74 = vector.extract_strided_slice %66 {offsets = [16, 0], sizes = [8, 40], strides = [1, 1]} : vector<32x40xf32> to vector<8x40xf32>
    %75 = vector.extract_strided_slice %8 {offsets = [80, 0], sizes = [40, 80], strides = [1, 1]} : vector<160x80xf32> to vector<40x80xf32>
    %cst_34 = arith.constant dense<0.000000e+00> : vector<8x80xf32>
    %76 = tpu.matmul %74, %75, %cst_34 {dimension_numbers = #tpu.dot_dimension_numbers<[1], [0], [0], [1], [0, 0, 1, 1], [], []>} : vector<8x40xf32>, vector<40x80xf32>, vector<8x80xf32> -> vector<8x80xf32>
    %77 = arith.addf %73, %76 : vector<8x80xf32>
    %78 = vector.extract_strided_slice %66 {offsets = [24, 0], sizes = [8, 40], strides = [1, 1]} : vector<32x40xf32> to vector<8x40xf32>
    %79 = vector.extract_strided_slice %8 {offsets = [120, 0], sizes = [40, 80], strides = [1, 1]} : vector<160x80xf32> to vector<40x80xf32>
    %cst_35 = arith.constant dense<0.000000e+00> : vector<8x80xf32>
    %80 = tpu.matmul %78, %79, %cst_35 {dimension_numbers = #tpu.dot_dimension_numbers<[1], [0], [0], [1], [0, 0, 1, 1], [], []>} : vector<8x40xf32>, vector<40x80xf32>, vector<8x80xf32> -> vector<8x80xf32>
    %81 = arith.addf %77, %80 : vector<8x80xf32>
    %82 = vector.extract_strided_slice %2 {offsets = [0, 3], sizes = [8, 1], strides = [1, 1]} : vector<64x5xf32> to vector<8x1xf32>
    %83 = vector.broadcast %82 : vector<8x1xf32> to vector<8x80xf32>
    %84 = arith.addf %81, %83 : vector<8x80xf32>
    %cst_36 = arith.constant 0.000000e+00 : f32
    %85 = vector.broadcast %cst_36 : f32 to vector<8x80xf32>
    %86 = arith.maximumf %84, %85 : vector<8x80xf32>
    %87 = vector.extract_strided_slice %1 {offsets = [224, 0], sizes = [16, 8], strides = [1, 1]} : vector<244x64xf32> to vector<16x8xf32>
    %cst_37 = arith.constant dense<0.000000e+00> : vector<16x80xf32>
    %88 = tpu.matmul %87, %86, %cst_37 {dimension_numbers = #tpu.dot_dimension_numbers<[1], [0], [0], [1], [0, 0, 1, 1], [], []>} : vector<16x8xf32>, vector<8x80xf32>, vector<16x80xf32> -> vector<16x80xf32>
    %89 = vector.extract_strided_slice %88 {offsets = [0, 0], sizes = [4, 80], strides = [1, 1]} : vector<16x80xf32> to vector<4x80xf32>
    %90 = vector.extract_strided_slice %10 {offsets = [0, 0], sizes = [80, 160], strides = [1, 1]} : vector<320x160xf32> to vector<80x160xf32>
    %cst_38 = arith.constant dense<0.000000e+00> : vector<4x160xf32>
    %91 = tpu.matmul %89, %90, %cst_38 {dimension_numbers = #tpu.dot_dimension_numbers<[1], [0], [0], [1], [0, 0, 1, 1], [], []>} : vector<4x80xf32>, vector<80x160xf32>, vector<4x160xf32> -> vector<4x160xf32>
    %92 = vector.extract_strided_slice %88 {offsets = [4, 0], sizes = [4, 80], strides = [1, 1]} : vector<16x80xf32> to vector<4x80xf32>
    %93 = vector.extract_strided_slice %10 {offsets = [80, 0], sizes = [80, 160], strides = [1, 1]} : vector<320x160xf32> to vector<80x160xf32>
    %cst_39 = arith.constant dense<0.000000e+00> : vector<4x160xf32>
    %94 = tpu.matmul %92, %93, %cst_39 {dimension_numbers = #tpu.dot_dimension_numbers<[1], [0], [0], [1], [0, 0, 1, 1], [], []>} : vector<4x80xf32>, vector<80x160xf32>, vector<4x160xf32> -> vector<4x160xf32>
    %95 = arith.addf %91, %94 : vector<4x160xf32>
    %96 = vector.extract_strided_slice %88 {offsets = [8, 0], sizes = [4, 80], strides = [1, 1]} : vector<16x80xf32> to vector<4x80xf32>
    %97 = vector.extract_strided_slice %10 {offsets = [160, 0], sizes = [80, 160], strides = [1, 1]} : vector<320x160xf32> to vector<80x160xf32>
    %cst_40 = arith.constant dense<0.000000e+00> : vector<4x160xf32>
    %98 = tpu.matmul %96, %97, %cst_40 {dimension_numbers = #tpu.dot_dimension_numbers<[1], [0], [0], [1], [0, 0, 1, 1], [], []>} : vector<4x80xf32>, vector<80x160xf32>, vector<4x160xf32> -> vector<4x160xf32>
    %99 = arith.addf %95, %98 : vector<4x160xf32>
    %100 = vector.extract_strided_slice %88 {offsets = [12, 0], sizes = [4, 80], strides = [1, 1]} : vector<16x80xf32> to vector<4x80xf32>
    %101 = vector.extract_strided_slice %10 {offsets = [240, 0], sizes = [80, 160], strides = [1, 1]} : vector<320x160xf32> to vector<80x160xf32>
    %cst_41 = arith.constant dense<0.000000e+00> : vector<4x160xf32>
    %102 = tpu.matmul %100, %101, %cst_41 {dimension_numbers = #tpu.dot_dimension_numbers<[1], [0], [0], [1], [0, 0, 1, 1], [], []>} : vector<4x80xf32>, vector<80x160xf32>, vector<4x160xf32> -> vector<4x160xf32>
    %103 = arith.addf %99, %102 : vector<4x160xf32>
    %104 = vector.extract_strided_slice %2 {offsets = [0, 4], sizes = [4, 1], strides = [1, 1]} : vector<64x5xf32> to vector<4x1xf32>
    %105 = vector.broadcast %104 : vector<4x1xf32> to vector<4x160xf32>
    %106 = arith.addf %103, %105 : vector<4x160xf32>
    %cst_42 = arith.constant 0.000000e+00 : f32
    %107 = vector.broadcast %cst_42 : f32 to vector<4x160xf32>
    %108 = arith.maximumf %106, %107 : vector<4x160xf32>
    %109 = vector.extract_strided_slice %1 {offsets = [240, 0], sizes = [4, 4], strides = [1, 1]} : vector<244x64xf32> to vector<4x4xf32>
    %cst_43 = arith.constant dense<0.000000e+00> : vector<4x160xf32>
    %110 = tpu.matmul %109, %108, %cst_43 {dimension_numbers = #tpu.dot_dimension_numbers<[1], [0], [0], [1], [0, 0, 1, 1], [], []>} : vector<4x4xf32>, vector<4x160xf32>, vector<4x160xf32> -> vector<4x160xf32>
    %111 = vector.extract_strided_slice %110 {offsets = [0, 0], sizes = [1, 160], strides = [1, 1]} : vector<4x160xf32> to vector<1x160xf32>
    %112 = vector.extract_strided_slice %12 {offsets = [0, 0], sizes = [160, 320], strides = [1, 1]} : vector<640x320xf32> to vector<160x320xf32>
    %cst_44 = arith.constant dense<0.000000e+00> : vector<1x320xf32>
    %113 = tpu.matmul %111, %112, %cst_44 {dimension_numbers = #tpu.dot_dimension_numbers<[1], [0], [0], [1], [0, 0, 1, 1], [], []>} : vector<1x160xf32>, vector<160x320xf32>, vector<1x320xf32> -> vector<1x320xf32>
    %114 = vector.extract_strided_slice %110 {offsets = [1, 0], sizes = [1, 160], strides = [1, 1]} : vector<4x160xf32> to vector<1x160xf32>
    %115 = vector.extract_strided_slice %12 {offsets = [160, 0], sizes = [160, 320], strides = [1, 1]} : vector<640x320xf32> to vector<160x320xf32>
    %cst_45 = arith.constant dense<0.000000e+00> : vector<1x320xf32>
    %116 = tpu.matmul %114, %115, %cst_45 {dimension_numbers = #tpu.dot_dimension_numbers<[1], [0], [0], [1], [0, 0, 1, 1], [], []>} : vector<1x160xf32>, vector<160x320xf32>, vector<1x320xf32> -> vector<1x320xf32>
    %117 = arith.addf %113, %116 : vector<1x320xf32>
    %118 = vector.extract_strided_slice %110 {offsets = [2, 0], sizes = [1, 160], strides = [1, 1]} : vector<4x160xf32> to vector<1x160xf32>
    %119 = vector.extract_strided_slice %12 {offsets = [320, 0], sizes = [160, 320], strides = [1, 1]} : vector<640x320xf32> to vector<160x320xf32>
    %cst_46 = arith.constant dense<0.000000e+00> : vector<1x320xf32>
    %120 = tpu.matmul %118, %119, %cst_46 {dimension_numbers = #tpu.dot_dimension_numbers<[1], [0], [0], [1], [0, 0, 1, 1], [], []>} : vector<1x160xf32>, vector<160x320xf32>, vector<1x320xf32> -> vector<1x320xf32>
    %121 = arith.addf %117, %120 : vector<1x320xf32>
    %122 = vector.extract_strided_slice %110 {offsets = [3, 0], sizes = [1, 160], strides = [1, 1]} : vector<4x160xf32> to vector<1x160xf32>
    %123 = vector.extract_strided_slice %12 {offsets = [480, 0], sizes = [160, 320], strides = [1, 1]} : vector<640x320xf32> to vector<160x320xf32>
    %cst_47 = arith.constant dense<0.000000e+00> : vector<1x320xf32>
    %124 = tpu.matmul %122, %123, %cst_47 {dimension_numbers = #tpu.dot_dimension_numbers<[1], [0], [0], [1], [0, 0, 1, 1], [], []>} : vector<1x160xf32>, vector<160x320xf32>, vector<1x320xf32> -> vector<1x320xf32>
    %125 = arith.addf %121, %124 : vector<1x320xf32>
    %126 = math.tanh %125 : vector<1x320xf32>
    %c0_48 = arith.constant 0 : index
    %c0_49 = arith.constant 0 : index
    %c0_50 = arith.constant 0 : index
    %127 = vector.load %arg9[%c0_48, %c0_49, %c0_50] : memref<2x1x320xf32, #tpu.memory_space<vmem>>, vector<1x1x320xf32>
    %128 = vector.shape_cast %127 : vector<1x1x320xf32> to vector<1x320xf32>
    %129 = vector.shape_cast %126 : vector<1x320xf32> to vector<1x1x320xf32>
    tpu.vector_store %arg9[%c0_48, %c0_49, %c0_50], %129 {strides = array<i32>} : memref<2x1x320xf32, #tpu.memory_space<vmem>>, vector<1x1x320xf32>,
    %c1 = arith.constant 1 : index
    %c0_51 = arith.constant 0 : index
    %c0_52 = arith.constant 0 : index
    %130 = vector.load %arg0[%c1, %c0_51, %c0_52] : memref<2x80x10xf32, #tpu.memory_space<vmem>>, vector<1x80x10xf32>
    %131 = vector.shape_cast %130 : vector<1x80x10xf32> to vector<80x10xf32>
    %cst_53 = arith.constant dense<0.000000e+00> : vector<64x10xf32>
    %132 = tpu.matmul %0, %131, %cst_53 {dimension_numbers = #tpu.dot_dimension_numbers<[1], [0], [0], [1], [0, 0, 1, 1], [], []>} : vector<64x80xf32>, vector<80x10xf32>, vector<64x10xf32> -> vector<64x10xf32>
    %133 = vector.extract_strided_slice %2 {offsets = [0, 0], sizes = [64, 1], strides = [1, 1]} : vector<64x5xf32> to vector<64x1xf32>
    %134 = vector.broadcast %133 : vector<64x1xf32> to vector<64x10xf32>
    %135 = arith.addf %132, %134 : vector<64x10xf32>
    %cst_54 = arith.constant 0.000000e+00 : f32
    %136 = vector.broadcast %cst_54 : f32 to vector<64x10xf32>
    %137 = arith.maximumf %135, %136 : vector<64x10xf32>
    %138 = vector.extract_strided_slice %1 {offsets = [0, 0], sizes = [128, 64], strides = [1, 1]} : vector<244x64xf32> to vector<128x64xf32>
    %cst_55 = arith.constant dense<0.000000e+00> : vector<128x10xf32>
    %139 = tpu.matmul %138, %137, %cst_55 {dimension_numbers = #tpu.dot_dimension_numbers<[1], [0], [0], [1], [0, 0, 1, 1], [], []>} : vector<128x64xf32>, vector<64x10xf32>, vector<128x10xf32> -> vector<128x10xf32>
    %140 = vector.extract_strided_slice %139 {offsets = [0, 0], sizes = [32, 10], strides = [1, 1]} : vector<128x10xf32> to vector<32x10xf32>
    %141 = vector.extract_strided_slice %4 {offsets = [0, 0], sizes = [10, 20], strides = [1, 1]} : vector<40x20xf32> to vector<10x20xf32>
    %cst_56 = arith.constant dense<0.000000e+00> : vector<32x20xf32>
    %142 = tpu.matmul %140, %141, %cst_56 {dimension_numbers = #tpu.dot_dimension_numbers<[1], [0], [0], [1], [0, 0, 1, 1], [], []>} : vector<32x10xf32>, vector<10x20xf32>, vector<32x20xf32> -> vector<32x20xf32>
    %143 = vector.extract_strided_slice %139 {offsets = [32, 0], sizes = [32, 10], strides = [1, 1]} : vector<128x10xf32> to vector<32x10xf32>
    %144 = vector.extract_strided_slice %4 {offsets = [10, 0], sizes = [10, 20], strides = [1, 1]} : vector<40x20xf32> to vector<10x20xf32>
    %cst_57 = arith.constant dense<0.000000e+00> : vector<32x20xf32>
    %145 = tpu.matmul %143, %144, %cst_57 {dimension_numbers = #tpu.dot_dimension_numbers<[1], [0], [0], [1], [0, 0, 1, 1], [], []>} : vector<32x10xf32>, vector<10x20xf32>, vector<32x20xf32> -> vector<32x20xf32>
    %146 = arith.addf %142, %145 : vector<32x20xf32>
    %147 = vector.extract_strided_slice %139 {offsets = [64, 0], sizes = [32, 10], strides = [1, 1]} : vector<128x10xf32> to vector<32x10xf32>
    %148 = vector.extract_strided_slice %4 {offsets = [20, 0], sizes = [10, 20], strides = [1, 1]} : vector<40x20xf32> to vector<10x20xf32>
    %cst_58 = arith.constant dense<0.000000e+00> : vector<32x20xf32>
    %149 = tpu.matmul %147, %148, %cst_58 {dimension_numbers = #tpu.dot_dimension_numbers<[1], [0], [0], [1], [0, 0, 1, 1], [], []>} : vector<32x10xf32>, vector<10x20xf32>, vector<32x20xf32> -> vector<32x20xf32>
    %150 = arith.addf %146, %149 : vector<32x20xf32>
    %151 = vector.extract_strided_slice %139 {offsets = [96, 0], sizes = [32, 10], strides = [1, 1]} : vector<128x10xf32> to vector<32x10xf32>
    %152 = vector.extract_strided_slice %4 {offsets = [30, 0], sizes = [10, 20], strides = [1, 1]} : vector<40x20xf32> to vector<10x20xf32>
    %cst_59 = arith.constant dense<0.000000e+00> : vector<32x20xf32>
    %153 = tpu.matmul %151, %152, %cst_59 {dimension_numbers = #tpu.dot_dimension_numbers<[1], [0], [0], [1], [0, 0, 1, 1], [], []>} : vector<32x10xf32>, vector<10x20xf32>, vector<32x20xf32> -> vector<32x20xf32>
    %154 = arith.addf %150, %153 : vector<32x20xf32>
    %155 = vector.extract_strided_slice %2 {offsets = [0, 1], sizes = [32, 1], strides = [1, 1]} : vector<64x5xf32> to vector<32x1xf32>
    %156 = vector.broadcast %155 : vector<32x1xf32> to vector<32x20xf32>
    %157 = arith.addf %154, %156 : vector<32x20xf32>
    %cst_60 = arith.constant 0.000000e+00 : f32
    %158 = vector.broadcast %cst_60 : f32 to vector<32x20xf32>
    %159 = arith.maximumf %157, %158 : vector<32x20xf32>
    %160 = vector.extract_strided_slice %1 {offsets = [128, 0], sizes = [64, 32], strides = [1, 1]} : vector<244x64xf32> to vector<64x32xf32>
    %cst_61 = arith.constant dense<0.000000e+00> : vector<64x20xf32>
    %161 = tpu.matmul %160, %159, %cst_61 {dimension_numbers = #tpu.dot_dimension_numbers<[1], [0], [0], [1], [0, 0, 1, 1], [], []>} : vector<64x32xf32>, vector<32x20xf32>, vector<64x20xf32> -> vector<64x20xf32>
    %162 = vector.extract_strided_slice %161 {offsets = [0, 0], sizes = [16, 20], strides = [1, 1]} : vector<64x20xf32> to vector<16x20xf32>
    %163 = vector.extract_strided_slice %6 {offsets = [0, 0], sizes = [20, 40], strides = [1, 1]} : vector<80x40xf32> to vector<20x40xf32>
    %cst_62 = arith.constant dense<0.000000e+00> : vector<16x40xf32>
    %164 = tpu.matmul %162, %163, %cst_62 {dimension_numbers = #tpu.dot_dimension_numbers<[1], [0], [0], [1], [0, 0, 1, 1], [], []>} : vector<16x20xf32>, vector<20x40xf32>, vector<16x40xf32> -> vector<16x40xf32>
    %165 = vector.extract_strided_slice %161 {offsets = [16, 0], sizes = [16, 20], strides = [1, 1]} : vector<64x20xf32> to vector<16x20xf32>
    %166 = vector.extract_strided_slice %6 {offsets = [20, 0], sizes = [20, 40], strides = [1, 1]} : vector<80x40xf32> to vector<20x40xf32>
    %cst_63 = arith.constant dense<0.000000e+00> : vector<16x40xf32>
    %167 = tpu.matmul %165, %166, %cst_63 {dimension_numbers = #tpu.dot_dimension_numbers<[1], [0], [0], [1], [0, 0, 1, 1], [], []>} : vector<16x20xf32>, vector<20x40xf32>, vector<16x40xf32> -> vector<16x40xf32>
    %168 = arith.addf %164, %167 : vector<16x40xf32>
    %169 = vector.extract_strided_slice %161 {offsets = [32, 0], sizes = [16, 20], strides = [1, 1]} : vector<64x20xf32> to vector<16x20xf32>
    %170 = vector.extract_strided_slice %6 {offsets = [40, 0], sizes = [20, 40], strides = [1, 1]} : vector<80x40xf32> to vector<20x40xf32>
    %cst_64 = arith.constant dense<0.000000e+00> : vector<16x40xf32>
    %171 = tpu.matmul %169, %170, %cst_64 {dimension_numbers = #tpu.dot_dimension_numbers<[1], [0], [0], [1], [0, 0, 1, 1], [], []>} : vector<16x20xf32>, vector<20x40xf32>, vector<16x40xf32> -> vector<16x40xf32>
    %172 = arith.addf %168, %171 : vector<16x40xf32>
    %173 = vector.extract_strided_slice %161 {offsets = [48, 0], sizes = [16, 20], strides = [1, 1]} : vector<64x20xf32> to vector<16x20xf32>
    %174 = vector.extract_strided_slice %6 {offsets = [60, 0], sizes = [20, 40], strides = [1, 1]} : vector<80x40xf32> to vector<20x40xf32>
    %cst_65 = arith.constant dense<0.000000e+00> : vector<16x40xf32>
    %175 = tpu.matmul %173, %174, %cst_65 {dimension_numbers = #tpu.dot_dimension_numbers<[1], [0], [0], [1], [0, 0, 1, 1], [], []>} : vector<16x20xf32>, vector<20x40xf32>, vector<16x40xf32> -> vector<16x40xf32>
    %176 = arith.addf %172, %175 : vector<16x40xf32>
    %177 = vector.extract_strided_slice %2 {offsets = [0, 2], sizes = [16, 1], strides = [1, 1]} : vector<64x5xf32> to vector<16x1xf32>
    %178 = vector.broadcast %177 : vector<16x1xf32> to vector<16x40xf32>
    %179 = arith.addf %176, %178 : vector<16x40xf32>
    %cst_66 = arith.constant 0.000000e+00 : f32
    %180 = vector.broadcast %cst_66 : f32 to vector<16x40xf32>
    %181 = arith.maximumf %179, %180 : vector<16x40xf32>
    %182 = vector.extract_strided_slice %1 {offsets = [192, 0], sizes = [32, 16], strides = [1, 1]} : vector<244x64xf32> to vector<32x16xf32>
    %cst_67 = arith.constant dense<0.000000e+00> : vector<32x40xf32>
    %183 = tpu.matmul %182, %181, %cst_67 {dimension_numbers = #tpu.dot_dimension_numbers<[1], [0], [0], [1], [0, 0, 1, 1], [], []>} : vector<32x16xf32>, vector<16x40xf32>, vector<32x40xf32> -> vector<32x40xf32>
    %184 = vector.extract_strided_slice %183 {offsets = [0, 0], sizes = [8, 40], strides = [1, 1]} : vector<32x40xf32> to vector<8x40xf32>
    %185 = vector.extract_strided_slice %8 {offsets = [0, 0], sizes = [40, 80], strides = [1, 1]} : vector<160x80xf32> to vector<40x80xf32>
    %cst_68 = arith.constant dense<0.000000e+00> : vector<8x80xf32>
    %186 = tpu.matmul %184, %185, %cst_68 {dimension_numbers = #tpu.dot_dimension_numbers<[1], [0], [0], [1], [0, 0, 1, 1], [], []>} : vector<8x40xf32>, vector<40x80xf32>, vector<8x80xf32> -> vector<8x80xf32>
    %187 = vector.extract_strided_slice %183 {offsets = [8, 0], sizes = [8, 40], strides = [1, 1]} : vector<32x40xf32> to vector<8x40xf32>
    %188 = vector.extract_strided_slice %8 {offsets = [40, 0], sizes = [40, 80], strides = [1, 1]} : vector<160x80xf32> to vector<40x80xf32>
    %cst_69 = arith.constant dense<0.000000e+00> : vector<8x80xf32>
    %189 = tpu.matmul %187, %188, %cst_69 {dimension_numbers = #tpu.dot_dimension_numbers<[1], [0], [0], [1], [0, 0, 1, 1], [], []>} : vector<8x40xf32>, vector<40x80xf32>, vector<8x80xf32> -> vector<8x80xf32>
    %190 = arith.addf %186, %189 : vector<8x80xf32>
    %191 = vector.extract_strided_slice %183 {offsets = [16, 0], sizes = [8, 40], strides = [1, 1]} : vector<32x40xf32> to vector<8x40xf32>
    %192 = vector.extract_strided_slice %8 {offsets = [80, 0], sizes = [40, 80], strides = [1, 1]} : vector<160x80xf32> to vector<40x80xf32>
    %cst_70 = arith.constant dense<0.000000e+00> : vector<8x80xf32>
    %193 = tpu.matmul %191, %192, %cst_70 {dimension_numbers = #tpu.dot_dimension_numbers<[1], [0], [0], [1], [0, 0, 1, 1], [], []>} : vector<8x40xf32>, vector<40x80xf32>, vector<8x80xf32> -> vector<8x80xf32>
    %194 = arith.addf %190, %193 : vector<8x80xf32>
    %195 = vector.extract_strided_slice %183 {offsets = [24, 0], sizes = [8, 40], strides = [1, 1]} : vector<32x40xf32> to vector<8x40xf32>
    %196 = vector.extract_strided_slice %8 {offsets = [120, 0], sizes = [40, 80], strides = [1, 1]} : vector<160x80xf32> to vector<40x80xf32>
    %cst_71 = arith.constant dense<0.000000e+00> : vector<8x80xf32>
    %197 = tpu.matmul %195, %196, %cst_71 {dimension_numbers = #tpu.dot_dimension_numbers<[1], [0], [0], [1], [0, 0, 1, 1], [], []>} : vector<8x40xf32>, vector<40x80xf32>, vector<8x80xf32> -> vector<8x80xf32>
    %198 = arith.addf %194, %197 : vector<8x80xf32>
    %199 = vector.extract_strided_slice %2 {offsets = [0, 3], sizes = [8, 1], strides = [1, 1]} : vector<64x5xf32> to vector<8x1xf32>
    %200 = vector.broadcast %199 : vector<8x1xf32> to vector<8x80xf32>
    %201 = arith.addf %198, %200 : vector<8x80xf32>
    %cst_72 = arith.constant 0.000000e+00 : f32
    %202 = vector.broadcast %cst_72 : f32 to vector<8x80xf32>
    %203 = arith.maximumf %201, %202 : vector<8x80xf32>
    %204 = vector.extract_strided_slice %1 {offsets = [224, 0], sizes = [16, 8], strides = [1, 1]} : vector<244x64xf32> to vector<16x8xf32>
    %cst_73 = arith.constant dense<0.000000e+00> : vector<16x80xf32>
    %205 = tpu.matmul %204, %203, %cst_73 {dimension_numbers = #tpu.dot_dimension_numbers<[1], [0], [0], [1], [0, 0, 1, 1], [], []>} : vector<16x8xf32>, vector<8x80xf32>, vector<16x80xf32> -> vector<16x80xf32>
    %206 = vector.extract_strided_slice %205 {offsets = [0, 0], sizes = [4, 80], strides = [1, 1]} : vector<16x80xf32> to vector<4x80xf32>
    %207 = vector.extract_strided_slice %10 {offsets = [0, 0], sizes = [80, 160], strides = [1, 1]} : vector<320x160xf32> to vector<80x160xf32>
    %cst_74 = arith.constant dense<0.000000e+00> : vector<4x160xf32>
    %208 = tpu.matmul %206, %207, %cst_74 {dimension_numbers = #tpu.dot_dimension_numbers<[1], [0], [0], [1], [0, 0, 1, 1], [], []>} : vector<4x80xf32>, vector<80x160xf32>, vector<4x160xf32> -> vector<4x160xf32>
    %209 = vector.extract_strided_slice %205 {offsets = [4, 0], sizes = [4, 80], strides = [1, 1]} : vector<16x80xf32> to vector<4x80xf32>
    %210 = vector.extract_strided_slice %10 {offsets = [80, 0], sizes = [80, 160], strides = [1, 1]} : vector<320x160xf32> to vector<80x160xf32>
    %cst_75 = arith.constant dense<0.000000e+00> : vector<4x160xf32>
    %211 = tpu.matmul %209, %210, %cst_75 {dimension_numbers = #tpu.dot_dimension_numbers<[1], [0], [0], [1], [0, 0, 1, 1], [], []>} : vector<4x80xf32>, vector<80x160xf32>, vector<4x160xf32> -> vector<4x160xf32>
    %212 = arith.addf %208, %211 : vector<4x160xf32>
    %213 = vector.extract_strided_slice %205 {offsets = [8, 0], sizes = [4, 80], strides = [1, 1]} : vector<16x80xf32> to vector<4x80xf32>
    %214 = vector.extract_strided_slice %10 {offsets = [160, 0], sizes = [80, 160], strides = [1, 1]} : vector<320x160xf32> to vector<80x160xf32>
    %cst_76 = arith.constant dense<0.000000e+00> : vector<4x160xf32>
    %215 = tpu.matmul %213, %214, %cst_76 {dimension_numbers = #tpu.dot_dimension_numbers<[1], [0], [0], [1], [0, 0, 1, 1], [], []>} : vector<4x80xf32>, vector<80x160xf32>, vector<4x160xf32> -> vector<4x160xf32>
    %216 = arith.addf %212, %215 : vector<4x160xf32>
    %217 = vector.extract_strided_slice %205 {offsets = [12, 0], sizes = [4, 80], strides = [1, 1]} : vector<16x80xf32> to vector<4x80xf32>
    %218 = vector.extract_strided_slice %10 {offsets = [240, 0], sizes = [80, 160], strides = [1, 1]} : vector<320x160xf32> to vector<80x160xf32>
    %cst_77 = arith.constant dense<0.000000e+00> : vector<4x160xf32>
    %219 = tpu.matmul %217, %218, %cst_77 {dimension_numbers = #tpu.dot_dimension_numbers<[1], [0], [0], [1], [0, 0, 1, 1], [], []>} : vector<4x80xf32>, vector<80x160xf32>, vector<4x160xf32> -> vector<4x160xf32>
    %220 = arith.addf %216, %219 : vector<4x160xf32>
    %221 = vector.extract_strided_slice %2 {offsets = [0, 4], sizes = [4, 1], strides = [1, 1]} : vector<64x5xf32> to vector<4x1xf32>
    %222 = vector.broadcast %221 : vector<4x1xf32> to vector<4x160xf32>
    %223 = arith.addf %220, %222 : vector<4x160xf32>
    %cst_78 = arith.constant 0.000000e+00 : f32
    %224 = vector.broadcast %cst_78 : f32 to vector<4x160xf32>
    %225 = arith.maximumf %223, %224 : vector<4x160xf32>
    %226 = vector.extract_strided_slice %1 {offsets = [240, 0], sizes = [4, 4], strides = [1, 1]} : vector<244x64xf32> to vector<4x4xf32>
    %cst_79 = arith.constant dense<0.000000e+00> : vector<4x160xf32>
    %227 = tpu.matmul %226, %225, %cst_79 {dimension_numbers = #tpu.dot_dimension_numbers<[1], [0], [0], [1], [0, 0, 1, 1], [], []>} : vector<4x4xf32>, vector<4x160xf32>, vector<4x160xf32> -> vector<4x160xf32>
    %228 = vector.extract_strided_slice %227 {offsets = [0, 0], sizes = [1, 160], strides = [1, 1]} : vector<4x160xf32> to vector<1x160xf32>
    %229 = vector.extract_strided_slice %12 {offsets = [0, 0], sizes = [160, 320], strides = [1, 1]} : vector<640x320xf32> to vector<160x320xf32>
    %cst_80 = arith.constant dense<0.000000e+00> : vector<1x320xf32>
    %230 = tpu.matmul %228, %229, %cst_80 {dimension_numbers = #tpu.dot_dimension_numbers<[1], [0], [0], [1], [0, 0, 1, 1], [], []>} : vector<1x160xf32>, vector<160x320xf32>, vector<1x320xf32> -> vector<1x320xf32>
    %231 = vector.extract_strided_slice %227 {offsets = [1, 0], sizes = [1, 160], strides = [1, 1]} : vector<4x160xf32> to vector<1x160xf32>
    %232 = vector.extract_strided_slice %12 {offsets = [160, 0], sizes = [160, 320], strides = [1, 1]} : vector<640x320xf32> to vector<160x320xf32>
    %cst_81 = arith.constant dense<0.000000e+00> : vector<1x320xf32>
    %233 = tpu.matmul %231, %232, %cst_81 {dimension_numbers = #tpu.dot_dimension_numbers<[1], [0], [0], [1], [0, 0, 1, 1], [], []>} : vector<1x160xf32>, vector<160x320xf32>, vector<1x320xf32> -> vector<1x320xf32>
    %234 = arith.addf %230, %233 : vector<1x320xf32>
    %235 = vector.extract_strided_slice %227 {offsets = [2, 0], sizes = [1, 160], strides = [1, 1]} : vector<4x160xf32> to vector<1x160xf32>
    %236 = vector.extract_strided_slice %12 {offsets = [320, 0], sizes = [160, 320], strides = [1, 1]} : vector<640x320xf32> to vector<160x320xf32>
    %cst_82 = arith.constant dense<0.000000e+00> : vector<1x320xf32>
    %237 = tpu.matmul %235, %236, %cst_82 {dimension_numbers = #tpu.dot_dimension_numbers<[1], [0], [0], [1], [0, 0, 1, 1], [], []>} : vector<1x160xf32>, vector<160x320xf32>, vector<1x320xf32> -> vector<1x320xf32>
    %238 = arith.addf %234, %237 : vector<1x320xf32>
    %239 = vector.extract_strided_slice %227 {offsets = [3, 0], sizes = [1, 160], strides = [1, 1]} : vector<4x160xf32> to vector<1x160xf32>
    %240 = vector.extract_strided_slice %12 {offsets = [480, 0], sizes = [160, 320], strides = [1, 1]} : vector<640x320xf32> to vector<160x320xf32>
    %cst_83 = arith.constant dense<0.000000e+00> : vector<1x320xf32>
    %241 = tpu.matmul %239, %240, %cst_83 {dimension_numbers = #tpu.dot_dimension_numbers<[1], [0], [0], [1], [0, 0, 1, 1], [], []>} : vector<1x160xf32>, vector<160x320xf32>, vector<1x320xf32> -> vector<1x320xf32>
    %242 = arith.addf %238, %241 : vector<1x320xf32>
    %243 = math.tanh %242 : vector<1x320xf32>
    %c1_84 = arith.constant 1 : index
    %c0_85 = arith.constant 0 : index
    %c0_86 = arith.constant 0 : index
    %244 = vector.load %arg9[%c1_84, %c0_85, %c0_86] : memref<2x1x320xf32, #tpu.memory_space<vmem>>, vector<1x1x320xf32>
    %245 = vector.shape_cast %244 : vector<1x1x320xf32> to vector<1x320xf32>
    %246 = vector.shape_cast %243 : vector<1x320xf32> to vector<1x1x320xf32>
    tpu.vector_store %arg9[%c1_84, %c0_85, %c0_86], %246 {strides = array<i32>} : memref<2x1x320xf32, #tpu.memory_space<vmem>>, vector<1x1x320xf32>,
    return
  }
}

</mosaic_0001>

<bundles_post_ra>
// kernel: ecg_decoder_forward.1
= control target key start
LH: loop header
LB: loop body
LE: loop exit
PB: predicated region body
PF: predicated region fallthrough
CT: control target
= control target key end

     0   :  { %vm720_vm0 = vcmask 654336   ;;  %v8773_v5 = vmov 0   ;;  %s10973_s0 = inlined_call_operand.vmem [shape: f32[2,80,10], index: 0, kind: input, shape index: {}]   ;;  %s10974_s1 = inlined_call_operand.vmem [shape: f32[64,80], index: 1, kind: input, shape index: {}]   ;;  %s10975_s2 = inlined_call_operand.vmem [shape: f32[244,64], index: 2, kind: input, shape index: {}]   ;;  %s10976_s3 = inlined_call_operand.vmem [shape: f32[64,5], index: 3, kind: input, shape index: {}]   ;;  %s10977_s4 = inlined_call_operand.vmem [shape: bf16[40,20], index: 4, kind: input, shape index: {}]   ;;  %s10978_s5 = inlined_call_operand.vmem [shape: bf16[80,40], index: 5, kind: input, shape index: {}]   ;;  %s10979_s6 = inlined_call_operand.vmem [shape: bf16[160,80], index: 6, kind: input, shape index: {}]   ;;  %s10980_s7 = inlined_call_operand.vmem [shape: bf16[320,160], index: 7, kind: input, shape index: {}]   ;;  %s10981_s8 = inlined_call_operand.vmem [shape: bf16[640,320], index: 8, kind: input, shape index: {}]   ;;  %s10982_s9 = inlined_call_operand.hbm [shape: f32[2,1,320], index: 9, kind: output, shape index: {}]  }
   0x1   :  { %v670_v0 = vld [vmem:[%s10973_s0] sm:$0xff]  ;;  %v671_v1 = vld [vmem:[%s10973_s0 + $0x8] sm:$0xff]  ;;  %v672_v2 = vld [vmem:[%s10973_s0 + $0x10] sm:$0xff]  ;;  %8453 = vset.pattern.permute.xlu0 %v8773_v5  ;;  %8454 = vset.pattern.permute.xlu1 %v8773_v5 }
   0x2   :  { %v7079_v3 = vpack.c.bf16 %v671_v1, %v670_v0  ;;  %v673_v4 = vld [vmem:[%s10973_s0 + $0x18] sm:$0xff]  ;;  %v674_v7 = vld [vmem:[%s10973_s0 + $0x20] sm:$0xff]  ;;  %v675_v8 = vld [vmem:[%s10973_s0 + $0x28] sm:$0xff] }
   0x3   :  { %v7083_v6 = vpack.c.bf16 %v673_v4, %v672_v2  ;;  %v33_v9 = vld [vmem:[%s10974_s1] sm:$0xff]  ;;  %v7087_v10 = vpack.c.bf16 %v675_v8, %v674_v7  ;;  %v676_v11 = vld [vmem:[%s10973_s0 + $0x30] sm:$0xff]  ;;  %v677_v12 = vld [vmem:[%s10973_s0 + $0x38] sm:$0xff] }
   0x4   :  { %7080 = vmatprep.subr.bf16.mxu0 %v7079_v3  ;;  %6629 = vmatprep.mubr.msk.f32.mxu0 %vm720_vm0, %v33_v9  ;;  %v8867_v13 = vld [vmem:[%s10976_s3] sm:$0xff]  ;;  %v8872_v14 = vld [vmem:[%s10976_s3 + $0x10] sm:$0xff]  ;;  %v679_v16 = vld [vmem:[%s10973_s0 + $0x48] sm:$0xff]  ;;  %v7091_v19 = vpack.c.bf16 %v677_v12, %v676_v11 }
   0x5   :  { %7082 = vmatpush3.bf16.msra.mxu0 %v7079_v3  ;;  %682 = vperm.xlu0 %8453, %v8867_v13   ;;  %v678_v15 = vld [vmem:[%s10973_s0 + $0x40] sm:$0xff]  ;;  %v8885_v17 = vld [vmem:[%s10976_s3 + $0x8] sm:$0xff]  ;;  %v8890_v18 = vld [vmem:[%s10976_s3 + $0x18] sm:$0xff] }
   0x6   :  { %7084 = vmatprep.subr.bf16.mxu0 %v7083_v6  ;;  %692 = vperm.xlu1 %8454, %v8872_v14   ;;  %v76_v20 = vld [vmem:[%s10976_s3 + $0x20] sm:$0xff]  ;;  %v77_v21 = vld [vmem:[%s10976_s3 + $0x28] sm:$0xff]  ;;  %v7095_v22 = vpack.c.bf16 %v679_v16, %v678_v15  ;;  %v78_v23 = vld [vmem:[%s10976_s3 + $0x30] sm:$0xff] }
   0x7   :  { %v79_v24 = vld [vmem:[%s10976_s3 + $0x38] sm:$0xff]  ;;  %v34_v25 = vld [vmem:[%s10974_s1 + $0x8] sm:$0xff]  ;;  %v35_v26 = vld [vmem:[%s10974_s1 + $0x10] sm:$0xff] }
   0x8   :  { %v36_v27 = vld [vmem:[%s10974_s1 + $0x18] sm:$0xff]  ;;  %v37_v28 = vld [vmem:[%s10974_s1 + $0x20] sm:$0xff]  ;;  %v38_v29 = vld [vmem:[%s10974_s1 + $0x28] sm:$0xff] }
   0x9   :  { %7086 = vmatpush3.bf16.msra.mxu0 %v7083_v6  ;;  %687 = vperm.xlu0 %8453, %v8885_v17   ;;  %v39_v30 = vld [vmem:[%s10974_s1 + $0x30] sm:$0xff]  ;;  %v40_v31 = vld [vmem:[%s10974_s1 + $0x38] sm:$0xff] }
   0xa   :  { %7088 = vmatprep.subr.bf16.mxu0 %v7087_v10  ;;  %697 = vperm.xlu1 %8454, %v8890_v18  }
   0xd   :  { %7090 = vmatpush3.bf16.msra.mxu0 %v7087_v10  ;;  %702 = vperm.xlu0 %8453, %v76_v20  }
   0xe   :  { %7092 = vmatprep.subr.bf16.mxu0 %v7091_v19  ;;  %707 = vperm.xlu1 %8454, %v77_v21  }
  0x11   :  { %7094 = vmatpush3.bf16.msra.mxu0 %v7091_v19  ;;  %712 = vperm.xlu0 %8453, %v78_v23  }
  0x12   :  { %7096 = vmatprep.subr.bf16.mxu0 %v7095_v22  ;;  %717 = vperm.xlu1 %8454, %v79_v24  }
  0x15   :  { %7098 = vmatpush3.bf16.msra.mxu0 %v7095_v22 }
  0x18   :  { %6630 = vmatmul.mubr.msk.f32.vlgmr.msra.gmra.mrb[0].mxu0 %vm720_vm0, %v34_v25 }
  0x19   :  { %6632 = vmatprep.mubr.msk.f32.mxu0 %vm720_vm0, %v35_v26 }
  0x1c   :  { %6633 = vmatmul.mubr.msk.f32.gmra.mrb[2].mxu0 %vm720_vm0, %v36_v27 }
  0x1d   :  { %6635 = vmatprep.mubr.msk.f32.mxu0 %vm720_vm0, %v37_v28 }
  0x20   :  { %6636 = vmatmul.mubr.msk.f32.gmra.mrb[4].mxu0 %vm720_vm0, %v38_v29 }
  0x21   :  { %6638 = vmatprep.mubr.msk.f32.mxu0 %vm720_vm0, %v39_v30 }
  0x24   :  { %6639 = vmatmul.mubr.msk.f32.gmra.mrb[6].mxu0 %vm720_vm0, %v40_v31 }
  0x25   :  { %14 = vsyncpa [#allocation3], 0  ;;  %v8937_v32 = vld [vmem:[%s10975_s2] sm:$0xff]  ;;  %vm858_vm1 = vcmask 523264   ;;  %v8968_v5 = vld [vmem:[%s10975_s2 + $0x8] sm:$0xff]  ;;  %vm1054_vm2 = vcmask 1045504  }
  0x26   :  { %6657 = vmatprep.mubr.msk.f32.mxu1 %vm858_vm1, %v8937_v32  ;;  %v8973_v6 = vld [vmem:[%s10975_s2 + $0x10] sm:$0xff]  ;;  %v8982_v7 = vld [vmem:[%s10975_s2 + $0x18] sm:$0xff]  ;;  %v8987_v8 = vld [vmem:[%s10975_s2 + $0x20] sm:$0xff]  ;;  %vm1072_vm3 = vcmask 1041408   ;;  %vm8774_vm4 = vmmov 1   ;;  %vm1260_vm6 = vcmask 1043456  }
  0x27   :  { %v8996_v9 = vld [vmem:[%s10975_s2 + $0x28] sm:$0xff]  ;;  %v9001_v10 = vld [vmem:[%s10975_s2 + $0x30] sm:$0xff]  ;;  %v9010_v11 = vld [vmem:[%s10975_s2 + $0x38] sm:$0xff]  ;;  %vm1059_vm7 = vcmask 80896   ;;  %vm1500_vm8 = vcmask 261120   ;;  %vm1640_vm9 = vcmask 162816  }
  0x28   :  { %v9015_v12 = vld [vmem:[%s10975_s2 + $0x40] sm:$0xff]  ;;  %v9024_v15 = vld [vmem:[%s10975_s2 + $0x48] sm:$0xff]  ;;  %v9029_v16 = vld [vmem:[%s10975_s2 + $0x50] sm:$0xff]  ;;  %vm1999_vm10 = vcmask 130048   ;;  %vm8779_vm11 = vmmov 0   ;;  %vm2097_vm12 = vcmask 326656  }
  0x29   :  { %v9038_v19 = vld [vmem:[%s10975_s2 + $0x58] sm:$0xff]  ;;  %v9043_v20 = vld [vmem:[%s10975_s2 + $0x60] sm:$0xff]  ;;  %v9052_v21 = vld [vmem:[%s10975_s2 + $0x68] sm:$0xff]  ;;  %vm2398_vm13 = vcmask 64512   ;;  %vm2788_vm14 = vcmask 31744  }
  0x2a   :  { %v9057_v22 = vld [vmem:[%s10975_s2 + $0x70] sm:$0xff]  ;;  %v9066_v23 = vld [vmem:[%s10975_s2 + $0x78] sm:$0xff]  ;;  %v9073_v24 = vld [vmem:[%s10977_s4] sm:$0xff]  }
  0x2b   :  { %v6333_v25 = vld [vmem:[%s10977_s4 + $0x8] sm:$0xff]   ;;  %v6268_v26 = vunpack.c.h.bf16 %v9073_v24  ;;  %vm9082_vm5 = vmpackc.low %vm1072_vm3, %vm8774_vm4 }
  0x2c   :  { %v6271_v27 = vunpack.c.l.bf16 %v6333_v25 }
  0x2d   :  { %v1055_v28 = vrot.slane %v6268_v26, 2 }
  0x2e   :  { %v1056_v29 = vrot.slane %v6271_v27, 2 }
  0x30   :  { %v1057_v30 = vsel %vm1054_vm2, %v1055_v28, %v1056_v29 }
  0x31   :  { %v9079_v31 = vpack.c.bf16 %v1056_v29, %v1057_v30 }
  0x33   :  { %7117 = vmatprep.subr.msk.bf16.mxu0 %vm9082_vm5, %v9079_v31 }
  0x34   :  { %7120 = vmatpush3.bf16.msk.msra.mxu0 %vm9082_vm5, %v9079_v31 }
  0x35   :  { %7123 = vmatprep.subr.msk.bf16.mxu0 %vm9082_vm5, %v9073_v24 }
  0x84   :  { %v8941_v33 = vpop.permute.xlu0 %682 }
  0x85   :  { %v8943_v34 = vpop.permute.xlu1 %692 }
  0x88   :  { %v8945_v35 = vpop.permute.xlu0 %687 }
  0x89   :  { %v8947_v36 = vpop.permute.xlu1 %697 }
  0x8c   :  { %v8955_v49 = vpop.permute.xlu0 %702 }
  0x8d   :  { %v8952_v46 = vpop.permute.xlu1 %707 }
  0x90   :  { %v8961_v61 = vpop.permute.xlu0 %712 }
  0x91   :  { %v8959_v58 = vpop.permute.xlu1 %717 }
  0xeb   :  { %v6631_v37 = vpop.f32.mrb[0].mxu0 }
  0xec   :  { %v817_v38 = vadd.f32 %v6631_v37, %v8945_v35  ;;  %v811_v39 = vpop.f32.mrb[1].mxu0 }
  0xed   :  { %v812_v40 = vadd.f32 %v811_v39, %v8941_v33  ;;  %v1261_v39 = vrot.slane %v6271_v27, 4 }
  0xee   :  { %v851_v41 = vmax.f32 %v817_v38, 0.0  ;;  %v6272_v38 = vunpack.c.h.bf16 %v6333_v25 }
  0xef   :  { %v850_v42 = vmax.f32 %v812_v40, 0.0  ;;  %v6634_v43 = vpop.f32.mrb[2].mxu0 }
  0xf0   :  { %v827_v44 = vadd.f32 %v6634_v43, %v8947_v36  ;;  %v821_v45 = vpop.f32.mrb[3].mxu0  ;;  %v1262_v40 = vrot.slane %v6272_v38, 4  ;;  %v84_v43 = vld [vmem:[%s10977_s4 + $0x10] sm:$0xf] }
  0xf1   :  { %v822_v47 = vadd.f32 %v821_v45, %v8943_v34  ;;  %v7099_v48 = vpack.c.bf16 %v851_v41, %v850_v42  ;;  %v1369_v45 = vrot.slane %v6272_v38, 6 }
  0xf2   :  { %v853_v50 = vmax.f32 %v827_v44, 0.0  ;;  %v1263_v41 = vsel %vm1260_vm6, %v1261_v39, %v1262_v40  ;;  %v89_v44 = vunpack.c.l.bf16 %v84_v43 }
  0xf3   :  { %v852_v51 = vmax.f32 %v822_v47, 0.0  ;;  %v6637_v52 = vpop.f32.mrb[4].mxu0  ;;  %7100 = vmatprep.subr.bf16.mxu1 %v7099_v48  ;;  %v9096_v42 = vpack.c.bf16 %v1262_v40, %v1263_v41 }
  0xf4   :  { %v837_v53 = vadd.f32 %v6637_v52, %v8952_v46  ;;  %v831_v54 = vpop.f32.mrb[5].mxu0  ;;  %7102 = vmatpush3.bf16.msra.mxu1 %v7099_v48  ;;  %v1370_v47 = vrot.slane %v89_v44, 6 }
  0xf5   :  { %v7103_v55 = vpack.c.bf16 %v853_v50, %v852_v51  ;;  %v832_v56 = vadd.f32 %v831_v54, %v8955_v49  ;;  %v8775_v50 = vmov 1  }
  0xf6   :  { %v855_v57 = vmax.f32 %v837_v53, 0.0  ;;  %v1371_v48 = vsel %vm1072_vm3, %v1369_v45, %v1370_v47  ;;  %8456 = vset.pattern.permute.xlu1 %v8775_v50  ;;  %8455 = vset.pattern.permute.xlu0 %v8775_v50 }
  0xf7   :  { %v854_v59 = vmax.f32 %v832_v56, 0.0  ;;  %v6640_v60 = vpop.f32.mrb[6].mxu0  ;;  %7104 = vmatprep.subr.bf16.mxu1 %v7103_v55  ;;  %1481 = vperm.xlu1 %8456, %v8885_v17  }
  0xf8   :  { %v847_v62 = vadd.f32 %v6640_v60, %v8959_v58  ;;  %v841_v63 = vpop.f32.mrb[7].mxu0  ;;  %7106 = vmatpush3.bf16.msra.mxu1 %v7103_v55  ;;  %1477 = vperm.xlu0 %8455, %v8867_v13   ;;  %v9117_v60 = vpack.c.bf16 %v1370_v47, %v1371_v48 }
  0xf9   :  { %v7107_v0 = vpack.c.bf16 %v855_v57, %v854_v59  ;;  %v842_v1 = vadd.f32 %v841_v63, %v8961_v61 }
  0xfa   :  { %v857_v2 = vmax.f32 %v847_v62, 0.0 }
  0xfb   :  { %v856_v3 = vmax.f32 %v842_v1, 0.0  ;;  %7108 = vmatprep.subr.bf16.mxu1 %v7107_v0  ;;  %1485 = vperm.xlu1 %8456, %v8872_v14  }
  0xfc   :  { %7110 = vmatpush3.bf16.msra.mxu1 %v7107_v0  ;;  %1489 = vperm.xlu0 %8455, %v8890_v18  }
  0xfd   :  { %v7111_v4 = vpack.c.bf16 %v857_v2, %v856_v3 }
  0xff   :  { %7112 = vmatprep.subr.bf16.mxu1 %v7111_v4 }
 0x100   :  { %7114 = vmatpush3.bf16.msra.mxu1 %v7111_v4  ;;  %v9142_v4 = vld [vmem:[%s10975_s2 + $0x80] sm:$0xff] }
 0x103   :  { %6658 = vmatmul.mubr.msk.f32.vlgmr.msra.gmra.mrb[0].mxu1 %vm858_vm1, %v8968_v5 }
 0x104   :  { %6660 = vmatprep.mubr.msk.f32.mxu1 %vm858_vm1, %v8973_v6 }
 0x107   :  { %6661 = vmatmul.mubr.msk.f32.gmra.mrb[2].mxu1 %vm858_vm1, %v8982_v7 }
 0x108   :  { %6663 = vmatprep.mubr.msk.f32.mxu1 %vm858_vm1, %v8987_v8 }
 0x10b   :  { %6664 = vmatmul.mubr.msk.f32.gmra.mrb[4].mxu1 %vm858_vm1, %v8996_v9 }
 0x10c   :  { %6666 = vmatprep.mubr.msk.f32.mxu1 %vm858_vm1, %v9001_v10 }
 0x10f   :  { %6667 = vmatmul.mubr.msk.f32.gmra.mrb[6].mxu1 %vm858_vm1, %v9010_v11 }
 0x110   :  { %6669 = vmatprep.mubr.msk.f32.mxu1 %vm858_vm1, %v9015_v12 }
 0x113   :  { %6670 = vmatmul.mubr.msk.f32.gmra.mrb[8].mxu1 %vm858_vm1, %v9024_v15 }
 0x114   :  { %6672 = vmatprep.mubr.msk.f32.mxu1 %vm858_vm1, %v9029_v16 }
 0x117   :  { %6673 = vmatmul.mubr.msk.f32.gmra.mrb[10].mxu1 %vm858_vm1, %v9038_v19 }
 0x118   :  { %6675 = vmatprep.mubr.msk.f32.mxu1 %vm858_vm1, %v9043_v20 }
 0x11b   :  { %6676 = vmatmul.mubr.msk.f32.gmra.mrb[12].mxu1 %vm858_vm1, %v9052_v21 }
 0x11c   :  { %6678 = vmatprep.mubr.msk.f32.mxu1 %vm858_vm1, %v9057_v22 }
 0x11f   :  { %6679 = vmatmul.mubr.msk.f32.gmra.mrb[14].mxu1 %vm858_vm1, %v9066_v23 }
 0x120   :  { %6729 = vmatprep.mubr.msk.f32.mxu1 %vm1500_vm8, %v9142_v4 }
 0x176   :  { %v9148_v26 = vpop.permute.xlu1 %1481 }
 0x177   :  { %v9146_v25 = vpop.permute.xlu0 %1477 }
 0x17a   :  { %v9154_v43 = vpop.permute.xlu1 %1485 }
 0x17b   :  { %v9152_v39 = vpop.permute.xlu0 %1489 }
 0x1d6   :  { %v6659_v51 = vpop.f32.mrb[0].mxu1 }
 0x1d7   :  { %v973_v52 = vpop.f32.mrb[1].mxu1 }
 0x1da   :  { %v6662_v53 = vpop.f32.mrb[2].mxu1 }
 0x1db   :  { %v983_v54 = vpop.f32.mrb[3].mxu1 }
 0x1de   :  { %v6665_v55 = vpop.f32.mrb[4].mxu1 }
 0x1df   :  { %v993_v56 = vpop.f32.mrb[5].mxu1 }
 0x1e0   :  { %6685 = vmatprep.mubr.msk.f32.mxu0 %vm1059_vm7, %v993_v56  ;;  %v9181_v56 = vld [vmem:[%s10975_s2 + $0x98] sm:$0xff] }
 0x1e1   :  { %6686 = vmatmul.mubr.msk.f32.vlgmr.msra.gmra.mrb[8].mxu0 %vm1059_vm7, %v6665_v55  ;;  %v9171_v55 = vld [vmem:[%s10975_s2 + $0x90] sm:$0xff] }
 0x1e2   :  { %v6668_v57 = vpop.f32.mrb[6].mxu1  ;;  %7126 = vmatpush3.bf16.msk.msra.mxu0 %vm9082_vm5, %v9073_v24 }
 0x1e3   :  { %v1003_v59 = vpop.f32.mrb[7].mxu1  ;;  %7129 = vmatprep.subr.msk.bf16.mxu0 %vm9082_vm5, %v9096_v42 }
 0x1e4   :  { %6688 = vmatprep.mubr.msk.f32.mxu0 %vm1059_vm7, %v1003_v59  ;;  %v9196_v59 = vld [vmem:[%s10975_s2 + $0xa8] sm:$0xff] }
 0x1e5   :  { %6689 = vmatmul.mubr.msk.f32.gmra.mrb[10].mxu0 %vm1059_vm7, %v6668_v57  ;;  %v9187_v57 = vld [vmem:[%s10975_s2 + $0xa0] sm:$0xff] }
 0x1e6   :  { %6695 = vmatprep.mubr.msk.f32.mxu0 %vm1059_vm7, %v973_v52  ;;  %v6671_v14 = vpop.f32.mrb[8].mxu1 }
 0x1e7   :  { %v1013_v18 = vpop.f32.mrb[9].mxu1 }
 0x1e9   :  { %6696 = vmatmul.mubr.msk.f32.vlgmr.msra.gmra.mrb[8].mxu0 %vm1059_vm7, %v6659_v51 }
 0x1ea   :  { %6698 = vmatprep.mubr.msk.f32.mxu0 %vm1059_vm7, %v983_v54  ;;  %7132 = vmatpush3.bf16.msk.msra.mxu0 %vm9082_vm5, %v9096_v42  ;;  %v6674_v62 = vpop.f32.mrb[10].mxu1  ;;  %v9166_v54 = vld [vmem:[%s10975_s2 + $0x88] sm:$0xff] }
 0x1eb   :  { %v1023_v63 = vpop.f32.mrb[11].mxu1  ;;  %7135 = vmatprep.subr.msk.bf16.mxu0 %vm9082_vm5, %v9117_v60 }
 0x1ed   :  { %6699 = vmatmul.mubr.msk.f32.gmra.mrb[10].mxu0 %vm1059_vm7, %v6662_v53  ;;  %v9161_v53 = vld [vmem:[%s10978_s5] sm:$0xff]  }
 0x1ee   :  { %6705 = vmatprep.mubr.msk.f32.mxu0 %vm1059_vm7, %v1013_v18  ;;  %v6677_v0 = vpop.f32.mrb[12].mxu1  ;;  %v9210_v18 = vld [vmem:[%s10975_s2 + $0xb8] sm:$0xff] }
 0x1ef   :  { %v1033_v1 = vpop.f32.mrb[13].mxu1 }
 0x1f1   :  { %6706 = vmatmul.mubr.msk.f32.vlgmr.msra.gmra.mrb[8].mxu0 %vm1059_vm7, %v6671_v14  ;;  %v9201_v14 = vld [vmem:[%s10975_s2 + $0xb0] sm:$0xff] }
 0x1f2   :  { %6708 = vmatprep.mubr.msk.f32.mxu0 %vm1059_vm7, %v1023_v63  ;;  %7138 = vmatpush3.bf16.msk.msra.mxu0 %vm9082_vm5, %v9117_v60  ;;  %v6680_v2 = vpop.f32.mrb[14].mxu1  ;;  %v6335_v63 = vld [vmem:[%s10978_s5 + $0x10] sm:$0xf]  }
 0x1f3   :  { %v1043_v3 = vpop.f32.mrb[15].mxu1 }
 0x1f5   :  { %6709 = vmatmul.mubr.msk.f32.gmra.mrb[10].mxu0 %vm1059_vm7, %v6674_v62  ;;  %v6334_v62 = vld [vmem:[%s10978_s5 + $0x8] sm:$0xff]  }
 0x1f6   :  { %6715 = vmatprep.mubr.msk.f32.mxu0 %vm1059_vm7, %v1033_v1  ;;  %v6280_v1 = vunpack.c.h.bf16 %v6334_v62 }
 0x1f9   :  { %6716 = vmatmul.mubr.msk.f32.vlgmr.msra.gmra.mrb[8].mxu0 %vm1059_vm7, %v6677_v0  ;;  %v9220_v0 = vunpack.c.l.bf16 %v6334_v62 }
 0x1fa   :  { %6718 = vmatprep.mubr.msk.f32.mxu0 %vm1059_vm7, %v1043_v3 }
 0x1fb   :  { %v1633_v3 = vrot.slane %v9220_v0, 4 }
 0x1fd   :  { %6719 = vmatmul.mubr.msk.f32.gmra.mrb[10].mxu0 %vm1059_vm7, %v6680_v2  ;;  %v6283_v2 = vunpack.c.l.bf16 %v6335_v63 }
 0x2cc   :  { %v6717_v27 = vpop.f32.mrb[8].mxu0 }
 0x2cd   :  { %v1493_v28 = vadd.f32 %v6717_v27, %v9148_v26  ;;  %v1453_v29 = vpop.f32.mrb[9].mxu0  ;;  %v1634_v27 = vrot.slane %v6280_v1, 4 }
 0x2ce   :  { %v1492_v30 = vadd.f32 %v9146_v25, %v1453_v29 }
 0x2cf   :  { %v1497_v38 = vmax.f32 %v1493_v28, 0.0  ;;  %v9225_v28 = vrot.slane %v6283_v2, 4  ;;  %v1635_v29 = vsel %vm1260_vm6, %v1633_v3, %v1634_v27 }
 0x2d0   :  { %v1496_v40 = vmax.f32 %v1492_v30, 0.0  ;;  %v6720_v41 = vpop.f32.mrb[10].mxu0 }
 0x2d1   :  { %v1495_v44 = vadd.f32 %v6720_v41, %v9152_v39  ;;  %v1463_v45 = vpop.f32.mrb[11].mxu0  ;;  %v1637_v30 = vsel %vm1260_vm6, %v1634_v27, %v9225_v28  ;;  %v8776_v41 = vmov 2  }
 0x2d2   :  { %v7139_v47 = vpack.c.bf16 %v1497_v38, %v1496_v40  ;;  %v1494_v48 = vadd.f32 %v9154_v43, %v1463_v45  ;;  %v9232_v38 = vpack.c.bf16 %v1637_v30, %v1635_v29  ;;  %v9239_v40 = vld [vmem:[%s10978_s5 + $0x14] sm:$0xff]  ;;  %8457 = vset.pattern.permute.xlu1 %v8776_v41  ;;  %8458 = vset.pattern.permute.xlu0 %v8776_v41  ;;  %v6337_v45 = vld [vmem:[%s10978_s5 + $0x20] sm:$0xff]  }
 0x2d3   :  { %v1499_v50 = vmax.f32 %v1495_v44, 0.0  ;;  %1988 = vperm.xlu1 %8457, %v8867_v13   ;;  %1992 = vperm.xlu0 %8458, %v8885_v17   ;;  %v6336_v44 = vld [vmem:[%s10978_s5 + $0x18] sm:$0xff]  }
 0x2d4   :  { %v1498_v51 = vmax.f32 %v1494_v48, 0.0  ;;  %7140 = vmatprep.subr.bf16.mxu1 %v7139_v47  ;;  %7148 = vmatprep.subr.bf16.mxu0 %v9232_v38  ;;  %v6291_v48 = vunpack.c.l.bf16 %v6337_v45 }
 0x2d5   :  { %7142 = vmatpush3.bf16.msra.mxu1 %v7139_v47  ;;  %7150 = vmatpush3.bf16.msra.mxu0 %v9232_v38  ;;  %v9254_v47 = vunpack.c.h.bf16 %v6336_v44 }
 0x2d6   :  { %v7143_v52 = vpack.c.bf16 %v1499_v50, %v1498_v51  ;;  %6745 = vmatprep.subr.msk.mxu0 %vm1260_vm6, %v9225_v28  ;;  %v6292_v50 = vunpack.c.h.bf16 %v6337_v45  ;;  %v9286_v45 = vld [vmem:[%s10975_s2 + $0xc0] sm:$0xff] }
 0x2d7   :  { %v1895_v51 = vrot.slane %v9254_v47, 4  ;;  %11088 = vst [vmem:[#allocation7_spill] sm:$0xff] %v9286_v45 }
 0x2d8   :  { %7144 = vmatprep.subr.bf16.mxu1 %v7143_v52  ;;  %v9257_v62 = vrot.slane %v6292_v50, 4 }
 0x2d9   :  { %7146 = vmatpush3.bf16.msra.mxu1 %v7143_v52  ;;  %6746 = vmatpush3.msk.msra.mxu0 %vm1260_vm6, %v9225_v28  ;;  %v1896_v52 = vrot.slane %v6291_v48, 4  ;;  %v10983_v48 = vmov 0.0|0.0  }
 0x2da   :  { %7152 = vmatprep.subr.bf16.mxu1 %v9161_v53  ;;  %11086 = vst [vmem:[#allocation5_spill] sm:$0xff] %v9257_v62 }
 0x2db   :  { %v1897_v63 = vsel %vm1260_vm6, %v1895_v51, %v1896_v52  ;;  %v1899_v1 = vsel %vm1260_vm6, %v1896_v52, %v9257_v62 }
 0x2dc   :  { %6730 = vmatmul.mubr.msk.f32.vlgmr.msra.gmra.mrb[16].mxu1 %vm1500_vm8, %v9166_v54  ;;  %v9267_v27 = vpack.c.bf16 %v1899_v1, %v1897_v63 }
 0x2dd   :  { %6732 = vmatprep.mubr.msk.f32.mxu1 %vm1500_vm8, %v9171_v55  ;;  %7154 = vmatpush3.bf16.msra.mxu1 %v9161_v53 }
 0x2de   :  { %6754 = vmatprep.subr.msk.mxu1 %vm1260_vm6, %v9220_v0  ;;  %11087 = vst [vmem:[#allocation6_spill] sm:$0xff] %v9267_v27 }
 0x2e0   :  { %6733 = vmatmul.mubr.msk.f32.gmra.mrb[18].mxu1 %vm1500_vm8, %v9181_v56 }
 0x2e1   :  { %6735 = vmatprep.mubr.msk.f32.mxu1 %vm1500_vm8, %v9187_v57  ;;  %6755 = vmatpush3.msk.msra.mxu1 %vm1260_vm6, %v9220_v0 }
 0x2e2   :  { %7156 = vmatprep.subr.bf16.mxu1 %v9239_v40 }
 0x2e4   :  { %6736 = vmatmul.mubr.msk.f32.gmra.mrb[20].mxu1 %vm1500_vm8, %v9196_v59 }
 0x2e5   :  { %6738 = vmatprep.mubr.msk.f32.mxu1 %vm1500_vm8, %v9201_v14 }
 0x2e8   :  { %6739 = vmatmul.mubr.msk.f32.gmra.mrb[22].mxu1 %vm1500_vm8, %v9210_v18 }
 0x352   :  { %v9293_v1 = vpop.permute.xlu1 %1988 }
 0x353   :  { %11090 = vst [vmem:[#allocation9_spill] sm:$0xff] %v9293_v1 }
 0x3af   :  { %v6731_v13 = vpop.f32.mrb[16].mxu1 }
 0x3b0   :  { %v1591_v17 = vpop.f32.mrb[17].mxu1 }
 0x3b1   :  { %6756 = vmatprep.mubr.msk.f32.mxu1 %vm1640_vm9, %v1591_v17 }
 0x3b2   :  { %6757 = vmatmul.mubr.msk.f32.vlgmr.msra.gmra.mrb[24].mxu1 %vm1640_vm9, %v6731_v13  ;;  %v9291_v13 = vpop.permute.xlu0 %1992 }
 0x3b3   :  { %v6734_v2 = vpop.f32.mrb[18].mxu1  ;;  %7158 = vmatpush3.bf16.msra.mxu1 %v9239_v40  ;;  %11089 = vst [vmem:[#allocation8_spill] sm:$0xff] %v9291_v13 }
 0x3b4   :  { %v1601_v3 = vpop.f32.mrb[19].mxu1  ;;  %6763 = vmatprep.subr.msk.mxu1 %vm1260_vm6, %v9254_v47 }
 0x3b5   :  { %6747 = vmatprep.mubr.msk.f32.mxu0 %vm1640_vm9, %v1601_v3 }
 0x3b6   :  { %6748 = vmatmul.mubr.msk.f32.vlgmr.msra.gmra.mrb[12].mxu0 %vm1640_vm9, %v6734_v2 }
 0x3b7   :  { %v6737_v29 = vpop.f32.mrb[20].mxu1  ;;  %6764 = vmatpush3.msk.msra.mxu1 %vm1260_vm6, %v9254_v47  ;;  %6781 = vmatprep.mubr.msk.f32.mxu0 %vm1999_vm10, %v9286_v45 }
 0x3b8   :  { %v1611_v30 = vpop.f32.mrb[21].mxu1  ;;  %7160 = vmatprep.subr.bf16.mxu1 %v9267_v27 }
 0x3b9   :  { %6765 = vmatprep.mubr.msk.f32.mxu1 %vm1640_vm9, %v1611_v30 }
 0x3ba   :  { %6766 = vmatmul.mubr.msk.f32.vlgmr.msra.gmra.mrb[24].mxu1 %vm1640_vm9, %v6737_v29 }
 0x3bb   :  { %7162 = vmatpush3.bf16.msra.mxu1 %v9267_v27  ;;  %v6740_v41 = vpop.f32.mrb[22].mxu1 }
 0x3bc   :  { %v1621_v44 = vpop.f32.mrb[23].mxu1  ;;  %6772 = vmatprep.subr.msk.mxu1 %vm1260_vm6, %v9257_v62 }
 0x3bd   :  { %6774 = vmatprep.mubr.msk.f32.mxu1 %vm1640_vm9, %v1621_v44 }
 0x3bf   :  { %6773 = vmatpush3.msk.msra.mxu1 %vm1260_vm6, %v9257_v62 }
 0x3c0   :  { %7179 = vmatprep.subr.bf16.mxu1 %v10983_v48  ;;  %v9300_v48 = vld [vmem:[%s10975_s2 + $0xc8] sm:$0xff] }
 0x3c1   :  { %11091 = vst [vmem:[#allocation10_spill] sm:$0xff] %v9300_v48 }
 0x3c2   :  { %6775 = vmatmul.mubr.msk.f32.vlgmr.msra.gmra.mrb[24].mxu1 %vm1640_vm9, %v6740_v41 }
 0x489   :  { %v6749_v50 = vpop.f32.mrb[12].mxu0 }
 0x48a   :  { %v1715_v51 = vpop.f32.mrb[13].mxu0 }
 0x495   :  { %v6776_v52 = vpop.f32.mrb[24].mxu1 }
 0x496   :  { %v8023_v17 = vadd.f32 %v6776_v52, %v6749_v50  ;;  %v1976_v63 = vpop.f32.mrb[25].mxu1  ;;  %v9305_v50 = vld [vmem:[%s10979_s6 + $0x14] sm:$0xff]  ;;  %v11094_v52 = vmov 0.0|0.0  }
 0x497   :  { %v8024_v2 = vadd.f32 %v1976_v63, %v1715_v51  ;;  %11092 = vst [vmem:[#allocation11_spill] sm:$0xff] %v9305_v50  ;;  %v9310_v51 = vld [vmem:[%s10975_s2 + $0xd0] sm:$0xff]  ;;  %v9326_v63 = vld [vmem:[%s10979_s6 + $0x1c] sm:$0xff] }
 0x498   :  { %v1996_v3 = vadd.f32 %v8023_v17, %v9291_v13  ;;  %11093 = vst [vmem:[#allocation12_spill] sm:$0xff] %v9310_v51  ;;  %v9320_v17 = vld [vmem:[%s10975_s2 + $0xd8] sm:$0xff]  ;;  %11096 = vst [vmem:[#allocation14_spill] sm:$0xff] %v9326_v63 }
 0x499   :  { %v1995_v29 = vadd.f32 %v8024_v2, %v9293_v1  ;;  %11095 = vst [vmem:[#allocation13_spill] sm:$0xff] %v9320_v17  ;;  %v9332_v2 = vld [vmem:[%s10979_s6 + $0x20] sm:$0xff]  }
 0x49a   :  { %v1998_v30 = vmax.f32 %v1996_v3, 0.0  ;;  %11097 = vst [vmem:[#allocation15_spill] sm:$0xff] %v9332_v2  ;;  %v10985_v3 = vunpack.c.h.bf16 %v9332_v2  ;;  %v9371_v2 = vld [vmem:[%s10976_s3] sm:$0xff] }
 0x49b   :  { %v1997_v41 = vmax.f32 %v1995_v29, 0.0  ;;  %v10989_v29 = vmov 0.0  }
 0x49c   :  { %6823 = vmatprep.mubr.msk.f32.mxu1 %vm8779_vm11, %v10989_v29 }
 0x49d   :  { %v7163_v44 = vpack.c.bf16 %v1998_v30, %v1997_v41  ;;  %v9349_v30 = vld [vmem:[%s10979_s6 + $0x28] sm:$0xff]   ;;  %v9356_v41 = vld [vmem:[%s10979_s6 + $0x30] sm:$0xff]  }
 0x49e   :  { %11098 = vst [vmem:[#allocation16_spill] sm:$0xff] %v9349_v30  ;;  %7181 = vmatpush3.bf16.msra.mxu1 %v9349_v30  ;;  %11099 = vst [vmem:[#allocation17_spill] sm:$0xff] %v9356_v41  ;;  %v8780_v30 = vmov 3  }
 0x49f   :  { %7164 = vmatprep.subr.bf16.mxu0 %v7163_v44  ;;  %7182 = vmatprep.subr.bf16.mxu1 %v11094_v52 }
 0x4a0   :  { %7166 = vmatpush3.bf16.msra.mxu0 %v7163_v44  ;;  %v9362_v44 = vld [vmem:[%s10979_s6 + $0x10] ss:$40 sps:$4 sm:$0xff]   ;;  %8459 = vset.pattern.permute.xlu1 %v8780_v30  ;;  %v11102_v30 = vmov 0.0  }
 0x4a1   :  { %7167 = vmatprep.subr.bf16.mxu0 %v11094_v52  ;;  %11100 = vst [vmem:[#allocation18_spill] sm:$0xff] %v9362_v44  ;;  %2393 = vperm.xlu1 %8459, %v9371_v2  }
 0x4a2   :  { %7184 = vmatpush3.bf16.msra.mxu1 %v9356_v41  ;;  %v9377_v41 = vld [vmem:[%s10979_s6] sm:$0xff]  }
 0x4a3   :  { %6782 = vmatmul.mubr.msk.f32.vlgmr.msra.gmra.mrb[14].mxu0 %vm1999_vm10, %v9300_v48  ;;  %6821 = vmatprep.subr.mxu1 %v10989_v29  ;;  %11101 = vst [vmem:[#allocation19_spill] sm:$0xff] %v9377_v41 }
 0x4a4   :  { %6784 = vmatprep.mubr.msk.f32.mxu0 %vm1999_vm10, %v9310_v51  ;;  %7169 = vmatpush3.bf16.msra.mxu0 %v9305_v50  ;;  %v10996_v51 = vunpack.c.l.bf16 %v9362_v44 }
 0x4a5   :  { %7170 = vmatprep.subr.bf16.mxu0 %v11094_v52 }
 0x4a7   :  { %6785 = vmatmul.mubr.msk.f32.gmra.mrb[16].mxu0 %vm1999_vm10, %v9320_v17 }
 0x4a8   :  { %7172 = vmatpush3.bf16.msra.mxu0 %v9326_v63  ;;  %6797 = vmatprep.mubr.msk.f32.mxu0 %vm8779_vm11, %v10989_v29 }
 0x4a9   :  { %6795 = vmatprep.subr.mxu0 %v10989_v29 }
 0x4ac   :  { %6796 = vmatpush3.msra.mxu0 %v10985_v3  ;;  %v10992_v3 = vunpack.c.h.bf16 %v9362_v44 }
 0x4ad   :  { %7173 = vmatprep.subr.bf16.mxu0 %v11094_v52 }
 0x4ae   :  { %6822 = vmatpush3.msra.mxu1 %v10992_v3  ;;  %v9387_v3 = vld [vmem:[%s10979_s6 + $0x8] sm:$0xff]  }
 0x4af   :  { %11103 = vst [vmem:[#allocation20_spill] sm:$0xff] %v9387_v3 }
 0x520   :  { %v9430_v1 = vpop.permute.xlu1 %2393 }
 0x576   :  { %v6783_v29 = vpop.f32.mrb[14].mxu0 }
 0x577   :  { %6798 = vmatmul.mubr.msk.f32.vlgmr.msra.gmra.mrb[18].mxu0 %vm2097_vm12, %v6783_v29  ;;  %v2078_v63 = vpop.f32.mrb[15].mxu0  ;;  %v9396_v29 = vld [vmem:[%s10979_s6 + $0x3c] sm:$0xff] }
 0x578   :  { %7175 = vmatpush3.bf16.msra.mxu0 %v9377_v41  ;;  %6810 = vmatprep.mubr.msk.f32.mxu0 %vm8779_vm11, %v11102_v30  ;;  %11104 = vst [vmem:[#allocation21_spill] sm:$0xff] %v9396_v29 }
 0x579   :  { %7176 = vmatprep.subr.bf16.mxu0 %v11094_v52 }
 0x57a   :  { %v6786_v17 = vpop.f32.mrb[16].mxu0 }
 0x57b   :  { %v2088_v50 = vpop.f32.mrb[17].mxu0 }
 0x57c   :  { %7178 = vmatpush3.bf16.msra.mxu0 %v9387_v3  ;;  %6824 = vmatmul.mubr.msk.f32.vlgmr.msra.gmra.mrb[26].mxu1 %vm2097_vm12, %v2088_v50  ;;  %v9406_v50 = vld [vmem:[%s10979_s6 + $0x44] sm:$0xff] }
 0x57d   :  { %6808 = vmatprep.subr.mxu0 %v11102_v30  ;;  %11105 = vst [vmem:[#allocation22_spill] sm:$0xff] %v9406_v50 }
 0x580   :  { %6809 = vmatpush3.msra.mxu0 %v10996_v51  ;;  %v9414_v51 = vld [vmem:[%s10979_s6 + $0x48] sm:$0xff]  }
 0x581   :  { %7185 = vmatprep.subr.bf16.mxu0 %v11094_v52  ;;  %6811 = vmatmul.mubr.msk.f32.vlgmr.msra.gmra.mrb[20].mxu0 %vm2097_vm12, %v2078_v63  ;;  %11106 = vst [vmem:[#allocation23_spill] sm:$0xff] %v9414_v51  ;;  %v11005_v63 = vunpack.c.h.bf16 %v9414_v51 }
 0x582   :  { %7187 = vmatpush3.bf16.msra.mxu0 %v9396_v29  ;;  %6836 = vmatprep.mubr.msk.f32.mxu0 %vm8779_vm11, %v11102_v30  ;;  %v9426_v29 = vld [vmem:[%s10975_s2 + $0xe0] sm:$0xff] }
 0x583   :  { %7188 = vmatprep.subr.bf16.mxu0 %v11094_v52  ;;  %11107 = vst [vmem:[#allocation24_spill] sm:$0xff] %v9426_v29  ;;  %6841 = vmatprep.mubr.msk.f32.mxu1 %vm2398_vm13, %v9426_v29  ;;  %v8462_v29 = vld [vmem:[%s10980_s7 + $0x54] ss:$8 sps:$4 sm:$0xff]  }
 0x586   :  { %7190 = vmatpush3.bf16.msra.mxu0 %v9406_v50 }
 0x587   :  { %6834 = vmatprep.subr.mxu0 %v11102_v30 }
 0x58a   :  { %6835 = vmatpush3.msra.mxu0 %v11005_v63 }
 0x58b   :  { %6837 = vmatmul.mubr.msk.f32.vlgmr.msra.gmra.mrb[22].mxu0 %vm2097_vm12, %v6786_v17 }
 0x58c   :  { %2862 = vmatprep.mubr.f32.mxu0 %v11102_v30 }
 0x64a   :  { %v2167_v50 = vpop.f32.mrb[18].mxu0 }
 0x64b   :  { %v6799_v44 = vpop.f32.mrb[19].mxu0 }
 0x64c   :  { %v8476_v44 = vld [vmem:[%s10980_s7 + $0x90] ss:$8 sps:$4 sm:$0xff]  }
 0x64f   :  { %v2313_v3 = vpop.f32.mrb[26].mxu1 }
 0x650   :  { %v6825_v41 = vpop.f32.mrb[27].mxu1 }
 0x651   :  { %v70_v41 = vld [vmem:[%s10975_s2 + $0xe8] sm:$0xff] }
 0x654   :  { %v2240_v48 = vpop.f32.mrb[20].mxu0 }
 0x655   :  { %v2241_v51 = vadd.f32 %v2240_v48, %v2167_v50  ;;  %v6812_v63 = vpop.f32.mrb[21].mxu0  ;;  %v8464_v48 = vld [vmem:[%s10980_s7 + $0x50] ss:$8 sps:$4 sm:$0xff]   ;;  %v8781_v50 = vmov 4  }
 0x656   :  { %8460 = vset.pattern.permute.xlu1 %v8781_v50  ;;  %8461 = vset.pattern.permute.xlu0 %v8781_v50  ;;  %v8495_v50 = vld [vmem:[%s10980_s7 + $0xb4] ss:$8 sps:$4 sm:$0xff]  }
 0x657   :  { %v2317_v52 = vadd.f32 %v2313_v3, %v2241_v51  ;;  %v8471_v51 = vld [vmem:[%s10980_s7 + $0x84] ss:$8 sps:$4 sm:$0xff]   ;;  %v8474_v3 = vld [vmem:[%s10980_s7 + $0x94] ss:$8 sps:$4 sm:$0xff]   ;;  %2781 = vperm.xlu1 %8460, %v9371_v2  }
 0x658   :  { %v8483_v2 = vld [vmem:[%s10980_s7 + $0x24] ss:$8 sps:$4 sm:$0xff]  }
 0x65e   :  { %v2387_v17 = vpop.f32.mrb[22].mxu0 }
 0x65f   :  { %v2391_v13 = vadd.f32 %v2387_v17, %v2317_v52  ;;  %v6838_v45 = vpop.f32.mrb[23].mxu0  ;;  %v8473_v52 = vld [vmem:[%s10980_s7 + $0x80] ss:$8 sps:$4 sm:$0xff]  }
 0x660   :  { %v8465_v45 = vld [vmem:[%s10980_s7 + $0x64] ss:$8 sps:$4 sm:$0xff]  }
 0x661   :  { %v2396_v62 = vadd.f32 %v9430_v1, %v2391_v13  ;;  %v8468_v13 = vld [vmem:[%s10980_s7 + $0x74] ss:$8 sps:$4 sm:$0xff]  }
 0x663   :  { %v2397_v27 = vmax.f32 %v2396_v62, 0.0  ;;  %v8467_v62 = vld [vmem:[%s10980_s7 + $0x60] ss:$8 sps:$4 sm:$0xff]  }
 0x665   :  { %6839 = vmatprep.subr.mxu1 %v2397_v27 }
 0x666   :  { %6840 = vmatpush3.msra.mxu1 %v2397_v27  ;;  %v8470_v27 = vld [vmem:[%s10980_s7 + $0x70] ss:$8 sps:$4 sm:$0xff]  }
 0x667   :  { %6842 = vmatmul.mubr.msk.f32.vlgmr.msra.gmra.mrb[28].mxu1 %vm2398_vm13, %v70_v41  ;;  %7192 = vmatprep.subr.bf16.mxu1 %v8462_v29  ;;  %v8477_v29 = vld [vmem:[%s10980_s7 + $0x4] ss:$8 sps:$4 sm:$0xff]   ;;  %v8479_v41 = vld [vmem:[%s10980_s7] ss:$8 sps:$4 sm:$0xff]  }
 0x668   :  { %7194 = vmatpush1.bf16.msra.mxu1 %v8464_v48  ;;  %2548 = vmatprep.mubr.f32.mxu1 %v11102_v30 }
 0x669   :  { %7196 = vmatprep.subr.bf16.mxu1 %v8465_v45  ;;  %v8480_v45 = vld [vmem:[%s10980_s7 + $0x14] ss:$8 sps:$4 sm:$0xff]  }
 0x66c   :  { %7198 = vmatpush1.bf16.msra.mxu1 %v8467_v62  ;;  %v8482_v62 = vld [vmem:[%s10980_s7 + $0x10] ss:$8 sps:$4 sm:$0xff]  }
 0x66d   :  { %7200 = vmatprep.subr.bf16.mxu1 %v8468_v13  ;;  %v8485_v13 = vld [vmem:[%s10980_s7 + $0x20] ss:$8 sps:$4 sm:$0xff]  }
 0x670   :  { %7202 = vmatpush1.bf16.msra.mxu1 %v8470_v27  ;;  %v8486_v27 = vld [vmem:[%s10980_s7 + $0x34] ss:$8 sps:$4 sm:$0xff]  }
 0x671   :  { %7204 = vmatprep.subr.bf16.mxu1 %v8471_v51  ;;  %v8488_v51 = vld [vmem:[%s10980_s7 + $0x30] ss:$8 sps:$4 sm:$0xff]  }
 0x674   :  { %7206 = vmatpush1.bf16.msra.mxu1 %v8473_v52  ;;  %v8489_v52 = vld [vmem:[%s10980_s7 + $0x44] ss:$8 sps:$4 sm:$0xff]  }
 0x675   :  { %7208 = vmatprep.subr.bf16.mxu1 %v8474_v3  ;;  %v8491_v3 = vld [vmem:[%s10980_s7 + $0x40] ss:$8 sps:$4 sm:$0xff]  }
 0x678   :  { %7210 = vmatpush1.bf16.msra.mxu1 %v8476_v44  ;;  %v8492_v44 = vld [vmem:[%s10980_s7 + $0xa4] ss:$8 sps:$4 sm:$0xff]  }
 0x679   :  { %7212 = vmatprep.subr.bf16.mxu1 %v8477_v29  ;;  %v8494_v29 = vld [vmem:[%s10980_s7 + $0xa0] ss:$8 sps:$4 sm:$0xff]  }
 0x73a   :  { %v9472_v63 = vpop.f32.mrb[28].mxu1 }
 0x73b   :  { %v2471_v17 = vpop.f32.mrb[29].mxu1 }
 0x73c   :  { %v2481_v48 = vrot.slane %v2471_v17, 4 }
 0x73e   :  { %6151 = vmatmul.mubr.msk.f32.vlgmr.msra.gmra.mrb[30].mxu1 %vm720_vm0, %v2481_v48  ;;  %v8498_v48 = vld [vmem:[%s10980_s7 + $0xc4] ss:$8 sps:$4 sm:$0xff]  }
 0x73f   :  { %7214 = vmatpush1.bf16.msra.mxu1 %v8479_v41  ;;  %2621 = vmatprep.mubr.f32.mxu1 %v11102_v30  ;;  %v8497_v41 = vld [vmem:[%s10980_s7 + $0xb0] ss:$8 sps:$4 sm:$0xff]  }
 0x740   :  { %7216 = vmatprep.subr.bf16.mxu1 %v8480_v45  ;;  %v8500_v45 = vld [vmem:[%s10980_s7 + $0xc0] ss:$8 sps:$4 sm:$0xff]  }
 0x743   :  { %7218 = vmatpush1.bf16.msra.mxu1 %v8482_v62  ;;  %v8503_v62 = vld [vmem:[%s10980_s7 + $0xd0] ss:$8 sps:$4 sm:$0xff]  }
 0x744   :  { %7220 = vmatprep.subr.bf16.mxu1 %v8483_v2  ;;  %v8504_v2 = vld [vmem:[%s10980_s7 + $0xe4] ss:$8 sps:$4 sm:$0xff]  }
 0x747   :  { %7222 = vmatpush1.bf16.msra.mxu1 %v8485_v13  ;;  %v8506_v13 = vld [vmem:[%s10980_s7 + $0xe0] ss:$8 sps:$4 sm:$0xff]  }
 0x748   :  { %7224 = vmatprep.subr.bf16.mxu1 %v8486_v27  ;;  %v8507_v27 = vld [vmem:[%s10980_s7 + $0xf4] ss:$8 sps:$4 sm:$0xff]  }
 0x74b   :  { %7226 = vmatpush1.bf16.msra.mxu1 %v8488_v51  ;;  %v8509_v51 = vld [vmem:[%s10980_s7 + $0xf0] ss:$8 sps:$4 sm:$0xff]  }
 0x74c   :  { %7228 = vmatprep.subr.bf16.mxu1 %v8489_v52  ;;  %v8510_v52 = vld [vmem:[%s10980_s7 + $0x104] ss:$8 sps:$4 sm:$0xff]  }
 0x74f   :  { %7230 = vmatpush1.bf16.msra.mxu1 %v8491_v3  ;;  %v8512_v3 = vld [vmem:[%s10980_s7 + $0x100] ss:$8 sps:$4 sm:$0xff]  }
 0x750   :  { %7232 = vmatprep.subr.bf16.mxu1 %v8492_v44  ;;  %v8513_v44 = vld [vmem:[%s10980_s7 + $0x114] ss:$8 sps:$4 sm:$0xff]  }
 0x752   :  { %6152 = vmatmul.mubr.msk.f32.vlgmr.msra.gmra.mrb[30].mxu1 %vm720_vm0, %v2471_v17  ;;  %v8501_v17 = vld [vmem:[%s10980_s7 + $0xd4] ss:$8 sps:$4 sm:$0xff]  }
 0x753   :  { %7234 = vmatpush1.bf16.msra.mxu1 %v8494_v29  ;;  %2695 = vmatprep.mubr.f32.mxu1 %v11102_v30  ;;  %v8515_v29 = vld [vmem:[%s10980_s7 + $0x110] ss:$8 sps:$4 sm:$0xff]  }
 0x754   :  { %7236 = vmatprep.subr.bf16.mxu1 %v8495_v50  ;;  %v8516_v50 = vld [vmem:[%s10980_s7 + $0x124] ss:$8 sps:$4 sm:$0xff]  }
 0x757   :  { %7238 = vmatpush1.bf16.msra.mxu1 %v8497_v41  ;;  %v8518_v41 = vld [vmem:[%s10980_s7 + $0x120] ss:$8 sps:$4 sm:$0xff]  }
 0x758   :  { %7240 = vmatprep.subr.bf16.mxu1 %v8498_v48  ;;  %v8519_v48 = vld [vmem:[%s10980_s7 + $0x134] ss:$8 sps:$4 sm:$0xff]  }
 0x75b   :  { %7242 = vmatpush1.bf16.msra.mxu1 %v8500_v45  ;;  %v6166_v45 = vld [vmem:[%s10973_s0 + $0x50] sm:$0xff] }
 0x75c   :  { %7244 = vmatprep.subr.bf16.mxu1 %v8501_v17  ;;  %v6167_v17 = vld [vmem:[%s10973_s0 + $0x58] sm:$0xff] }
 0x75f   :  { %7246 = vmatpush1.bf16.msra.mxu1 %v8503_v62  ;;  %v8521_v62 = vld [vmem:[%s10980_s7 + $0x130] ss:$8 sps:$4 sm:$0xff]  }
 0x760   :  { %7248 = vmatprep.subr.bf16.mxu1 %v8504_v2  ;;  %v7551_v2 = vpack.c.bf16 %v6167_v17, %v6166_v45  ;;  %v6174_v45 = vld [vmem:[%s10973_s0 + $0x90] sm:$0xff]  ;;  %v6175_v17 = vld [vmem:[%s10973_s0 + $0x98] sm:$0xff] }
 0x763   :  { %7250 = vmatpush1.bf16.msra.mxu1 %v8506_v13  ;;  %v6168_v13 = vld [vmem:[%s10973_s0 + $0x60] sm:$0xff] }
 0x764   :  { %7252 = vmatprep.subr.bf16.mxu1 %v8507_v27  ;;  %v6169_v27 = vld [vmem:[%s10973_s0 + $0x68] sm:$0xff] }
 0x766   :  { %6153 = vmatmul.mubr.msk.f32.vlgmr.msra.gmra.mrb[30].mxu1 %vm720_vm0, %v9472_v63 }
 0x767   :  { %7254 = vmatpush1.bf16.msra.mxu1 %v8509_v51  ;;  %2771 = vmatprep.mubr.f32.mxu1 %v11102_v30  ;;  %v2704_v51 = vrot.slane %v9472_v63, 4 }
 0x768   :  { %7256 = vmatprep.subr.bf16.mxu1 %v8510_v52  ;;  %v7555_v52 = vpack.c.bf16 %v6169_v27, %v6168_v13  ;;  %v8697_v13 = vld [vmem:[%s10974_s1 + $0x10] sm:$0xff]  ;;  %v8698_v27 = vld [vmem:[%s10974_s1 + $0x18] sm:$0xff] }
 0x76b   :  { %7258 = vmatpush1.bf16.msra.mxu1 %v8512_v3  ;;  %v6170_v3 = vld [vmem:[%s10973_s0 + $0x70] sm:$0xff] }
 0x76c   :  { %7260 = vmatprep.subr.bf16.mxu1 %v8513_v44  ;;  %v6171_v44 = vld [vmem:[%s10973_s0 + $0x78] sm:$0xff] }
 0x76d   :  { %v7559_v63 = vpack.c.bf16 %v6171_v44, %v6170_v3  ;;  %v8701_v3 = vld [vmem:[%s10974_s1 + $0x30] sm:$0xff]  ;;  %v8702_v44 = vld [vmem:[%s10974_s1 + $0x38] sm:$0xff] }
 0x76f   :  { %7262 = vmatpush1.bf16.msra.mxu1 %v8515_v29  ;;  %v8695_v29 = vld [vmem:[%s10974_s1] sm:$0xff] }
 0x770   :  { %7264 = vmatprep.subr.bf16.mxu1 %v8516_v50  ;;  %v6172_v50 = vld [vmem:[%s10973_s0 + $0x80] sm:$0xff] }
 0x773   :  { %7266 = vmatpush1.bf16.msra.mxu1 %v8518_v41  ;;  %v6173_v41 = vld [vmem:[%s10973_s0 + $0x88] sm:$0xff] }
 0x774   :  { %7268 = vmatprep.subr.bf16.mxu1 %v8519_v48  ;;  %v7563_v48 = vpack.c.bf16 %v6173_v41, %v6172_v50 }
 0x777   :  { %7270 = vmatpush1.bf16.msra.mxu1 %v8521_v62  ;;  %v7567_v62 = vpack.c.bf16 %v6175_v17, %v6174_v45 }
 0x778   :  { %7552 = vmatprep.subr.bf16.mxu1 %v7551_v2 }
 0x77a   :  { %6154 = vmatmul.mubr.msk.f32.vlgmr.msra.gmra.mrb[30].mxu1 %vm720_vm0, %v2704_v51  ;;  %v8699_v51 = vld [vmem:[%s10974_s1 + $0x20] sm:$0xff] }
 0x77b   :  { %7554 = vmatpush3.bf16.msra.mxu1 %v7551_v2  ;;  %6864 = vmatprep.mubr.msk.f32.mxu1 %vm720_vm0, %v8695_v29  ;;  %v8696_v2 = vld [vmem:[%s10974_s1 + $0x8] sm:$0xff]  ;;  %v9634_v29 = vpop.permute.xlu1 %2781 }
 0x77c   :  { %7556 = vmatprep.subr.bf16.mxu1 %v7555_v52  ;;  %11108 = vst [vmem:[#allocation25_spill] sm:$0xff] %v9634_v29 }
 0x77f   :  { %7558 = vmatpush3.bf16.msra.mxu1 %v7555_v52  ;;  %v8700_v52 = vld [vmem:[%s10974_s1 + $0x28] sm:$0xff] }
 0x780   :  { %7560 = vmatprep.subr.bf16.mxu1 %v7559_v63 }
 0x783   :  { %7562 = vmatpush3.bf16.msra.mxu1 %v7559_v63 }
 0x784   :  { %7564 = vmatprep.subr.bf16.mxu1 %v7563_v48 }
 0x787   :  { %7566 = vmatpush3.bf16.msra.mxu1 %v7563_v48 }
 0x788   :  { %7568 = vmatprep.subr.bf16.mxu1 %v7567_v62 }
 0x78b   :  { %7570 = vmatpush3.bf16.msra.mxu1 %v7567_v62 }
 0x78e   :  { %6865 = vmatmul.mubr.msk.f32.vlgmr.msra.gmra.mrb[32].mxu1 %vm720_vm0, %v8696_v2 }
 0x78f   :  { %6867 = vmatprep.mubr.msk.f32.mxu1 %vm720_vm0, %v8697_v13 }
 0x792   :  { %6868 = vmatmul.mubr.msk.f32.gmra.mrb[34].mxu1 %vm720_vm0, %v8698_v27 }
 0x793   :  { %6870 = vmatprep.mubr.msk.f32.mxu1 %vm720_vm0, %v8699_v51 }
 0x796   :  { %6871 = vmatmul.mubr.msk.f32.gmra.mrb[36].mxu1 %vm720_vm0, %v8700_v52 }
 0x797   :  { %6873 = vmatprep.mubr.msk.f32.mxu1 %vm720_vm0, %v8701_v3 }
 0x79a   :  { %6874 = vmatmul.mubr.msk.f32.gmra.mrb[38].mxu1 %vm720_vm0, %v8702_v44 }
 0x79b   :  { %6892 = vmatprep.mubr.msk.f32.mxu1 %vm858_vm1, %v8937_v32 }
 0x84d   :  { %v2773_v63 = vpop.f32.mrb[30].mxu1 }
 0x84e   :  { %v2784_v50 = vadd.f32 %v9634_v29, %v2773_v63  ;;  %v2775_v41 = vpop.f32.mrb[31].mxu1 }
 0x84f   :  { %v2785_v48 = vadd.f32 %v9634_v29, %v2775_v41 }
 0x850   :  { %v2786_v17 = vmax.f32 %v2784_v50, 0.0 }
 0x851   :  { %v2787_v45 = vmax.f32 %v2785_v48, 0.0 }
 0x853   :  { %6155 = vmatprep.subr.msk.mxu0 %vm1260_vm6, %v2787_v45 }
 0x854   :  { %6156 = vmatpush1.msk.msra.mxu0 %vm1260_vm6, %v2786_v17 }
 0x861   :  { %v6866_v62 = vpop.f32.mrb[32].mxu1 }
 0x862   :  { %v3576_v2 = vadd.f32 %v6866_v62, %v8945_v35  ;;  %v3570_v13 = vpop.f32.mrb[33].mxu1 }
 0x863   :  { %v3571_v32 = vadd.f32 %v3570_v13, %v8941_v33 }
 0x864   :  { %v3610_v27 = vmax.f32 %v3576_v2, 0.0 }
 0x865   :  { %v3609_v51 = vmax.f32 %v3571_v32, 0.0  ;;  %v6869_v52 = vpop.f32.mrb[34].mxu1 }
 0x866   :  { %v3586_v3 = vadd.f32 %v6869_v52, %v8947_v36  ;;  %v3580_v44 = vpop.f32.mrb[35].mxu1 }
 0x867   :  { %v7571_v63 = vpack.c.bf16 %v3610_v27, %v3609_v51  ;;  %v3581_v41 = vadd.f32 %v3580_v44, %v8943_v34 }
 0x868   :  { %v3612_v50 = vmax.f32 %v3586_v3, 0.0 }
 0x869   :  { %v3611_v48 = vmax.f32 %v3581_v41, 0.0  ;;  %v6872_v45 = vpop.f32.mrb[36].mxu1  ;;  %7572 = vmatprep.subr.bf16.mxu1 %v7571_v63 }
 0x86a   :  { %v3596_v17 = vadd.f32 %v6872_v45, %v8952_v46  ;;  %v3590_v29 = vpop.f32.mrb[37].mxu1  ;;  %7574 = vmatpush3.bf16.msra.mxu1 %v7571_v63 }
 0x86b   :  { %v7575_v35 = vpack.c.bf16 %v3612_v50, %v3611_v48  ;;  %v3591_v33 = vadd.f32 %v3590_v29, %v8955_v49 }
 0x86c   :  { %v3614_v62 = vmax.f32 %v3596_v17, 0.0 }
 0x86d   :  { %v3613_v2 = vmax.f32 %v3591_v33, 0.0  ;;  %v6875_v13 = vpop.f32.mrb[38].mxu1  ;;  %7576 = vmatprep.subr.bf16.mxu1 %v7575_v35  ;;  %v11114_v33 = vmov 0.0|0.0  }
 0x86e   :  { %v3606_v36 = vadd.f32 %v6875_v13, %v8959_v58  ;;  %v3600_v32 = vpop.f32.mrb[39].mxu1  ;;  %7578 = vmatpush3.bf16.msra.mxu1 %v7575_v35  ;;  %v11117_v13 = vld [vmem:[#allocation11_spill] sm:$0xff] }
 0x86f   :  { %v7579_v34 = vpack.c.bf16 %v3614_v62, %v3613_v2  ;;  %v3601_v27 = vadd.f32 %v3600_v32, %v8961_v61  ;;  %v11115_v62 = vld [vmem:[#allocation10_spill] sm:$0xff]  ;;  %v11116_v2 = vld [vmem:[#allocation12_spill] sm:$0xff] }
 0x870   :  { %v3616_v51 = vmax.f32 %v3606_v36, 0.0  ;;  %v11118_v36 = vld [vmem:[#allocation13_spill] sm:$0xff]  ;;  %v11119_v32 = vld [vmem:[#allocation14_spill] sm:$0xff] }
 0x871   :  { %v3615_v52 = vmax.f32 %v3601_v27, 0.0  ;;  %7580 = vmatprep.subr.bf16.mxu1 %v7579_v34 }
 0x872   :  { %7582 = vmatpush3.bf16.msra.mxu1 %v7579_v34  ;;  %v11120_v34 = vld [vmem:[#allocation15_spill] sm:$0xff] }
 0x873   :  { %v7583_v46 = vpack.c.bf16 %v3616_v51, %v3615_v52  ;;  %v11121_v27 = vunpack.c.h.bf16 %v11120_v34  ;;  %v9800_v51 = vld [vmem:[%s10981_s8 + $0xf4] ss:$12 sps:$4 sm:$0xff]   ;;  %v9805_v52 = vld [vmem:[%s10981_s8 + $0xf0] ss:$12 sps:$4 sm:$0xff]  }
 0x874   :  { %7272 = vmatprep.subr.bf16.mxu0 %v9800_v51  ;;  %v10084_v34 = vld [vmem:[%s10981_s8 + $0x64] ss:$12 sps:$4 sm:$0xff]  }
 0x875   :  { %7584 = vmatprep.subr.bf16.mxu1 %v7583_v46 }
 0x876   :  { %7586 = vmatpush3.bf16.msra.mxu1 %v7583_v46  ;;  %v9810_v46 = vld [vmem:[%s10981_s8 + $0x10c] ss:$12 sps:$4 sm:$0xff]  }
 0x877   :  { %7589 = vmatprep.subr.msk.bf16.mxu1 %vm9082_vm5, %v9079_v31 }
 0x879   :  { %6893 = vmatmul.mubr.msk.f32.vlgmr.msra.gmra.mrb[40].mxu1 %vm858_vm1, %v8968_v5 }
 0x87a   :  { %6895 = vmatprep.mubr.msk.f32.mxu1 %vm858_vm1, %v8973_v6  ;;  %7592 = vmatpush3.bf16.msk.msra.mxu1 %vm9082_vm5, %v9079_v31 }
 0x87b   :  { %7595 = vmatprep.subr.msk.bf16.mxu1 %vm9082_vm5, %v9073_v24 }
 0x87d   :  { %6896 = vmatmul.mubr.msk.f32.gmra.mrb[42].mxu1 %vm858_vm1, %v8982_v7 }
 0x87e   :  { %6898 = vmatprep.mubr.msk.f32.mxu1 %vm858_vm1, %v8987_v8 }
 0x881   :  { %6899 = vmatmul.mubr.msk.f32.gmra.mrb[44].mxu1 %vm858_vm1, %v8996_v9 }
 0x882   :  { %6901 = vmatprep.mubr.msk.f32.mxu1 %vm858_vm1, %v9001_v10 }
 0x885   :  { %6902 = vmatmul.mubr.msk.f32.gmra.mrb[46].mxu1 %vm858_vm1, %v9010_v11 }
 0x886   :  { %6904 = vmatprep.mubr.msk.f32.mxu1 %vm858_vm1, %v9015_v12 }
 0x889   :  { %6905 = vmatmul.mubr.msk.f32.gmra.mrb[48].mxu1 %vm858_vm1, %v9024_v15 }
 0x88a   :  { %6907 = vmatprep.mubr.msk.f32.mxu1 %vm858_vm1, %v9029_v16 }
 0x88d   :  { %6908 = vmatmul.mubr.msk.f32.gmra.mrb[50].mxu1 %vm858_vm1, %v9038_v19 }
 0x88e   :  { %6910 = vmatprep.mubr.msk.f32.mxu1 %vm858_vm1, %v9043_v20 }
 0x891   :  { %6911 = vmatmul.mubr.msk.f32.gmra.mrb[52].mxu1 %vm858_vm1, %v9052_v21 }
 0x892   :  { %6913 = vmatprep.mubr.msk.f32.mxu1 %vm858_vm1, %v9057_v22 }
 0x895   :  { %6914 = vmatmul.mubr.msk.f32.gmra.mrb[54].mxu1 %vm858_vm1, %v9066_v23 }
 0x94c   :  { %v6894_v49 = vpop.f32.mrb[40].mxu1 }
 0x94d   :  { %v3683_v58 = vpop.f32.mrb[41].mxu1 }
 0x950   :  { %v6897_v61 = vpop.f32.mrb[42].mxu1 }
 0x951   :  { %v3693_v5 = vpop.f32.mrb[43].mxu1 }
 0x954   :  { %v6900_v6 = vpop.f32.mrb[44].mxu1 }
 0x955   :  { %v3703_v7 = vpop.f32.mrb[45].mxu1 }
 0x956   :  { %6920 = vmatprep.mubr.msk.f32.mxu1 %vm1059_vm7, %v3703_v7  ;;  %v9839_v7 = vld [vmem:[%s10981_s8 + $0x13c] ss:$12 sps:$4 sm:$0xff]  }
 0x957   :  { %6921 = vmatmul.mubr.msk.f32.vlgmr.msra.gmra.mrb[56].mxu1 %vm1059_vm7, %v6900_v6 }
 0x958   :  { %v6903_v8 = vpop.f32.mrb[46].mxu1  ;;  %7598 = vmatpush3.bf16.msk.msra.mxu1 %vm9082_vm5, %v9073_v24 }
 0x959   :  { %v3713_v9 = vpop.f32.mrb[47].mxu1  ;;  %7601 = vmatprep.subr.msk.bf16.mxu1 %vm9082_vm5, %v9096_v42 }
 0x95a   :  { %6923 = vmatprep.mubr.msk.f32.mxu1 %vm1059_vm7, %v3713_v9  ;;  %v9847_v9 = vld [vmem:[%s10981_s8 + $0x138] ss:$12 sps:$4 sm:$0xff]  }
 0x95b   :  { %6924 = vmatmul.mubr.msk.f32.gmra.mrb[58].mxu1 %vm1059_vm7, %v6903_v8 }
 0x95c   :  { %6930 = vmatprep.mubr.msk.f32.mxu1 %vm1059_vm7, %v3683_v58  ;;  %v6906_v10 = vpop.f32.mrb[48].mxu1  ;;  %v9823_v58 = vld [vmem:[%s10981_s8 + $0x124] ss:$12 sps:$4 sm:$0xff]  }
 0x95d   :  { %v3723_v11 = vpop.f32.mrb[49].mxu1 }
 0x95f   :  { %6931 = vmatmul.mubr.msk.f32.vlgmr.msra.gmra.mrb[56].mxu1 %vm1059_vm7, %v6894_v49  ;;  %v9817_v49 = vld [vmem:[%s10981_s8 + $0x108] ss:$12 sps:$4 sm:$0xff]  }
 0x960   :  { %6933 = vmatprep.mubr.msk.f32.mxu1 %vm1059_vm7, %v3693_v5  ;;  %7604 = vmatpush3.bf16.msk.msra.mxu1 %vm9082_vm5, %v9096_v42  ;;  %v6909_v12 = vpop.f32.mrb[50].mxu1  ;;  %v9831_v5 = vld [vmem:[%s10981_s8 + $0x120] ss:$12 sps:$4 sm:$0xff]  }
 0x961   :  { %v3733_v15 = vpop.f32.mrb[51].mxu1  ;;  %7607 = vmatprep.subr.msk.bf16.mxu1 %vm9082_vm5, %v9117_v60 }
 0x963   :  { %6934 = vmatmul.mubr.msk.f32.gmra.mrb[58].mxu1 %vm1059_vm7, %v6897_v61 }
 0x964   :  { %6940 = vmatprep.mubr.msk.f32.mxu1 %vm1059_vm7, %v3723_v11  ;;  %v6912_v16 = vpop.f32.mrb[52].mxu1  ;;  %v9859_v11 = vld [vmem:[%s10981_s8 + $0x150] ss:$12 sps:$4 sm:$0xff]  }
 0x965   :  { %v3743_v19 = vpop.f32.mrb[53].mxu1 }
 0x967   :  { %6941 = vmatmul.mubr.msk.f32.vlgmr.msra.gmra.mrb[56].mxu1 %vm1059_vm7, %v6906_v10  ;;  %v9853_v10 = vld [vmem:[%s10981_s8 + $0x154] ss:$12 sps:$4 sm:$0xff]  }
 0x968   :  { %6943 = vmatprep.mubr.msk.f32.mxu1 %vm1059_vm7, %v3733_v15  ;;  %7610 = vmatpush3.bf16.msk.msra.mxu1 %vm9082_vm5, %v9117_v60  ;;  %v6915_v20 = vpop.f32.mrb[54].mxu1  ;;  %v9871_v15 = vld [vmem:[%s10981_s8 + $0x168] ss:$12 sps:$4 sm:$0xff]  }
 0x969   :  { %v3753_v21 = vpop.f32.mrb[55].mxu1 }
 0x96b   :  { %6944 = vmatmul.mubr.msk.f32.gmra.mrb[58].mxu1 %vm1059_vm7, %v6909_v12  ;;  %v9865_v12 = vld [vmem:[%s10981_s8 + $0x16c] ss:$12 sps:$4 sm:$0xff]  }
 0x96c   :  { %6950 = vmatprep.mubr.msk.f32.mxu1 %vm1059_vm7, %v3743_v19  ;;  %v9883_v19 = vld [vmem:[%s10981_s8 + $0x180] ss:$12 sps:$4 sm:$0xff]  }
 0x96f   :  { %6951 = vmatmul.mubr.msk.f32.vlgmr.msra.gmra.mrb[56].mxu1 %vm1059_vm7, %v6912_v16  ;;  %v9877_v16 = vld [vmem:[%s10981_s8 + $0x184] ss:$12 sps:$4 sm:$0xff]  }
 0x970   :  { %6953 = vmatprep.mubr.msk.f32.mxu1 %vm1059_vm7, %v3753_v21  ;;  %v9895_v21 = vld [vmem:[%s10981_s8 + $0x198] ss:$12 sps:$4 sm:$0xff]  }
 0x973   :  { %6954 = vmatmul.mubr.msk.f32.gmra.mrb[58].mxu1 %vm1059_vm7, %v6915_v20  ;;  %v9889_v20 = vld [vmem:[%s10981_s8 + $0x19c] ss:$12 sps:$4 sm:$0xff]  }
 0x974   :  { %6964 = vmatprep.mubr.msk.f32.mxu1 %vm1500_vm8, %v9142_v4 }
 0xa42   :  { %v6952_v22 = vpop.f32.mrb[56].mxu1 }
 0xa43   :  { %v4159_v23 = vadd.f32 %v6952_v22, %v9148_v26  ;;  %v4135_v24 = vpop.f32.mrb[57].mxu1  ;;  %v9901_v22 = vld [vmem:[%s10981_s8 + $0x1b4] ss:$12 sps:$4 sm:$0xff]  }
 0xa44   :  { %v4158_v31 = vadd.f32 %v4135_v24, %v9146_v25  ;;  %v9913_v24 = vld [vmem:[%s10981_s8 + $0x1cc] ss:$12 sps:$4 sm:$0xff]  }
 0xa45   :  { %v4163_v37 = vmax.f32 %v4159_v23, 0.0  ;;  %v9907_v23 = vld [vmem:[%s10981_s8 + $0x1b0] ss:$12 sps:$4 sm:$0xff]  }
 0xa46   :  { %v4162_v42 = vmax.f32 %v4158_v31, 0.0  ;;  %v6955_v60 = vpop.f32.mrb[58].mxu1  ;;  %v9919_v31 = vld [vmem:[%s10981_s8 + $0x1c8] ss:$12 sps:$4 sm:$0xff]  }
 0xa47   :  { %v4161_v29 = vadd.f32 %v6955_v60, %v9152_v39  ;;  %v4145_v3 = vpop.f32.mrb[59].mxu1  ;;  %v9936_v60 = vld [vmem:[%s10981_s8 + $0x110] ss:$12 sps:$4 sm:$0xff]  }
 0xa48   :  { %v7611_v44 = vpack.c.bf16 %v4163_v37, %v4162_v42  ;;  %v4160_v63 = vadd.f32 %v4145_v3, %v9154_v43  ;;  %v9927_v42 = vld [vmem:[%s10981_s8 + $0xf8] ss:$12 sps:$4 sm:$0xff]   ;;  %v9951_v3 = vld [vmem:[%s10981_s8 + $0x140] ss:$12 sps:$4 sm:$0xff]  }
 0xa49   :  { %v4165_v41 = vmax.f32 %v4161_v29, 0.0  ;;  %v9944_v29 = vld [vmem:[%s10981_s8 + $0x128] ss:$12 sps:$4 sm:$0xff]  }
 0xa4a   :  { %v4164_v50 = vmax.f32 %v4160_v63, 0.0  ;;  %7612 = vmatprep.subr.bf16.mxu1 %v7611_v44  ;;  %v9965_v63 = vld [vmem:[%s10981_s8 + $0x170] ss:$12 sps:$4 sm:$0xff]  }
 0xa4b   :  { %7614 = vmatpush3.bf16.msra.mxu1 %v7611_v44  ;;  %v9958_v44 = vld [vmem:[%s10981_s8 + $0x158] ss:$12 sps:$4 sm:$0xff]  }
 0xa4c   :  { %v7615_v4 = vpack.c.bf16 %v4165_v41, %v4164_v50  ;;  %v9972_v41 = vld [vmem:[%s10981_s8 + $0x188] ss:$12 sps:$4 sm:$0xff]   ;;  %v9979_v50 = vld [vmem:[%s10981_s8 + $0x1a0] ss:$12 sps:$4 sm:$0xff]  }
 0xa4e   :  { %7616 = vmatprep.subr.bf16.mxu1 %v7615_v4 }
 0xa4f   :  { %7618 = vmatpush3.bf16.msra.mxu1 %v7615_v4 }
 0xa50   :  { %7620 = vmatprep.subr.bf16.mxu1 %v9232_v38 }
 0xa52   :  { %6965 = vmatmul.mubr.msk.f32.vlgmr.msra.gmra.mrb[60].mxu1 %vm1500_vm8, %v9166_v54 }
 0xa53   :  { %6967 = vmatprep.mubr.msk.f32.mxu1 %vm1500_vm8, %v9171_v55  ;;  %7622 = vmatpush3.bf16.msra.mxu1 %v9232_v38 }
 0xa54   :  { %6980 = vmatprep.subr.msk.mxu1 %vm1260_vm6, %v9225_v28 }
 0xa56   :  { %6968 = vmatmul.mubr.msk.f32.gmra.mrb[62].mxu1 %vm1500_vm8, %v9181_v56 }
 0xa57   :  { %6970 = vmatprep.mubr.msk.f32.mxu1 %vm1500_vm8, %v9187_v57  ;;  %6981 = vmatpush3.msk.msra.mxu1 %vm1260_vm6, %v9225_v28  ;;  %v11112_v28 = vld [vmem:[#allocation8_spill] sm:$0xff] }
 0xa58   :  { %7624 = vmatprep.subr.bf16.mxu1 %v9161_v53 }
 0xa5a   :  { %6971 = vmatmul.mubr.msk.f32.gmra.mrb[64].mxu1 %vm1500_vm8, %v9196_v59  ;;  %v11110_v59 = vld [vmem:[#allocation5_spill] sm:$0xff] }
 0xa5b   :  { %6973 = vmatprep.mubr.msk.f32.mxu1 %vm1500_vm8, %v9201_v14  ;;  %v11111_v14 = vld [vmem:[#allocation7_spill] sm:$0xff] }
 0xa5e   :  { %6974 = vmatmul.mubr.msk.f32.gmra.mrb[66].mxu1 %vm1500_vm8, %v9210_v18  ;;  %v9775_v18 = vld [vmem:[%s10975_s2 + $0xf0] sm:$0xf] }
 0xa5f   :  { %6157 = vmatmul.mubr.msk.f32.vlgmr.msra.gmra.mrb[24].mxu0 %vm2788_vm14, %v9775_v18 }
 0xa60   :  { %7274 = vmatpush1.bf16.msra.mxu0 %v9805_v52 }
 0xa61   :  { %7276 = vmatprep.subr.bf16.mxu0 %v9810_v46 }
 0xa64   :  { %7278 = vmatpush1.bf16.msra.mxu0 %v9817_v49 }
 0xa65   :  { %7280 = vmatprep.subr.bf16.mxu0 %v9823_v58 }
 0xa68   :  { %7282 = vmatpush1.bf16.msra.mxu0 %v9831_v5 }
 0xa69   :  { %7284 = vmatprep.subr.bf16.mxu0 %v9839_v7 }
 0xa6c   :  { %7286 = vmatpush1.bf16.msra.mxu0 %v9847_v9 }
 0xa6d   :  { %7288 = vmatprep.subr.bf16.mxu0 %v9853_v10 }
 0xa70   :  { %7290 = vmatpush1.bf16.msra.mxu0 %v9859_v11 }
 0xa71   :  { %7292 = vmatprep.subr.bf16.mxu0 %v9865_v12 }
 0xa74   :  { %7294 = vmatpush1.bf16.msra.mxu0 %v9871_v15 }
 0xa75   :  { %7296 = vmatprep.subr.bf16.mxu0 %v9877_v16 }
 0xa78   :  { %7298 = vmatpush1.bf16.msra.mxu0 %v9883_v19 }
 0xa79   :  { %7300 = vmatprep.subr.bf16.mxu0 %v9889_v20 }
 0xa7c   :  { %7302 = vmatpush1.bf16.msra.mxu0 %v9895_v21 }
 0xa7d   :  { %7304 = vmatprep.subr.bf16.mxu0 %v9901_v22 }
 0xa80   :  { %7306 = vmatpush1.bf16.msra.mxu0 %v9907_v23 }
 0xa81   :  { %7308 = vmatprep.subr.bf16.mxu0 %v9913_v24 }
 0xa84   :  { %7310 = vmatpush1.bf16.msra.mxu0 %v9919_v31 }
 0xa85   :  { %7311 = vmatprep.subr.bf16.mxu0 %v11114_v33 }
 0xb25   :  { %v6966_v25 = vpop.f32.mrb[60].mxu1 }
 0xb26   :  { %v4232_v26 = vpop.f32.mrb[61].mxu1 }
 0xb29   :  { %v6969_v39 = vpop.f32.mrb[62].mxu1 }
 0xb2a   :  { %v4242_v43 = vpop.f32.mrb[63].mxu1 }
 0xb2b   :  { %6982 = vmatprep.mubr.msk.f32.mxu1 %vm1640_vm9, %v4242_v43 }
 0xb2c   :  { %6983 = vmatmul.mubr.msk.f32.vlgmr.msra.gmra.mrb[68].mxu1 %vm1640_vm9, %v6969_v39 }
 0xb2d   :  { %7626 = vmatpush3.bf16.msra.mxu1 %v9161_v53  ;;  %6991 = vmatprep.mubr.msk.f32.mxu1 %vm1640_vm9, %v4232_v26  ;;  %v6972_v54 = vpop.f32.mrb[64].mxu1  ;;  %v11109_v53 = vld [vmem:[#allocation6_spill] sm:$0xff]  ;;  %v11122_v26 = vld [vmem:[#allocation19_spill] sm:$0xff] }
 0xb2e   :  { %6989 = vmatprep.subr.msk.mxu1 %vm1260_vm6, %v9220_v0  ;;  %v4252_v55 = vpop.f32.mrb[65].mxu1 }
 0xb31   :  { %6990 = vmatpush3.msk.msra.mxu1 %vm1260_vm6, %v9220_v0  ;;  %v6975_v56 = vpop.f32.mrb[66].mxu1 }
 0xb32   :  { %7628 = vmatprep.subr.bf16.mxu1 %v9239_v40  ;;  %v4262_v57 = vpop.f32.mrb[67].mxu1  ;;  %v9825_v61 = vpop.f32.mrb[24].mxu0 }
 0xb33   :  { %v9833_v6 = vpop.f32.mrb[25].mxu0  ;;  %v2871_v37 = vrot.slane %v9825_v61, 1 }
 0xb34   :  { %6992 = vmatmul.mubr.msk.f32.vlgmr.msra.gmra.mrb[68].mxu1 %vm1640_vm9, %v6966_v25  ;;  %v2872_v8 = vrot.slane %v9833_v6, 1 }
 0xb35   :  { %7630 = vmatpush3.bf16.msra.mxu1 %v9239_v40  ;;  %7000 = vmatprep.mubr.msk.f32.mxu1 %vm1640_vm9, %v4252_v55  ;;  %v11124_v55 = vld [vmem:[#allocation18_spill] sm:$0xff] }
 0xb36   :  { %6998 = vmatprep.subr.msk.mxu1 %vm1260_vm6, %v9254_v47  ;;  %6158 = vmatprep.mubr.msk.f32.mxu0 %vm1500_vm8, %v2872_v8 }
 0xb37   :  { %2941 = vmatmul.mubr.f32.vlgmr.msra.gmra.mrb[26].mxu0 %v2871_v37 }
 0xb38   :  { %7313 = vmatpush1.bf16.msra.mxu0 %v9927_v42  ;;  %6159 = vmatprep.mubr.msk.f32.mxu0 %vm1500_vm8, %v2872_v8  ;;  %v10096_v8 = vld [vmem:[%s10981_s8 + $0x7c] ss:$12 sps:$4 sm:$0xff]  }
 0xb39   :  { %6999 = vmatpush3.msk.msra.mxu1 %vm1260_vm6, %v9254_v47  ;;  %v11113_v47 = vld [vmem:[#allocation9_spill] sm:$0xff]  ;;  %7314 = vmatprep.subr.bf16.mxu0 %v11114_v33 }
 0xb3a   :  { %7632 = vmatprep.subr.bf16.mxu1 %v11109_v53 }
 0xb3c   :  { %7001 = vmatmul.mubr.msk.f32.vlgmr.msra.gmra.mrb[68].mxu1 %vm1640_vm9, %v6972_v54  ;;  %7316 = vmatpush1.bf16.msra.mxu0 %v9936_v60  ;;  %v11123_v54 = vld [vmem:[#allocation20_spill] sm:$0xff] }
 0xb3d   :  { %7634 = vmatpush3.bf16.msra.mxu1 %v11109_v53  ;;  %7009 = vmatprep.mubr.msk.f32.mxu1 %vm1640_vm9, %v4262_v57  ;;  %v11126_v57 = vld [vmem:[#allocation16_spill] sm:$0xff]  ;;  %v11127_v53 = vld [vmem:[#allocation17_spill] sm:$0xff] }
 0xb3e   :  { %7007 = vmatprep.subr.msk.mxu1 %vm1260_vm6, %v11110_v59  ;;  %7317 = vmatprep.subr.bf16.mxu0 %v11114_v33 }
 0xb40   :  { %7319 = vmatpush1.bf16.msra.mxu0 %v9944_v29 }
 0xb41   :  { %7008 = vmatpush3.msk.msra.mxu1 %vm1260_vm6, %v11110_v59  ;;  %7320 = vmatprep.subr.bf16.mxu0 %v11114_v33  ;;  %v11128_v59 = vunpack.c.h.bf16 %v11124_v55 }
 0xb44   :  { %7010 = vmatmul.mubr.msk.f32.vlgmr.msra.gmra.mrb[68].mxu1 %vm1640_vm9, %v6975_v56  ;;  %7322 = vmatpush1.bf16.msra.mxu0 %v9951_v3  ;;  %v11125_v56 = vunpack.c.l.bf16 %v11124_v55  ;;  %v10144_v55 = vld [vmem:[%s10981_s8 + $0xdc] ss:$12 sps:$4 sm:$0xff]  }
 0xb45   :  { %7016 = vmatprep.mubr.msk.f32.mxu1 %vm1999_vm10, %v11111_v14  ;;  %7323 = vmatprep.subr.bf16.mxu0 %v11114_v33  ;;  %v11129_v14 = vld [vmem:[#allocation21_spill] sm:$0xff]  ;;  %11140 = vst [vmem:[#allocation12_spill] sm:$0xff] %v10144_v55 }
 0xb48   :  { %7325 = vmatpush1.bf16.msra.mxu0 %v9958_v44 }
 0xb49   :  { %7326 = vmatprep.subr.bf16.mxu0 %v11114_v33 }
 0xb4c   :  { %7328 = vmatpush1.bf16.msra.mxu0 %v9965_v63 }
 0xb4d   :  { %7329 = vmatprep.subr.bf16.mxu0 %v11114_v33 }
 0xb50   :  { %7331 = vmatpush1.bf16.msra.mxu0 %v9972_v41 }
 0xb51   :  { %7332 = vmatprep.subr.bf16.mxu0 %v11114_v33 }
 0xb54   :  { %7334 = vmatpush1.bf16.msra.mxu0 %v9979_v50 }
 0xb55   :  { %7335 = vmatprep.subr.bf16.mxu0 %v11114_v33 }
 0xc17   :  { %v7011_v0 = vpop.f32.mrb[68].mxu1 }
 0xc18   :  { %v4600_v38 = vadd.f32 %v7011_v0, %v11112_v28  ;;  %v4588_v40 = vpop.f32.mrb[69].mxu1  ;;  %v11130_v0 = vld [vmem:[#allocation22_spill] sm:$0xff]  ;;  %v11131_v28 = vld [vmem:[#allocation23_spill] sm:$0xff] }
 0xc19   :  { %v4599_v48 = vadd.f32 %v4588_v40, %v11113_v47  ;;  %v11133_v40 = vld [vmem:[#allocation24_spill] sm:$0xff] }
 0xc1a   :  { %v4602_v45 = vmax.f32 %v4600_v38, 0.0  ;;  %v11132_v38 = vunpack.c.h.bf16 %v11131_v28  ;;  %v10019_v47 = vld [vmem:[%s10981_s8 + $0x1b8] ss:$12 sps:$4 sm:$0xff]   ;;  %v10194_v28 = vld [vmem:[%s10981_s8 + $0x80] ss:$12 sps:$4 sm:$0xff]  }
 0xc1b   :  { %v4601_v17 = vmax.f32 %v4599_v48, 0.0  ;;  %7337 = vmatpush1.bf16.msra.mxu0 %v10019_v47  ;;  %v10026_v48 = vld [vmem:[%s10981_s8 + $0x1d0] ss:$12 sps:$4 sm:$0xff]   ;;  %11142 = vst [vmem:[#allocation13_spill] sm:$0xff] %v10194_v28 }
 0xc1c   :  { %7338 = vmatprep.subr.bf16.mxu0 %v11114_v33 }
 0xc1d   :  { %v7635_v35 = vpack.c.bf16 %v4602_v45, %v4601_v17  ;;  %v10032_v45 = vld [vmem:[%s10981_s8 + $0x4] ss:$12 sps:$4 sm:$0xff]   ;;  %v10037_v17 = vld [vmem:[%s10981_s8] ss:$12 sps:$4 sm:$0xff]  }
 0xc1f   :  { %7636 = vmatprep.subr.bf16.mxu1 %v7635_v35  ;;  %7340 = vmatpush1.bf16.msra.mxu0 %v10026_v48 }
 0xc20   :  { %7638 = vmatpush3.bf16.msra.mxu1 %v7635_v35  ;;  %7342 = vmatprep.subr.bf16.mxu0 %v10032_v45  ;;  %v10048_v35 = vld [vmem:[%s10981_s8 + $0x1c] ss:$12 sps:$4 sm:$0xff]  }
 0xc21   :  { %7639 = vmatprep.subr.bf16.mxu1 %v11114_v33 }
 0xc22   :  { %3012 = vmatmul.mubr.f32.vlgmr.msra.gmra.mrb[28].mxu0 %v2871_v37  ;;  %v10101_v37 = vld [vmem:[%s10981_s8 + $0x78] ss:$12 sps:$4 sm:$0xff]  }
 0xc23   :  { %7017 = vmatmul.mubr.msk.f32.vlgmr.msra.gmra.mrb[70].mxu1 %vm1999_vm10, %v11115_v62  ;;  %7344 = vmatpush1.bf16.msra.mxu0 %v10037_v17  ;;  %v10053_v62 = vld [vmem:[%s10981_s8 + $0x18] ss:$12 sps:$4 sm:$0xff]  }
 0xc24   :  { %7019 = vmatprep.mubr.msk.f32.mxu1 %vm1999_vm10, %v11116_v2  ;;  %7641 = vmatpush3.bf16.msra.mxu1 %v11117_v13  ;;  %v10060_v2 = vld [vmem:[%s10981_s8 + $0x34] ss:$12 sps:$4 sm:$0xff]   ;;  %v10065_v13 = vld [vmem:[%s10981_s8 + $0x30] ss:$12 sps:$4 sm:$0xff]  }
 0xc25   :  { %7642 = vmatprep.subr.bf16.mxu1 %v11114_v33  ;;  %6160 = vmatprep.mubr.msk.f32.mxu0 %vm1500_vm8, %v9833_v6 }
 0xc26   :  { %7346 = vmatprep.subr.bf16.mxu0 %v10048_v35 }
 0xc27   :  { %7020 = vmatmul.mubr.msk.f32.gmra.mrb[72].mxu1 %vm1999_vm10, %v11118_v36  ;;  %7348 = vmatpush1.bf16.msra.mxu0 %v10053_v62  ;;  %v10072_v36 = vld [vmem:[%s10981_s8 + $0x4c] ss:$12 sps:$4 sm:$0xff]  }
 0xc28   :  { %7644 = vmatpush3.bf16.msra.mxu1 %v11119_v32  ;;  %7032 = vmatprep.mubr.msk.f32.mxu1 %vm8779_vm11, %v11102_v30  ;;  %v10077_v32 = vld [vmem:[%s10981_s8 + $0x48] ss:$12 sps:$4 sm:$0xff]  }
 0xc29   :  { %7030 = vmatprep.subr.mxu1 %v11102_v30  ;;  %7350 = vmatprep.subr.bf16.mxu0 %v10060_v2 }
 0xc2b   :  { %7352 = vmatpush1.bf16.msra.mxu0 %v10065_v13 }
 0xc2c   :  { %7031 = vmatpush3.msra.mxu1 %v11121_v27  ;;  %7354 = vmatprep.subr.bf16.mxu0 %v10072_v36  ;;  %v10089_v27 = vld [vmem:[%s10981_s8 + $0x60] ss:$12 sps:$4 sm:$0xff]  }
 0xc2d   :  { %7645 = vmatprep.subr.bf16.mxu1 %v11114_v33 }
 0xc2f   :  { %7356 = vmatpush1.bf16.msra.mxu0 %v10077_v32 }
 0xc30   :  { %7358 = vmatprep.subr.bf16.mxu0 %v10084_v34 }
 0xc33   :  { %7360 = vmatpush1.bf16.msra.mxu0 %v10089_v27 }
 0xc34   :  { %7362 = vmatprep.subr.bf16.mxu0 %v10096_v8 }
 0xc37   :  { %7364 = vmatpush1.bf16.msra.mxu0 %v10101_v37 }
 0xcf6   :  { %v7018_v4 = vpop.f32.mrb[70].mxu1 }
 0xcf7   :  { %7033 = vmatmul.mubr.msk.f32.vlgmr.msra.gmra.mrb[74].mxu1 %vm2097_vm12, %v7018_v4  ;;  %v4669_v25 = vpop.f32.mrb[71].mxu1  ;;  %v10108_v4 = vld [vmem:[%s10981_s8 + $0x94] ss:$12 sps:$4 sm:$0xff]  }
 0xcf8   :  { %7647 = vmatpush3.bf16.msra.mxu1 %v11122_v26  ;;  %7045 = vmatprep.mubr.msk.f32.mxu1 %vm8779_vm11, %v11102_v30  ;;  %11134 = vst [vmem:[#allocation6_spill] sm:$0xff] %v10108_v4  ;;  %v10120_v26 = vld [vmem:[%s10981_s8 + $0xac] ss:$12 sps:$4 sm:$0xff]  }
 0xcf9   :  { %7648 = vmatprep.subr.bf16.mxu1 %v11114_v33  ;;  %7366 = vmatprep.subr.bf16.mxu0 %v10108_v4  ;;  %11136 = vst [vmem:[#allocation7_spill] sm:$0xff] %v10120_v26  ;;  %v10436_v4 = vld [vmem:[%s10981_s8 + $0x2ec] ss:$12 sps:$4 sm:$0xff]  }
 0xcfa   :  { %v7021_v39 = vpop.f32.mrb[72].mxu1 }
 0xcfb   :  { %v4679_v43 = vpop.f32.mrb[73].mxu1 }
 0xcfc   :  { %7650 = vmatpush3.bf16.msra.mxu1 %v11123_v54  ;;  %v10137_v54 = vld [vmem:[%s10981_s8 + $0xc0] ss:$12 sps:$4 sm:$0xff]  }
 0xcfd   :  { %7043 = vmatprep.subr.mxu1 %v11102_v30  ;;  %11139 = vst [vmem:[#allocation10_spill] sm:$0xff] %v10137_v54 }
 0xd00   :  { %7044 = vmatpush3.msra.mxu1 %v11125_v56  ;;  %v10149_v56 = vld [vmem:[%s10981_s8 + $0xd8] ss:$12 sps:$4 sm:$0xff]  }
 0xd01   :  { %7651 = vmatprep.subr.bf16.mxu1 %v11114_v33  ;;  %7046 = vmatmul.mubr.msk.f32.vlgmr.msra.gmra.mrb[76].mxu1 %vm2097_vm12, %v4669_v25  ;;  %v10113_v25 = vld [vmem:[%s10981_s8 + $0x90] ss:$12 sps:$4 sm:$0xff]   ;;  %11141 = vst [vmem:[#allocation11_spill] sm:$0xff] %v10149_v56 }
 0xd02   :  { %7653 = vmatpush3.bf16.msra.mxu1 %v11126_v57  ;;  %7058 = vmatprep.mubr.msk.f32.mxu1 %vm8779_vm11, %v11102_v30  ;;  %11135 = vst [vmem:[#allocation5_spill] sm:$0xff] %v10113_v25  ;;  %v10156_v57 = vld [vmem:[%s10981_s8 + $0x8] ss:$12 sps:$4 sm:$0xff]  }
 0xd03   :  { %7654 = vmatprep.subr.bf16.mxu1 %v11114_v33  ;;  %7368 = vmatpush1.bf16.msra.mxu0 %v10113_v25 }
 0xd04   :  { %7370 = vmatprep.subr.bf16.mxu0 %v10120_v26  ;;  %v10368_v26 = vld [vmem:[%s10981_s8 + $0x218] ss:$12 sps:$4 sm:$0xff]  }
 0xd05   :  { %11169 = vst [vmem:[#allocation41_spill] sm:$0xff] %v10368_v26 }
 0xd06   :  { %7656 = vmatpush3.bf16.msra.mxu1 %v11127_v53  ;;  %v10164_v53 = vld [vmem:[%s10981_s8 + $0x20] ss:$12 sps:$4 sm:$0xff]  }
 0xd07   :  { %7056 = vmatprep.subr.mxu1 %v11102_v30 }
 0xd0a   :  { %7057 = vmatpush3.msra.mxu1 %v11128_v59  ;;  %v10173_v59 = vld [vmem:[%s10981_s8 + $0x38] ss:$12 sps:$4 sm:$0xff]  }
 0xd0b   :  { %7657 = vmatprep.subr.bf16.mxu1 %v11114_v33  ;;  %7059 = vmatmul.mubr.msk.f32.vlgmr.msra.gmra.mrb[78].mxu1 %vm2097_vm12, %v4679_v43  ;;  %v10132_v43 = vld [vmem:[%s10981_s8 + $0xc4] ss:$12 sps:$4 sm:$0xff]  }
 0xd0c   :  { %7659 = vmatpush3.bf16.msra.mxu1 %v11129_v14  ;;  %7071 = vmatprep.mubr.msk.f32.mxu1 %vm8779_vm11, %v11102_v30  ;;  %11138 = vst [vmem:[#allocation9_spill] sm:$0xff] %v10132_v43  ;;  %v10180_v14 = vld [vmem:[%s10981_s8 + $0x50] ss:$12 sps:$4 sm:$0xff]  }
 0xd0d   :  { %7660 = vmatprep.subr.bf16.mxu1 %v11114_v33 }
 0xd10   :  { %7662 = vmatpush3.bf16.msra.mxu1 %v11130_v0  ;;  %v10187_v0 = vld [vmem:[%s10981_s8 + $0x68] ss:$12 sps:$4 sm:$0xff]  }
 0xd11   :  { %7069 = vmatprep.subr.mxu1 %v11102_v30 }
 0xd14   :  { %7070 = vmatpush3.msra.mxu1 %v11132_v38  ;;  %v10201_v38 = vld [vmem:[%s10981_s8 + $0x98] ss:$12 sps:$4 sm:$0xff]  }
 0xd15   :  { %7072 = vmatmul.mubr.msk.f32.vlgmr.msra.gmra.mrb[80].mxu1 %vm2097_vm12, %v7021_v39  ;;  %v10125_v39 = vld [vmem:[%s10981_s8 + $0xa8] ss:$12 sps:$4 sm:$0xff]   ;;  %11143 = vst [vmem:[#allocation14_spill] sm:$0xff] %v10201_v38 }
 0xd16   :  { %7076 = vmatprep.mubr.msk.f32.mxu1 %vm2398_vm13, %v11133_v40  ;;  %11137 = vst [vmem:[#allocation8_spill] sm:$0xff] %v10125_v39  ;;  %7372 = vmatpush1.bf16.msra.mxu0 %v10125_v39  ;;  %v10208_v40 = vld [vmem:[%s10981_s8 + $0xb0] ss:$12 sps:$4 sm:$0xff]   ;;  %v10267_v39 = vld [vmem:[%s10981_s8 + $0x22c] ss:$12 sps:$4 sm:$0xff]  }
 0xd17   :  { %7374 = vmatprep.subr.bf16.mxu0 %v10132_v43  ;;  %11144 = vst [vmem:[#allocation15_spill] sm:$0xff] %v10208_v40  ;;  %v10234_v43 = vld [vmem:[%s10981_s8 + $0x1e0] ss:$12 sps:$4 sm:$0xff]   ;;  %11153 = vst [vmem:[#allocation24_spill] sm:$0xff] %v10267_v39 }
 0xd18   :  { %11148 = vst [vmem:[#allocation16_spill] sm:$0xff] %v10234_v43 }
 0xd1a   :  { %7376 = vmatpush1.bf16.msra.mxu0 %v10137_v54  ;;  %v10228_v54 = vld [vmem:[%s10981_s8 + $0x1e4] ss:$12 sps:$4 sm:$0xff]  }
 0xd1b   :  { %7378 = vmatprep.subr.bf16.mxu0 %v10144_v55  ;;  %v10222_v55 = vld [vmem:[%s10981_s8 + $0xe0] ss:$12 sps:$4 sm:$0xff]   ;;  %11147 = vst [vmem:[#allocation18_spill] sm:$0xff] %v10228_v54 }
 0xd1c   :  { %11146 = vst [vmem:[#allocation20_spill] sm:$0xff] %v10222_v55 }
 0xd1e   :  { %7380 = vmatpush1.bf16.msra.mxu0 %v10149_v56  ;;  %v10215_v56 = vld [vmem:[%s10981_s8 + $0xc8] ss:$12 sps:$4 sm:$0xff]  }
 0xd1f   :  { %7381 = vmatprep.subr.bf16.mxu0 %v11114_v33  ;;  %11145 = vst [vmem:[#allocation19_spill] sm:$0xff] %v10215_v56 }
 0xd21   :  { %3084 = vmatmul.mubr.f32.vlgmr.msra.gmra.mrb[26].mxu0 %v9825_v61 }
 0xd22   :  { %7383 = vmatpush1.bf16.msra.mxu0 %v10156_v57  ;;  %6161 = vmatprep.mubr.msk.f32.mxu0 %vm1500_vm8, %v9833_v6 }
 0xd23   :  { %7384 = vmatprep.subr.bf16.mxu0 %v11114_v33 }
 0xd26   :  { %7386 = vmatpush1.bf16.msra.mxu0 %v10164_v53 }
 0xd27   :  { %7387 = vmatprep.subr.bf16.mxu0 %v11114_v33 }
 0xd2a   :  { %7389 = vmatpush1.bf16.msra.mxu0 %v10173_v59 }
 0xd2b   :  { %7390 = vmatprep.subr.bf16.mxu0 %v11114_v33 }
 0xd2e   :  { %7392 = vmatpush1.bf16.msra.mxu0 %v10180_v14 }
 0xd2f   :  { %7393 = vmatprep.subr.bf16.mxu0 %v11114_v33 }
 0xd32   :  { %7395 = vmatpush1.bf16.msra.mxu0 %v10187_v0 }
 0xd33   :  { %7396 = vmatprep.subr.bf16.mxu0 %v11114_v33 }
 0xd36   :  { %7398 = vmatpush1.bf16.msra.mxu0 %v10194_v28 }
 0xd37   :  { %7399 = vmatprep.subr.bf16.mxu0 %v11114_v33 }
 0xd3a   :  { %7401 = vmatpush1.bf16.msra.mxu0 %v10201_v38 }
 0xd3b   :  { %7402 = vmatprep.subr.bf16.mxu0 %v11114_v33 }
 0xd3e   :  { %7404 = vmatpush1.bf16.msra.mxu0 %v10208_v40  ;;  %v10241_v40 = vld [vmem:[%s10981_s8 + $0x1fc] ss:$12 sps:$4 sm:$0xff]  }
 0xd3f   :  { %7405 = vmatprep.subr.bf16.mxu0 %v11114_v33  ;;  %11149 = vst [vmem:[#allocation17_spill] sm:$0xff] %v10241_v40 }
 0xd42   :  { %7407 = vmatpush1.bf16.msra.mxu0 %v10215_v56  ;;  %v3161_v56 = vrot.slane %v9833_v6, 2 }
 0xd43   :  { %7408 = vmatprep.subr.bf16.mxu0 %v11114_v33 }
 0xd46   :  { %7410 = vmatpush1.bf16.msra.mxu0 %v10222_v55  ;;  %v10248_v55 = vld [vmem:[%s10981_s8 + $0x1f8] ss:$12 sps:$4 sm:$0xff]  }
 0xd47   :  { %7412 = vmatprep.subr.bf16.mxu0 %v10228_v54  ;;  %11150 = vst [vmem:[#allocation21_spill] sm:$0xff] %v10248_v55  ;;  %v10255_v54 = vld [vmem:[%s10981_s8 + $0x214] ss:$12 sps:$4 sm:$0xff]  }
 0xd48   :  { %11151 = vst [vmem:[#allocation22_spill] sm:$0xff] %v10255_v54 }
 0xd49   :  { %3155 = vmatmul.mubr.f32.vlgmr.msra.gmra.mrb[28].mxu0 %v9825_v61 }
 0xd4a   :  { %7414 = vmatpush1.bf16.msra.mxu0 %v10234_v43  ;;  %6162 = vmatprep.mubr.msk.f32.mxu0 %vm1500_vm8, %v3161_v56  ;;  %v10261_v43 = vld [vmem:[%s10981_s8 + $0x210] ss:$12 sps:$4 sm:$0xff]  }
 0xd4b   :  { %7416 = vmatprep.subr.bf16.mxu0 %v10241_v40  ;;  %11152 = vst [vmem:[#allocation23_spill] sm:$0xff] %v10261_v43  ;;  %v10273_v40 = vld [vmem:[%s10981_s8 + $0x228] ss:$12 sps:$4 sm:$0xff]  }
 0xd4c   :  { %11154 = vst [vmem:[#allocation26_spill] sm:$0xff] %v10273_v40 }
 0xd4e   :  { %7418 = vmatpush1.bf16.msra.mxu0 %v10248_v55  ;;  %v10279_v55 = vld [vmem:[%s10981_s8 + $0x244] ss:$12 sps:$4 sm:$0xff]  }
 0xd4f   :  { %7420 = vmatprep.subr.bf16.mxu0 %v10255_v54  ;;  %11155 = vst [vmem:[#allocation27_spill] sm:$0xff] %v10279_v55  ;;  %v10285_v54 = vld [vmem:[%s10981_s8 + $0x240] ss:$12 sps:$4 sm:$0xff]  }
 0xd50   :  { %11156 = vst [vmem:[#allocation28_spill] sm:$0xff] %v10285_v54 }
 0xd52   :  { %7422 = vmatpush1.bf16.msra.mxu0 %v10261_v43  ;;  %v10291_v43 = vld [vmem:[%s10981_s8 + $0x25c] ss:$12 sps:$4 sm:$0xff]  }
 0xd53   :  { %7424 = vmatprep.subr.bf16.mxu0 %v10267_v39  ;;  %11157 = vst [vmem:[#allocation29_spill] sm:$0xff] %v10291_v43  ;;  %v10297_v39 = vld [vmem:[%s10981_s8 + $0x258] ss:$12 sps:$4 sm:$0xff]  }
 0xd54   :  { %11158 = vst [vmem:[#allocation30_spill] sm:$0xff] %v10297_v39 }
 0xd56   :  { %7426 = vmatpush1.bf16.msra.mxu0 %v10273_v40  ;;  %v10303_v40 = vld [vmem:[%s10981_s8 + $0x274] ss:$12 sps:$4 sm:$0xff]  }
 0xd57   :  { %7428 = vmatprep.subr.bf16.mxu0 %v10279_v55  ;;  %11159 = vst [vmem:[#allocation31_spill] sm:$0xff] %v10303_v40  ;;  %v10309_v55 = vld [vmem:[%s10981_s8 + $0x270] ss:$12 sps:$4 sm:$0xff]  }
 0xd58   :  { %11160 = vst [vmem:[#allocation32_spill] sm:$0xff] %v10309_v55 }
 0xd5a   :  { %7430 = vmatpush1.bf16.msra.mxu0 %v10285_v54  ;;  %v10315_v54 = vld [vmem:[%s10981_s8 + $0x28c] ss:$12 sps:$4 sm:$0xff]  }
 0xd5b   :  { %7432 = vmatprep.subr.bf16.mxu0 %v10291_v43  ;;  %11161 = vst [vmem:[#allocation33_spill] sm:$0xff] %v10315_v54  ;;  %v10321_v43 = vld [vmem:[%s10981_s8 + $0x288] ss:$12 sps:$4 sm:$0xff]  }
 0xd5c   :  { %11162 = vst [vmem:[#allocation34_spill] sm:$0xff] %v10321_v43 }
 0xd5e   :  { %7434 = vmatpush1.bf16.msra.mxu0 %v10297_v39  ;;  %v10327_v39 = vld [vmem:[%s10981_s8 + $0x2a4] ss:$12 sps:$4 sm:$0xff]  }
 0xd5f   :  { %7436 = vmatprep.subr.bf16.mxu0 %v10303_v40  ;;  %11163 = vst [vmem:[#allocation35_spill] sm:$0xff] %v10327_v39  ;;  %v10333_v40 = vld [vmem:[%s10981_s8 + $0x2a0] ss:$12 sps:$4 sm:$0xff]  }
 0xd60   :  { %11164 = vst [vmem:[#allocation36_spill] sm:$0xff] %v10333_v40 }
 0xd62   :  { %7438 = vmatpush1.bf16.msra.mxu0 %v10309_v55  ;;  %v10339_v55 = vld [vmem:[%s10981_s8 + $0x2bc] ss:$12 sps:$4 sm:$0xff]  }
 0xd63   :  { %7440 = vmatprep.subr.bf16.mxu0 %v10315_v54  ;;  %11165 = vst [vmem:[#allocation37_spill] sm:$0xff] %v10339_v55  ;;  %v10345_v54 = vld [vmem:[%s10981_s8 + $0x2b8] ss:$12 sps:$4 sm:$0xff]  }
 0xd64   :  { %11166 = vst [vmem:[#allocation38_spill] sm:$0xff] %v10345_v54 }
 0xd66   :  { %7442 = vmatpush1.bf16.msra.mxu0 %v10321_v43  ;;  %v3160_v43 = vrot.slane %v9825_v61, 2 }
 0xd67   :  { %7444 = vmatprep.subr.bf16.mxu0 %v10327_v39  ;;  %v10353_v39 = vld [vmem:[%s10981_s8 + $0x1e8] ss:$12 sps:$4 sm:$0xff]  }
 0xd68   :  { %11167 = vst [vmem:[#allocation39_spill] sm:$0xff] %v10353_v39 }
 0xd6a   :  { %7446 = vmatpush1.bf16.msra.mxu0 %v10333_v40  ;;  %v10360_v40 = vld [vmem:[%s10981_s8 + $0x200] ss:$12 sps:$4 sm:$0xff]  }
 0xd6b   :  { %7448 = vmatprep.subr.bf16.mxu0 %v10339_v55  ;;  %11168 = vst [vmem:[#allocation40_spill] sm:$0xff] %v10360_v40 }
 0xd6e   :  { %7450 = vmatpush1.bf16.msra.mxu0 %v10345_v54 }
 0xd6f   :  { %7451 = vmatprep.subr.bf16.mxu0 %v11114_v33 }
 0xd71   :  { %3230 = vmatmul.mubr.f32.vlgmr.msra.gmra.mrb[26].mxu0 %v3160_v43 }
 0xd72   :  { %7453 = vmatpush1.bf16.msra.mxu0 %v10353_v39  ;;  %6163 = vmatprep.mubr.msk.f32.mxu0 %vm1500_vm8, %v3161_v56  ;;  %v10375_v39 = vld [vmem:[%s10981_s8 + $0x230] ss:$12 sps:$4 sm:$0xff]  }
 0xd73   :  { %7454 = vmatprep.subr.bf16.mxu0 %v11114_v33  ;;  %11170 = vst [vmem:[#allocation42_spill] sm:$0xff] %v10375_v39 }
 0xd76   :  { %7456 = vmatpush1.bf16.msra.mxu0 %v10360_v40 }
 0xd77   :  { %7457 = vmatprep.subr.bf16.mxu0 %v11114_v33 }
 0xd7a   :  { %7459 = vmatpush1.bf16.msra.mxu0 %v10368_v26  ;;  %v10389_v26 = vld [vmem:[%s10981_s8 + $0x260] ss:$12 sps:$4 sm:$0xff]  }
 0xd7b   :  { %7460 = vmatprep.subr.bf16.mxu0 %v11114_v33  ;;  %11172 = vst [vmem:[#allocation44_spill] sm:$0xff] %v10389_v26 }
 0xd7e   :  { %7462 = vmatpush1.bf16.msra.mxu0 %v10375_v39  ;;  %v10396_v39 = vld [vmem:[%s10981_s8 + $0x278] ss:$12 sps:$4 sm:$0xff]  }
 0xd7f   :  { %7463 = vmatprep.subr.bf16.mxu0 %v11114_v33  ;;  %11173 = vst [vmem:[#allocation45_spill] sm:$0xff] %v10396_v39 }
 0xdca   :  { %v4757_v54 = vpop.f32.mrb[74].mxu1 }
 0xdcb   :  { %v7034_v55 = vpop.f32.mrb[75].mxu1 }
 0xdcc   :  { %v10382_v55 = vld [vmem:[%s10981_s8 + $0x248] ss:$12 sps:$4 sm:$0xff]  }
 0xdcd   :  { %11171 = vst [vmem:[#allocation43_spill] sm:$0xff] %v10382_v55  ;;  %7465 = vmatpush1.bf16.msra.mxu0 %v10382_v55  ;;  %v10403_v55 = vld [vmem:[%s10981_s8 + $0x290] ss:$12 sps:$4 sm:$0xff]  }
 0xdce   :  { %7466 = vmatprep.subr.bf16.mxu0 %v11114_v33  ;;  %11174 = vst [vmem:[#allocation46_spill] sm:$0xff] %v10403_v55 }
 0xdd1   :  { %7468 = vmatpush1.bf16.msra.mxu0 %v10389_v26  ;;  %v10410_v26 = vld [vmem:[%s10981_s8 + $0x2a8] ss:$12 sps:$4 sm:$0xff]  }
 0xdd2   :  { %7469 = vmatprep.subr.bf16.mxu0 %v11114_v33  ;;  %11175 = vst [vmem:[#allocation47_spill] sm:$0xff] %v10410_v26 }
 0xdd4   :  { %v4830_v56 = vpop.f32.mrb[76].mxu1 }
 0xdd5   :  { %v4831_v40 = vadd.f32 %v4830_v56, %v4757_v54  ;;  %v7047_v38 = vpop.f32.mrb[77].mxu1  ;;  %7471 = vmatpush1.bf16.msra.mxu0 %v10396_v39 }
 0xdd6   :  { %7472 = vmatprep.subr.bf16.mxu0 %v11114_v33 }
 0xdd9   :  { %7474 = vmatpush1.bf16.msra.mxu0 %v10403_v55 }
 0xdda   :  { %7475 = vmatprep.subr.bf16.mxu0 %v11114_v33 }
 0xddd   :  { %7477 = vmatpush1.bf16.msra.mxu0 %v10410_v26  ;;  %v10430_v26 = vld [vmem:[%s10981_s8 + $0x2d0] ss:$12 sps:$4 sm:$0xff]  }
 0xdde   :  { %v4903_v54 = vpop.f32.mrb[78].mxu1  ;;  %7478 = vmatprep.subr.bf16.mxu0 %v11114_v33 }
 0xddf   :  { %v4907_v38 = vadd.f32 %v4903_v54, %v4831_v40  ;;  %v7060_v56 = vpop.f32.mrb[79].mxu1  ;;  %v10417_v40 = vld [vmem:[%s10981_s8 + $0x2c0] ss:$12 sps:$4 sm:$0xff]  }
 0xde0   :  { %v10423_v56 = vld [vmem:[%s10981_s8 + $0x2d4] ss:$12 sps:$4 sm:$0xff]  }
 0xde1   :  { %7480 = vmatpush1.bf16.msra.mxu0 %v10417_v40 }
 0xde2   :  { %7482 = vmatprep.subr.bf16.mxu0 %v10423_v56 }
 0xde4   :  { %3301 = vmatmul.mubr.f32.vlgmr.msra.gmra.mrb[28].mxu0 %v3160_v43  ;;  %v8704_v43 = vld [vmem:[%s10980_s7 + $0x54] ss:$8 sps:$4 sm:$0xff]  }
 0xde5   :  { %7484 = vmatpush1.bf16.msra.mxu0 %v10430_v26 }
 0xde6   :  { %7486 = vmatprep.subr.bf16.mxu0 %v10436_v4 }
 0xde8   :  { %v4977_v54 = vpop.f32.mrb[80].mxu1 }
 0xde9   :  { %v4981_v55 = vadd.f32 %v4977_v54, %v4907_v38  ;;  %v7073_v39 = vpop.f32.mrb[81].mxu1  ;;  %v11059_v38 = vrot.slane %v9833_v6, 3  ;;  %v10475_v54 = vld [vmem:[%s10981_s8 + $0x31c] ss:$12 sps:$4 sm:$0xff]  }
 0xdea   :  { %v10449_v39 = vld [vmem:[%s10981_s8 + $0x304] ss:$12 sps:$4 sm:$0xff]   ;;  %11178 = vst [vmem:[#allocation50_spill] sm:$0xff] %v10475_v54 }
 0xdeb   :  { %v4982_v25 = vadd.f32 %v4981_v55, %v9430_v1  ;;  %v10443_v1 = vld [vmem:[%s10981_s8 + $0x2e8] ss:$12 sps:$4 sm:$0xff]   ;;  %11176 = vst [vmem:[#allocation48_spill] sm:$0xff] %v10449_v39  ;;  %6164 = vmatprep.mubr.msk.f32.mxu0 %vm1500_vm8, %v11059_v38  ;;  %v8705_v55 = vld [vmem:[%s10980_s7 + $0x50] ss:$8 sps:$4 sm:$0xff]  }
 0xdec   :  { %7488 = vmatpush1.bf16.msra.mxu0 %v10443_v1  ;;  %v10493_v38 = vld [vmem:[%s10981_s8 + $0x334] ss:$12 sps:$4 sm:$0xff]  }
 0xded   :  { %v4983_v28 = vmax.f32 %v4982_v25, 0.0  ;;  %v8703_v25 = vld [vmem:[%s10975_s2 + $0xe8] sm:$0xff]  ;;  %7490 = vmatprep.subr.bf16.mxu0 %v10449_v39  ;;  %11180 = vst [vmem:[#allocation52_spill] sm:$0xff] %v10493_v38  ;;  %v8720_v39 = vld [vmem:[%s10980_s7 + $0x34] ss:$8 sps:$4 sm:$0xff]  }
 0xdef   :  { %7074 = vmatprep.subr.mxu1 %v4983_v28 }
 0xdf0   :  { %7075 = vmatpush3.msra.mxu1 %v4983_v28  ;;  %v10466_v28 = vld [vmem:[%s10981_s8 + $0x300] ss:$12 sps:$4 sm:$0xff]  }
 0xdf1   :  { %7077 = vmatmul.mubr.msk.f32.vlgmr.msra.gmra.mrb[82].mxu1 %vm2398_vm13, %v8703_v25  ;;  %7664 = vmatprep.subr.bf16.mxu1 %v8704_v43  ;;  %11177 = vst [vmem:[#allocation49_spill] sm:$0xff] %v10466_v28  ;;  %v8706_v25 = vld [vmem:[%s10980_s7 + $0x64] ss:$8 sps:$4 sm:$0xff]  }
 0xdf2   :  { %5127 = vmatprep.mubr.f32.mxu1 %v11102_v30  ;;  %7666 = vmatpush1.bf16.msra.mxu1 %v8705_v55  ;;  %v10484_v43 = vld [vmem:[%s10981_s8 + $0x318] ss:$12 sps:$4 sm:$0xff]   ;;  %v8707_v55 = vld [vmem:[%s10980_s7 + $0x60] ss:$8 sps:$4 sm:$0xff]  }
 0xdf3   :  { %7668 = vmatprep.subr.bf16.mxu1 %v8706_v25  ;;  %7492 = vmatpush1.bf16.msra.mxu0 %v10466_v28  ;;  %11179 = vst [vmem:[#allocation51_spill] sm:$0xff] %v10484_v43  ;;  %v8708_v25 = vld [vmem:[%s10980_s7 + $0x74] ss:$8 sps:$4 sm:$0xff]  }
 0xdf4   :  { %7494 = vmatprep.subr.bf16.mxu0 %v10475_v54  ;;  %v10502_v28 = vld [vmem:[%s10981_s8 + $0x330] ss:$12 sps:$4 sm:$0xff]   ;;  %v10511_v54 = vld [vmem:[%s10981_s8 + $0x34c] ss:$12 sps:$4 sm:$0xff]  }
 0xdf5   :  { %11181 = vst [vmem:[#allocation53_spill] sm:$0xff] %v10502_v28  ;;  %11182 = vst [vmem:[#allocation54_spill] sm:$0xff] %v10511_v54 }
 0xdf6   :  { %7670 = vmatpush1.bf16.msra.mxu1 %v8707_v55  ;;  %v8709_v55 = vld [vmem:[%s10980_s7 + $0x70] ss:$8 sps:$4 sm:$0xff]  }
 0xdf7   :  { %7672 = vmatprep.subr.bf16.mxu1 %v8708_v25  ;;  %7496 = vmatpush1.bf16.msra.mxu0 %v10484_v43  ;;  %v8710_v25 = vld [vmem:[%s10980_s7 + $0x84] ss:$8 sps:$4 sm:$0xff]   ;;  %v10520_v43 = vld [vmem:[%s10981_s8 + $0x348] ss:$12 sps:$4 sm:$0xff]  }
 0xdf8   :  { %7498 = vmatprep.subr.bf16.mxu0 %v10493_v38  ;;  %11183 = vst [vmem:[#allocation55_spill] sm:$0xff] %v10520_v43  ;;  %v10529_v38 = vld [vmem:[%s10981_s8 + $0x364] ss:$12 sps:$4 sm:$0xff]  }
 0xdf9   :  { %11184 = vst [vmem:[#allocation56_spill] sm:$0xff] %v10529_v38 }
 0xdfa   :  { %7674 = vmatpush1.bf16.msra.mxu1 %v8709_v55  ;;  %v8711_v55 = vld [vmem:[%s10980_s7 + $0x80] ss:$8 sps:$4 sm:$0xff]  }
 0xdfb   :  { %7676 = vmatprep.subr.bf16.mxu1 %v8710_v25  ;;  %7500 = vmatpush1.bf16.msra.mxu0 %v10502_v28  ;;  %v8712_v25 = vld [vmem:[%s10980_s7 + $0x94] ss:$8 sps:$4 sm:$0xff]   ;;  %v10538_v28 = vld [vmem:[%s10981_s8 + $0x360] ss:$12 sps:$4 sm:$0xff]  }
 0xdfc   :  { %7502 = vmatprep.subr.bf16.mxu0 %v10511_v54  ;;  %11185 = vst [vmem:[#allocation57_spill] sm:$0xff] %v10538_v28  ;;  %v10547_v54 = vld [vmem:[%s10981_s8 + $0x37c] ss:$12 sps:$4 sm:$0xff]  }
 0xdfd   :  { %11186 = vst [vmem:[#allocation58_spill] sm:$0xff] %v10547_v54 }
 0xdfe   :  { %7678 = vmatpush1.bf16.msra.mxu1 %v8711_v55  ;;  %v8713_v55 = vld [vmem:[%s10980_s7 + $0x90] ss:$8 sps:$4 sm:$0xff]  }
 0xdff   :  { %7680 = vmatprep.subr.bf16.mxu1 %v8712_v25  ;;  %7504 = vmatpush1.bf16.msra.mxu0 %v10520_v43  ;;  %v8714_v25 = vld [vmem:[%s10980_s7 + $0x4] ss:$8 sps:$4 sm:$0xff]  }
 0xe00   :  { %7506 = vmatprep.subr.bf16.mxu0 %v10529_v38  ;;  %v10556_v43 = vld [vmem:[%s10981_s8 + $0x378] ss:$12 sps:$4 sm:$0xff]   ;;  %v10634_v38 = vld [vmem:[%s10981_s8 + $0x368] ss:$12 sps:$4 sm:$0xff]  }
 0xe01   :  { %11187 = vst [vmem:[#allocation59_spill] sm:$0xff] %v10556_v43  ;;  %11197 = vst [vmem:[#allocation68_spill] sm:$0xff] %v10634_v38 }
 0xe02   :  { %7682 = vmatpush1.bf16.msra.mxu1 %v8713_v55  ;;  %v10562_v55 = vld [vmem:[%s10981_s8 + $0x394] ss:$12 sps:$4 sm:$0xff]  }
 0xe03   :  { %7684 = vmatprep.subr.bf16.mxu1 %v8714_v25  ;;  %7508 = vmatpush1.bf16.msra.mxu0 %v10538_v28  ;;  %11188 = vst [vmem:[#allocation60_spill] sm:$0xff] %v10562_v55  ;;  %v10568_v25 = vld [vmem:[%s10981_s8 + $0x390] ss:$12 sps:$4 sm:$0xff]   ;;  %v10574_v28 = vld [vmem:[%s10981_s8 + $0x3ac] ss:$12 sps:$4 sm:$0xff]  }
 0xe04   :  { %7510 = vmatprep.subr.bf16.mxu0 %v10547_v54  ;;  %11189 = vst [vmem:[#allocation61_spill] sm:$0xff] %v10568_v25  ;;  %11190 = vst [vmem:[#allocation62_spill] sm:$0xff] %v10574_v28  ;;  %v10580_v54 = vld [vmem:[%s10981_s8 + $0x3a8] ss:$12 sps:$4 sm:$0xff]  }
 0xe05   :  { %11191 = vst [vmem:[#allocation63_spill] sm:$0xff] %v10580_v54 }
 0xe07   :  { %7512 = vmatpush1.bf16.msra.mxu0 %v10556_v43  ;;  %v3309_v43 = vrot.slane %v9825_v61, 3  ;;  %v10605_v61 = vld [vmem:[%s10981_s8 + $0x308] ss:$12 sps:$4 sm:$0xff]  }
 0xe08   :  { %7514 = vmatprep.subr.bf16.mxu0 %v10562_v55  ;;  %v10588_v55 = vld [vmem:[%s10981_s8 + $0x2d8] ss:$12 sps:$4 sm:$0xff]   ;;  %11193 = vst [vmem:[#allocation64_spill] sm:$0xff] %v10605_v61 }
 0xe0b   :  { %7516 = vmatpush1.bf16.msra.mxu0 %v10568_v25  ;;  %v10595_v25 = vld [vmem:[%s10981_s8 + $0x2f0] ss:$12 sps:$4 sm:$0xff]  }
 0xe0c   :  { %7518 = vmatprep.subr.bf16.mxu0 %v10574_v28  ;;  %v11192_v28 = vrot.slane %v9833_v6, 3  ;;  %v10619_v6 = vld [vmem:[%s10981_s8 + $0x338] ss:$12 sps:$4 sm:$0xff]  }
 0xe0d   :  { %11195 = vst [vmem:[#allocation66_spill] sm:$0xff] %v10619_v6 }
 0xe0f   :  { %7520 = vmatpush1.bf16.msra.mxu0 %v10580_v54  ;;  %v10612_v54 = vld [vmem:[%s10981_s8 + $0x320] ss:$12 sps:$4 sm:$0xff]  }
 0xe10   :  { %7521 = vmatprep.subr.bf16.mxu0 %v11114_v33  ;;  %11194 = vst [vmem:[#allocation65_spill] sm:$0xff] %v10612_v54 }
 0xe12   :  { %3379 = vmatmul.mubr.f32.vlgmr.msra.gmra.mrb[26].mxu0 %v3309_v43 }
 0xe13   :  { %7523 = vmatpush1.bf16.msra.mxu0 %v10588_v55  ;;  %6165 = vmatprep.mubr.msk.f32.mxu0 %vm1500_vm8, %v11192_v28  ;;  %v10626_v28 = vld [vmem:[%s10981_s8 + $0x350] ss:$12 sps:$4 sm:$0xff]  }
 0xe14   :  { %7524 = vmatprep.subr.bf16.mxu0 %v11114_v33  ;;  %11196 = vst [vmem:[#allocation67_spill] sm:$0xff] %v10626_v28 }
 0xe17   :  { %7526 = vmatpush1.bf16.msra.mxu0 %v10595_v25 }
 0xe18   :  { %7527 = vmatprep.subr.bf16.mxu0 %v11114_v33 }
 0xe1b   :  { %7529 = vmatpush1.bf16.msra.mxu0 %v10605_v61 }
 0xe1c   :  { %7530 = vmatprep.subr.bf16.mxu0 %v11114_v33 }
 0xe1f   :  { %7532 = vmatpush1.bf16.msra.mxu0 %v10612_v54 }
 0xe20   :  { %7533 = vmatprep.subr.bf16.mxu0 %v11114_v33 }
 0xe23   :  { %7535 = vmatpush1.bf16.msra.mxu0 %v10619_v6  ;;  %v10641_v6 = vld [vmem:[%s10981_s8 + $0x380] ss:$12 sps:$4 sm:$0xff]  }
 0xe24   :  { %7536 = vmatprep.subr.bf16.mxu0 %v11114_v33  ;;  %11198 = vst [vmem:[#allocation69_spill] sm:$0xff] %v10641_v6 }
 0xe27   :  { %7538 = vmatpush1.bf16.msra.mxu0 %v10626_v28  ;;  %v10648_v28 = vld [vmem:[%s10981_s8 + $0x398] ss:$12 sps:$4 sm:$0xff]  }
 0xe28   :  { %7539 = vmatprep.subr.bf16.mxu0 %v11114_v33  ;;  %11199 = vst [vmem:[#allocation70_spill] sm:$0xff] %v10648_v28 }
 0xe2b   :  { %7541 = vmatpush1.bf16.msra.mxu0 %v10634_v38  ;;  %v10655_v38 = vld [vmem:[%s10981_s8 + $0x3b0] ss:$12 sps:$4 sm:$0xff]  }
 0xe2c   :  { %7542 = vmatprep.subr.bf16.mxu0 %v11114_v33  ;;  %11200 = vst [vmem:[#allocation71_spill] sm:$0xff] %v10655_v38 }
 0xe2f   :  { %7544 = vmatpush1.bf16.msra.mxu0 %v10641_v6 }
 0xe30   :  { %7545 = vmatprep.subr.bf16.mxu0 %v11114_v33 }
 0xe33   :  { %7547 = vmatpush1.bf16.msra.mxu0 %v10648_v28  ;;  %v8715_v28 = vld [vmem:[%s10980_s7] ss:$8 sps:$4 sm:$0xff]  }
 0xe34   :  { %7548 = vmatprep.subr.bf16.mxu0 %v11114_v33 }
 0xe37   :  { %7550 = vmatpush1.bf16.msra.mxu0 %v10655_v38  ;;  %v8716_v38 = vld [vmem:[%s10980_s7 + $0x14] ss:$8 sps:$4 sm:$0xff]  }
 0xe3a   :  { %3450 = vmatmul.mubr.f32.vlgmr.msra.gmra.mrb[28].mxu0 %v3309_v43  ;;  %v8717_v43 = vld [vmem:[%s10980_s7 + $0x10] ss:$8 sps:$4 sm:$0xff]  }
 0xe3b   :  { %5433 = vmatprep.mubr.f32.mxu0 %v11102_v30 }
 0xec4   :  { %v10659_v6 = vpop.f32.mrb[82].mxu1 }
 0xec5   :  { %v5050_v54 = vpop.f32.mrb[83].mxu1 }
 0xec6   :  { %v5060_v61 = vrot.slane %v5050_v54, 4 }
 0xec8   :  { %6250 = vmatmul.mubr.msk.f32.vlgmr.msra.gmra.mrb[84].mxu1 %vm720_vm0, %v5060_v61  ;;  %v8718_v61 = vld [vmem:[%s10980_s7 + $0x24] ss:$8 sps:$4 sm:$0xff]  }
 0xec9   :  { %7686 = vmatpush1.bf16.msra.mxu1 %v8715_v28  ;;  %5200 = vmatprep.mubr.f32.mxu1 %v11102_v30  ;;  %v8719_v28 = vld [vmem:[%s10980_s7 + $0x20] ss:$8 sps:$4 sm:$0xff]  }
 0xeca   :  { %7688 = vmatprep.subr.bf16.mxu1 %v8716_v38  ;;  %v8721_v38 = vld [vmem:[%s10980_s7 + $0x30] ss:$8 sps:$4 sm:$0xff]  }
 0xecd   :  { %7690 = vmatpush1.bf16.msra.mxu1 %v8717_v43  ;;  %v8722_v43 = vld [vmem:[%s10980_s7 + $0x44] ss:$8 sps:$4 sm:$0xff]  }
 0xece   :  { %7692 = vmatprep.subr.bf16.mxu1 %v8718_v61  ;;  %v8723_v61 = vld [vmem:[%s10980_s7 + $0x40] ss:$8 sps:$4 sm:$0xff]  }
 0xed1   :  { %7694 = vmatpush1.bf16.msra.mxu1 %v8719_v28  ;;  %v8724_v28 = vld [vmem:[%s10980_s7 + $0xa4] ss:$8 sps:$4 sm:$0xff]  }
 0xed2   :  { %7696 = vmatprep.subr.bf16.mxu1 %v8720_v39  ;;  %v8725_v39 = vld [vmem:[%s10980_s7 + $0xa0] ss:$8 sps:$4 sm:$0xff]  }
 0xed5   :  { %7698 = vmatpush1.bf16.msra.mxu1 %v8721_v38  ;;  %v8726_v38 = vld [vmem:[%s10980_s7 + $0xb4] ss:$8 sps:$4 sm:$0xff]  }
 0xed6   :  { %7700 = vmatprep.subr.bf16.mxu1 %v8722_v43  ;;  %v8727_v43 = vld [vmem:[%s10980_s7 + $0xb0] ss:$8 sps:$4 sm:$0xff]  }
 0xed9   :  { %7702 = vmatpush1.bf16.msra.mxu1 %v8723_v61  ;;  %v8729_v61 = vld [vmem:[%s10980_s7 + $0xc0] ss:$8 sps:$4 sm:$0xff]  }
 0xeda   :  { %7704 = vmatprep.subr.bf16.mxu1 %v8724_v28  ;;  %v8730_v28 = vld [vmem:[%s10980_s7 + $0xd4] ss:$8 sps:$4 sm:$0xff]  }
 0xedc   :  { %6251 = vmatmul.mubr.msk.f32.vlgmr.msra.gmra.mrb[84].mxu1 %vm720_vm0, %v5050_v54  ;;  %v8728_v54 = vld [vmem:[%s10980_s7 + $0xc4] ss:$8 sps:$4 sm:$0xff]  }
 0xedd   :  { %7706 = vmatpush1.bf16.msra.mxu1 %v8725_v39  ;;  %5274 = vmatprep.mubr.f32.mxu1 %v11102_v30  ;;  %v8731_v39 = vld [vmem:[%s10980_s7 + $0xd0] ss:$8 sps:$4 sm:$0xff]  }
 0xede   :  { %7708 = vmatprep.subr.bf16.mxu1 %v8726_v38 }
 0xee1   :  { %7710 = vmatpush1.bf16.msra.mxu1 %v8727_v43  ;;  %v8732_v43 = vld [vmem:[%s10980_s7 + $0xe4] ss:$8 sps:$4 sm:$0xff]  }
 0xee2   :  { %7712 = vmatprep.subr.bf16.mxu1 %v8728_v54 }
 0xee5   :  { %7714 = vmatpush1.bf16.msra.mxu1 %v8729_v61  ;;  %v3380_v38 = vpop.f32.mrb[26].mxu0  ;;  %v8733_v61 = vld [vmem:[%s10980_s7 + $0xe0] ss:$8 sps:$4 sm:$0xff]  }
 0xee6   :  { %7716 = vmatprep.subr.bf16.mxu1 %v8730_v28  ;;  %8682 = vtanh.f32 %v3380_v38  ;;  %v3382_v54 = vpop.f32.mrb[27].mxu0  ;;  %v8734_v28 = vld [vmem:[%s10980_s7 + $0xf4] ss:$8 sps:$4 sm:$0xff]   ;;  %v8736_v38 = vld [vmem:[%s10980_s7 + $0x104] ss:$8 sps:$4 sm:$0xff]  }
 0xee7   :  { %8684 = vtanh.f32 %v3382_v54 }
 0xee9   :  { %7718 = vmatpush1.bf16.msra.mxu1 %v8731_v39  ;;  %v8735_v39 = vld [vmem:[%s10980_s7 + $0xf0] ss:$8 sps:$4 sm:$0xff]  }
 0xeea   :  { %7720 = vmatprep.subr.bf16.mxu1 %v8732_v43 }
 0xeed   :  { %7722 = vmatpush1.bf16.msra.mxu1 %v8733_v61  ;;  %v8737_v61 = vld [vmem:[%s10980_s7 + $0x100] ss:$8 sps:$4 sm:$0xff]  }
 0xeee   :  { %7724 = vmatprep.subr.bf16.mxu1 %v8734_v28  ;;  %v8738_v28 = vld [vmem:[%s10980_s7 + $0x114] ss:$8 sps:$4 sm:$0xff]  }
 0xef0   :  { %6252 = vmatmul.mubr.msk.f32.vlgmr.msra.gmra.mrb[84].mxu1 %vm720_vm0, %v10659_v6  ;;  %v8683_v43 = vpop.eup %8682 }
 0xef1   :  { %7726 = vmatpush1.bf16.msra.mxu1 %v8735_v39  ;;  %5350 = vmatprep.mubr.f32.mxu1 %v11102_v30  ;;  %v8685_v54 = vpop.eup %8684  ;;  %v8739_v30 = vld [vmem:[%s10980_s7 + $0x110] ss:$8 sps:$4 sm:$0xff]  }
 0xef2   :  { %7728 = vmatprep.subr.bf16.mxu1 %v8736_v38  ;;  %v3464_v39 = vcombine.low %v8683_v43, %v8685_v54  ;;  %v8740_v38 = vld [vmem:[%s10980_s7 + $0x124] ss:$8 sps:$4 sm:$0xff]   ;;  %v8743_v43 = vld [vmem:[%s10980_s7 + $0x130] ss:$8 sps:$4 sm:$0xff]   ;;  %v5283_v54 = vrot.slane %v10659_v6, 4 }
 0xef5   :  { %7730 = vmatpush1.bf16.msra.mxu1 %v8737_v61  ;;  %v8741_v61 = vld [vmem:[%s10980_s7 + $0x120] ss:$8 sps:$4 sm:$0xff]  }
 0xef6   :  { %7732 = vmatprep.subr.bf16.mxu1 %v8738_v28  ;;  %v8742_v28 = vld [vmem:[%s10980_s7 + $0x134] ss:$8 sps:$4 sm:$0xff]   ;;  %s8783_s7 = smov [#allocation2]  }
 0xef7   :  { %s6066_s16 = sshll.u32 %s8783_s7, 4  ;;  %s6067_s16 = int_to_ptr.vmem [resolvable:$true] %s6066_s16 }
 0xef8   :  { %s8749_s17 = scalar_lea.vmem %s6067_s16, 96  ;;  %p8754_p1 = scmp.lt.s32.totalorder %s6067_s16, %s6067_s16 }
 0xef9   :  { %7734 = vmatpush1.bf16.msra.mxu1 %v8739_v30  ;;  %p8750_p0 = scmp.ne.s32.totalorder %s6067_s16, %s8749_s17  ;;  %p8755_p2 = scmp.lt.s32.totalorder %s8749_s17, %s8749_s17 }
 0xefa   :  { %7736 = vmatprep.subr.bf16.mxu1 %v8740_v38  ;;  %v8782_v38 = vmov 1966171168  }
 0xefb   :  { %p8756_p3 = por %p8755_p2, %p8754_p1 }
 0xefd   :  { %7738 = vmatpush1.bf16.msra.mxu1 %v8741_v61  ;;  %v3466_v61 = vunpack.c.l.s4 %v8782_v38  ;;  %p8757_p4 = pnand %p8756_p3, %p8750_p0 }
 0xefe   :  { %7740 = vmatprep.subr.bf16.mxu1 %v8742_v28 }
 0xf01   :  { %7742 = vmatpush1.bf16.msra.mxu1 %v8743_v43 }
 0xf02   :  { %7783 = vmatprep.subr.bf16.mxu1 %v11114_v33 }
 0xf04   :  { %6253 = vmatmul.mubr.msk.f32.vlgmr.msra.gmra.mrb[84].mxu1 %vm720_vm0, %v5283_v54 }
 0xf05   :  { %7785 = vmatpush1.bf16.msra.mxu1 %v9927_v42  ;;  %v3468_v42 = vlaneseq }
 0xf06   :  { %7786 = vmatprep.subr.bf16.mxu1 %v11114_v33 }
 0xf07   :  { %v3469_v28 = vshrl.u32 %v3468_v42, 7  ;;  %vm10781_vm15 = vcmp.lt.s32.totalorder %v3468_v42, 320  ;;  %v11238_v42 = vld [vmem:[#allocation33_spill] sm:$0xff] }
 0xf09   :  { %7788 = vmatpush1.bf16.msra.mxu1 %v9936_v60  ;;  %v3467_v60 = vunpack.c.0.s8 %v3466_v61 }
 0xf0a   :  { %7789 = vmatprep.subr.bf16.mxu1 %v11114_v33 }
 0xf0d   :  { %7791 = vmatpush1.bf16.msra.mxu1 %v9944_v29  ;;  %v3451_v30 = vpop.f32.mrb[28].mxu0  ;;  %v10770_v29 = vsub.s32 %v3467_v60, %v3469_v28  ;;  %v11239_v60 = vld [vmem:[#allocation34_spill] sm:$0xff] }
 0xf0e   :  { %7792 = vmatprep.subr.bf16.mxu1 %v11114_v33  ;;  %8686 = vtanh.f32 %v3451_v30  ;;  %v3453_v6 = vpop.f32.mrb[29].mxu0  ;;  %v11240_v28 = vld [vmem:[#allocation46_spill] sm:$0xff] }
 0xf11   :  { %7794 = vmatpush1.bf16.msra.mxu1 %v9951_v3 }
 0xf12   :  { %7795 = vmatprep.subr.bf16.mxu1 %v11114_v33 }
 0xf15   :  { %7797 = vmatpush1.bf16.msra.mxu1 %v9958_v44  ;;  %v3471_v44 = vrot.slane %v3464_v39, %v10770_v29 }
 0xf16   :  { %7798 = vmatprep.subr.bf16.mxu1 %v11114_v33 }
 0xf18   :  { %v8687_v3 = vpop.eup %8686 }
 0xf19   :  { %7800 = vmatpush1.bf16.msra.mxu1 %v9965_v63  ;;  %v3478_v43 = vrot.slane %v8687_v3, %v10770_v29  ;;  %v11241_v3 = vld [vmem:[#allocation35_spill] sm:$0xff] }
 0xf1a   :  { %7801 = vmatprep.subr.bf16.mxu1 %v11114_v33 }
 0xf1b   :  { %v3479_v54 = vcombine.low %v3471_v44, %v3478_v43  ;;  %v11242_v43 = vld [vmem:[#allocation36_spill] sm:$0xff]  ;;  %v11243_v44 = vld [vmem:[#allocation47_spill] sm:$0xff] }
 0xf1d   :  { %7803 = vmatpush1.bf16.msra.mxu1 %v9972_v41  ;;  %v3486_v63 = vrot.slane %v3479_v54, %v10770_v29  ;;  %v11244_v54 = vld [vmem:[#allocation37_spill] sm:$0xff] }
 0xf1e   :  { %7804 = vmatprep.subr.bf16.mxu1 %v11114_v33 }
 0xf1f   :  { %3492 = vst.msk [vmem:[#allocation2] sm:$0x7] %vm10781_vm15, %v3486_v63  ;;  %v11245_v63 = vld [vmem:[#allocation38_spill] sm:$0xff] }
 0xf21   :  { %7806 = vmatpush1.bf16.msra.mxu1 %v9979_v50  ;;  %v11203_v50 = vld [vmem:[#allocation25_spill] sm:$0xff] }
 0xf22   :  { %7807 = vmatprep.subr.bf16.mxu1 %v11114_v33 }
 0xf25   :  { %7809 = vmatpush1.bf16.msra.mxu1 %v10019_v47 }
 0xf26   :  { %7810 = vmatprep.subr.bf16.mxu1 %v11114_v33 }
 0xf29   :  { %7812 = vmatpush1.bf16.msra.mxu1 %v10026_v48  ;;  %v11220_v48 = vld [vmem:[#allocation17_spill] sm:$0xff] }
 0xf2a   :  { %7853 = vmatprep.subr.bf16.mxu1 %v11114_v33 }
 0xfd7   :  { %v5352_v41 = vpop.f32.mrb[84].mxu1 }
 0xfd8   :  { %v5359_v39 = vadd.f32 %v5352_v41, %v11203_v50  ;;  %v5354_v6 = vpop.f32.mrb[85].mxu1 }
 0xfd9   :  { %v5360_v47 = vadd.f32 %v5354_v6, %v11203_v50  ;;  %v11252_v6 = vld [vmem:[#allocation52_spill] sm:$0xff] }
 0xfda   :  { %v5361_v61 = vmax.f32 %v5359_v39, 0.0  ;;  %v11249_v39 = vld [vmem:[#allocation50_spill] sm:$0xff] }
 0xfdb   :  { %v5362_v38 = vmax.f32 %v5360_v47, 0.0  ;;  %v11255_v47 = vld [vmem:[#allocation54_spill] sm:$0xff] }
 0xfdd   :  { %6254 = vmatprep.subr.msk.mxu0 %vm1260_vm6, %v5362_v38  ;;  %v11256_v38 = vld [vmem:[#allocation55_spill] sm:$0xff] }
 0xfde   :  { %6255 = vmatpush1.msk.msra.mxu0 %vm1260_vm6, %v5361_v61  ;;  %v11257_v61 = vld [vmem:[#allocation67_spill] sm:$0xff] }
 0xfdf   :  { %6256 = vmatmul.mubr.msk.f32.vlgmr.msra.gmra.mrb[30].mxu0 %vm2788_vm14, %v9775_v18  ;;  %7744 = vmatprep.subr.bf16.mxu0 %v9800_v51 }
 0xfe0   :  { %7746 = vmatpush1.bf16.msra.mxu0 %v9805_v52 }
 0xfe1   :  { %7748 = vmatprep.subr.bf16.mxu0 %v9810_v46 }
 0xfe4   :  { %7750 = vmatpush1.bf16.msra.mxu0 %v9817_v49  ;;  %v11204_v49 = vld [vmem:[#allocation13_spill] sm:$0xff] }
 0xfe5   :  { %7752 = vmatprep.subr.bf16.mxu0 %v9823_v58  ;;  %v11205_v58 = vld [vmem:[#allocation6_spill] sm:$0xff] }
 0xfe8   :  { %7754 = vmatpush1.bf16.msra.mxu0 %v9831_v5  ;;  %v11206_v5 = vld [vmem:[#allocation5_spill] sm:$0xff] }
 0xfe9   :  { %7756 = vmatprep.subr.bf16.mxu0 %v9839_v7  ;;  %v11207_v7 = vld [vmem:[#allocation14_spill] sm:$0xff] }
 0xfec   :  { %7758 = vmatpush1.bf16.msra.mxu0 %v9847_v9  ;;  %v11208_v9 = vld [vmem:[#allocation7_spill] sm:$0xff] }
 0xfed   :  { %7760 = vmatprep.subr.bf16.mxu0 %v9853_v10  ;;  %v11209_v10 = vld [vmem:[#allocation8_spill] sm:$0xff] }
 0xff0   :  { %7762 = vmatpush1.bf16.msra.mxu0 %v9859_v11  ;;  %v11210_v11 = vld [vmem:[#allocation15_spill] sm:$0xff] }
 0xff1   :  { %7764 = vmatprep.subr.bf16.mxu0 %v9865_v12  ;;  %v11211_v12 = vld [vmem:[#allocation9_spill] sm:$0xff] }
 0xff4   :  { %7766 = vmatpush1.bf16.msra.mxu0 %v9871_v15  ;;  %v11212_v15 = vld [vmem:[#allocation10_spill] sm:$0xff] }
 0xff5   :  { %7768 = vmatprep.subr.bf16.mxu0 %v9877_v16  ;;  %v11213_v16 = vld [vmem:[#allocation19_spill] sm:$0xff] }
 0xff8   :  { %7770 = vmatpush1.bf16.msra.mxu0 %v9883_v19  ;;  %v11214_v19 = vld [vmem:[#allocation12_spill] sm:$0xff] }
 0xff9   :  { %7772 = vmatprep.subr.bf16.mxu0 %v9889_v20  ;;  %v11215_v20 = vld [vmem:[#allocation11_spill] sm:$0xff] }
 0xffc   :  { %7774 = vmatpush1.bf16.msra.mxu0 %v9895_v21  ;;  %v11216_v21 = vld [vmem:[#allocation20_spill] sm:$0xff] }
 0xffd   :  { %7776 = vmatprep.subr.bf16.mxu0 %v9901_v22  ;;  %v11217_v22 = vld [vmem:[#allocation18_spill] sm:$0xff] }
0x1000   :  { %7778 = vmatpush1.bf16.msra.mxu0 %v9907_v23 }
0x1001   :  { %7780 = vmatprep.subr.bf16.mxu0 %v9913_v24  ;;  %v11218_v24 = vld [vmem:[#allocation16_spill] sm:$0xff] }
0x1004   :  { %7782 = vmatpush1.bf16.msra.mxu0 %v9919_v31  ;;  %v11219_v31 = vld [vmem:[#allocation39_spill] sm:$0xff] }
0x1005   :  { %7814 = vmatprep.subr.bf16.mxu0 %v10032_v45  ;;  %v11221_v45 = vld [vmem:[#allocation21_spill] sm:$0xff] }
0x10b2   :  { %v10816_v18 = vpop.f32.mrb[30].mxu0 }
0x10b3   :  { %v10818_v51 = vpop.f32.mrb[31].mxu0  ;;  %v5442_v46 = vrot.slane %v10816_v18, 1  ;;  %v5731_v41 = vrot.slane %v10816_v18, 2 }
0x10b4   :  { %v5443_v52 = vrot.slane %v10818_v51, 1  ;;  %v5732_v23 = vrot.slane %v10818_v51, 2  ;;  %v5881_v50 = vrot.slane %v10818_v51, 3 }
0x10b6   :  { %6257 = vmatprep.mubr.msk.f32.mxu0 %vm1500_vm8, %v5443_v52  ;;  %6258 = vmatprep.mubr.msk.f32.mxu1 %vm1500_vm8, %v5443_v52  ;;  %v11259_v52 = vld [vmem:[#allocation57_spill] sm:$0xff] }
0x10b7   :  { %5512 = vmatmul.mubr.f32.vlgmr.msra.gmra.mrb[32].mxu0 %v5442_v46  ;;  %5583 = vmatmul.mubr.f32.vlgmr.msra.gmra.mrb[86].mxu1 %v5442_v46  ;;  %v11260_v46 = vld [vmem:[#allocation68_spill] sm:$0xff] }
0x10b8   :  { %7816 = vmatpush1.bf16.msra.mxu0 %v10037_v17  ;;  %7855 = vmatpush1.bf16.msra.mxu1 %v10156_v57  ;;  %v11222_v17 = vld [vmem:[#allocation40_spill] sm:$0xff]  ;;  %v11233_v57 = vld [vmem:[#allocation30_spill] sm:$0xff] }
0x10b9   :  { %7818 = vmatprep.subr.bf16.mxu0 %v10048_v35  ;;  %7856 = vmatprep.subr.bf16.mxu1 %v11114_v33  ;;  %v11223_v35 = vld [vmem:[#allocation22_spill] sm:$0xff] }
0x10ba   :  { %6259 = vmatprep.mubr.msk.f32.mxu0 %vm1500_vm8, %v10818_v51  ;;  %6260 = vmatprep.mubr.msk.f32.mxu1 %vm1500_vm8, %v10818_v51  ;;  %v11258_v51 = vld [vmem:[#allocation56_spill] sm:$0xff] }
0x10bc   :  { %7820 = vmatpush1.bf16.msra.mxu0 %v10053_v62  ;;  %7858 = vmatpush1.bf16.msra.mxu1 %v10164_v53  ;;  %v11224_v62 = vld [vmem:[#allocation23_spill] sm:$0xff]  ;;  %v11234_v53 = vld [vmem:[#allocation44_spill] sm:$0xff] }
0x10bd   :  { %7822 = vmatprep.subr.bf16.mxu0 %v10060_v2  ;;  %7859 = vmatprep.subr.bf16.mxu1 %v11114_v33  ;;  %v11225_v2 = vld [vmem:[#allocation41_spill] sm:$0xff] }
0x10c0   :  { %7824 = vmatpush1.bf16.msra.mxu0 %v10065_v13  ;;  %7861 = vmatpush1.bf16.msra.mxu1 %v10173_v59  ;;  %v11226_v13 = vld [vmem:[#allocation24_spill] sm:$0xff]  ;;  %v11235_v59 = vld [vmem:[#allocation31_spill] sm:$0xff] }
0x10c1   :  { %7826 = vmatprep.subr.bf16.mxu0 %v10072_v36  ;;  %7862 = vmatprep.subr.bf16.mxu1 %v11114_v33  ;;  %v11227_v36 = vld [vmem:[#allocation26_spill] sm:$0xff] }
0x10c4   :  { %7828 = vmatpush1.bf16.msra.mxu0 %v10077_v32  ;;  %7864 = vmatpush1.bf16.msra.mxu1 %v10180_v14  ;;  %v11228_v32 = vld [vmem:[#allocation42_spill] sm:$0xff]  ;;  %v11236_v14 = vld [vmem:[#allocation32_spill] sm:$0xff] }
0x10c5   :  { %7830 = vmatprep.subr.bf16.mxu0 %v10084_v34  ;;  %7865 = vmatprep.subr.bf16.mxu1 %v11114_v33  ;;  %v11229_v34 = vld [vmem:[#allocation27_spill] sm:$0xff] }
0x10c8   :  { %7832 = vmatpush1.bf16.msra.mxu0 %v10089_v27  ;;  %7867 = vmatpush1.bf16.msra.mxu1 %v10187_v0  ;;  %v11230_v27 = vld [vmem:[#allocation28_spill] sm:$0xff]  ;;  %v11237_v0 = vld [vmem:[#allocation45_spill] sm:$0xff] }
0x10c9   :  { %7834 = vmatprep.subr.bf16.mxu0 %v10096_v8  ;;  %7868 = vmatprep.subr.bf16.mxu1 %v11114_v33  ;;  %v11231_v8 = vld [vmem:[#allocation43_spill] sm:$0xff] }
0x10cc   :  { %7836 = vmatpush1.bf16.msra.mxu0 %v10101_v37  ;;  %7870 = vmatpush1.bf16.msra.mxu1 %v11204_v49  ;;  %v11232_v37 = vld [vmem:[#allocation29_spill] sm:$0xff]  ;;  %v11261_v49 = vld [vmem:[#allocation58_spill] sm:$0xff] }
0x10cd   :  { %7838 = vmatprep.subr.bf16.mxu0 %v11205_v58  ;;  %7871 = vmatprep.subr.bf16.mxu1 %v11114_v33  ;;  %v11262_v58 = vld [vmem:[#allocation59_spill] sm:$0xff] }
0x10d0   :  { %7840 = vmatpush1.bf16.msra.mxu0 %v11206_v5  ;;  %7873 = vmatpush1.bf16.msra.mxu1 %v11207_v7  ;;  %v11263_v5 = vld [vmem:[#allocation69_spill] sm:$0xff]  ;;  %v11264_v7 = vld [vmem:[#allocation60_spill] sm:$0xff] }
0x10d1   :  { %7842 = vmatprep.subr.bf16.mxu0 %v11208_v9  ;;  %7874 = vmatprep.subr.bf16.mxu1 %v11114_v33  ;;  %v11265_v9 = vld [vmem:[#allocation61_spill] sm:$0xff] }
0x10d4   :  { %7844 = vmatpush1.bf16.msra.mxu0 %v11209_v10  ;;  %7876 = vmatpush1.bf16.msra.mxu1 %v11210_v11  ;;  %v11266_v10 = vld [vmem:[#allocation70_spill] sm:$0xff] }
0x10d5   :  { %7846 = vmatprep.subr.bf16.mxu0 %v11211_v12  ;;  %7877 = vmatprep.subr.bf16.mxu1 %v11114_v33  ;;  %v11267_v11 = vld [vmem:[#allocation62_spill] sm:$0xff]  ;;  %v11268_v12 = vld [vmem:[#allocation63_spill] sm:$0xff] }
0x10d8   :  { %7848 = vmatpush1.bf16.msra.mxu0 %v11212_v15  ;;  %7879 = vmatpush1.bf16.msra.mxu1 %v11213_v16  ;;  %v11269_v15 = vld [vmem:[#allocation71_spill] sm:$0xff]  ;;  %v5880_v16 = vrot.slane %v10816_v18, 3 }
0x10d9   :  { %7850 = vmatprep.subr.bf16.mxu0 %v11214_v19  ;;  %7880 = vmatprep.subr.bf16.mxu1 %v11114_v33 }
0x10dc   :  { %7852 = vmatpush1.bf16.msra.mxu0 %v11215_v20  ;;  %7882 = vmatpush1.bf16.msra.mxu1 %v11216_v21 }
0x10dd   :  { %7884 = vmatprep.subr.bf16.mxu0 %v11217_v22  ;;  %7923 = vmatprep.subr.bf16.mxu1 %v11114_v33 }
0x10df   :  { %5655 = vmatmul.mubr.f32.vlgmr.msra.gmra.mrb[32].mxu0 %v10816_v18  ;;  %5726 = vmatmul.mubr.f32.vlgmr.msra.gmra.mrb[86].mxu1 %v10816_v18 }
0x10e0   :  { %7886 = vmatpush1.bf16.msra.mxu0 %v11218_v24  ;;  %6261 = vmatprep.mubr.msk.f32.mxu0 %vm1500_vm8, %v5732_v23 }
0x10e1   :  { %7925 = vmatpush1.bf16.msra.mxu1 %v11219_v31  ;;  %6262 = vmatprep.mubr.msk.f32.mxu1 %vm1500_vm8, %v5732_v23 }
0x10e2   :  { %7888 = vmatprep.subr.bf16.mxu0 %v11220_v48  ;;  %7926 = vmatprep.subr.bf16.mxu1 %v11114_v33 }
0x10e4   :  { %7890 = vmatpush1.bf16.msra.mxu0 %v11221_v45 }
0x10e5   :  { %7928 = vmatpush1.bf16.msra.mxu1 %v11222_v17  ;;  %7892 = vmatprep.subr.bf16.mxu0 %v11223_v35 }
0x10e6   :  { %7929 = vmatprep.subr.bf16.mxu1 %v11114_v33 }
0x10e8   :  { %7894 = vmatpush1.bf16.msra.mxu0 %v11224_v62 }
0x10e9   :  { %7931 = vmatpush1.bf16.msra.mxu1 %v11225_v2  ;;  %7896 = vmatprep.subr.bf16.mxu0 %v11226_v13 }
0x10ea   :  { %7932 = vmatprep.subr.bf16.mxu1 %v11114_v33 }
0x10ec   :  { %7898 = vmatpush1.bf16.msra.mxu0 %v11227_v36 }
0x10ed   :  { %7934 = vmatpush1.bf16.msra.mxu1 %v11228_v32  ;;  %7900 = vmatprep.subr.bf16.mxu0 %v11229_v34 }
0x10ee   :  { %7935 = vmatprep.subr.bf16.mxu1 %v11114_v33 }
0x10f0   :  { %7902 = vmatpush1.bf16.msra.mxu0 %v11230_v27 }
0x10f1   :  { %7937 = vmatpush1.bf16.msra.mxu1 %v11231_v8  ;;  %7904 = vmatprep.subr.bf16.mxu0 %v11232_v37 }
0x10f2   :  { %7938 = vmatprep.subr.bf16.mxu1 %v11114_v33 }
0x10f4   :  { %7906 = vmatpush1.bf16.msra.mxu0 %v11233_v57 }
0x10f5   :  { %7940 = vmatpush1.bf16.msra.mxu1 %v11234_v53  ;;  %7908 = vmatprep.subr.bf16.mxu0 %v11235_v59 }
0x10f6   :  { %7941 = vmatprep.subr.bf16.mxu1 %v11114_v33 }
0x10f8   :  { %7910 = vmatpush1.bf16.msra.mxu0 %v11236_v14 }
0x10f9   :  { %7943 = vmatpush1.bf16.msra.mxu1 %v11237_v0  ;;  %7912 = vmatprep.subr.bf16.mxu0 %v11238_v42 }
0x10fa   :  { %7944 = vmatprep.subr.bf16.mxu1 %v11114_v33 }
0x10fc   :  { %7914 = vmatpush1.bf16.msra.mxu0 %v11239_v60 }
0x10fd   :  { %7946 = vmatpush1.bf16.msra.mxu1 %v11240_v28  ;;  %7916 = vmatprep.subr.bf16.mxu0 %v11241_v3 }
0x10fe   :  { %7947 = vmatprep.subr.bf16.mxu1 %v11114_v33 }
0x1100   :  { %7918 = vmatpush1.bf16.msra.mxu0 %v11242_v43 }
0x1101   :  { %7949 = vmatpush1.bf16.msra.mxu1 %v11243_v44  ;;  %7920 = vmatprep.subr.bf16.mxu0 %v11244_v54 }
0x1102   :  { %7950 = vmatprep.subr.bf16.mxu1 %v11114_v33 }
0x1104   :  { %7922 = vmatpush1.bf16.msra.mxu0 %v11245_v63 }
0x1105   :  { %7952 = vmatpush1.bf16.msra.mxu1 %v10417_v40  ;;  %7954 = vmatprep.subr.bf16.mxu0 %v10423_v56  ;;  %v11246_v40 = vld [vmem:[#allocation48_spill] sm:$0xff]  ;;  %v11247_v56 = vld [vmem:[#allocation49_spill] sm:$0xff] }
0x1106   :  { %7993 = vmatprep.subr.bf16.mxu1 %v11114_v33 }
0x1107   :  { %5801 = vmatmul.mubr.f32.vlgmr.msra.gmra.mrb[32].mxu0 %v5731_v41 }
0x1108   :  { %5872 = vmatmul.mubr.f32.vlgmr.msra.gmra.mrb[86].mxu1 %v5731_v41  ;;  %7956 = vmatpush1.bf16.msra.mxu0 %v10430_v26  ;;  %v11248_v26 = vld [vmem:[#allocation64_spill] sm:$0xff] }
0x1109   :  { %6263 = vmatprep.mubr.msk.f32.mxu0 %vm1500_vm8, %v5881_v50  ;;  %7995 = vmatpush1.bf16.msra.mxu1 %v10588_v55  ;;  %v11250_v55 = vld [vmem:[#allocation51_spill] sm:$0xff] }
0x110a   :  { %6264 = vmatprep.mubr.msk.f32.mxu1 %vm1500_vm8, %v5881_v50  ;;  %7958 = vmatprep.subr.bf16.mxu0 %v10436_v4  ;;  %v11251_v4 = vld [vmem:[#allocation65_spill] sm:$0xff] }
0x110b   :  { %7996 = vmatprep.subr.bf16.mxu1 %v11114_v33 }
0x110c   :  { %7960 = vmatpush1.bf16.msra.mxu0 %v10443_v1  ;;  %v11253_v1 = vld [vmem:[#allocation53_spill] sm:$0xff] }
0x110d   :  { %7998 = vmatpush1.bf16.msra.mxu1 %v10595_v25  ;;  %7962 = vmatprep.subr.bf16.mxu0 %v11246_v40  ;;  %v11254_v25 = vld [vmem:[#allocation66_spill] sm:$0xff] }
0x110e   :  { %7999 = vmatprep.subr.bf16.mxu1 %v11114_v33 }
0x1110   :  { %7964 = vmatpush1.bf16.msra.mxu0 %v11247_v56 }
0x1111   :  { %8001 = vmatpush1.bf16.msra.mxu1 %v11248_v26  ;;  %7966 = vmatprep.subr.bf16.mxu0 %v11249_v39 }
0x1112   :  { %8002 = vmatprep.subr.bf16.mxu1 %v11114_v33 }
0x1114   :  { %7968 = vmatpush1.bf16.msra.mxu0 %v11250_v55 }
0x1115   :  { %8004 = vmatpush1.bf16.msra.mxu1 %v11251_v4  ;;  %7970 = vmatprep.subr.bf16.mxu0 %v11252_v6 }
0x1116   :  { %8005 = vmatprep.subr.bf16.mxu1 %v11114_v33 }
0x1118   :  { %7972 = vmatpush1.bf16.msra.mxu0 %v11253_v1 }
0x1119   :  { %8007 = vmatpush1.bf16.msra.mxu1 %v11254_v25  ;;  %7974 = vmatprep.subr.bf16.mxu0 %v11255_v47 }
0x111a   :  { %8008 = vmatprep.subr.bf16.mxu1 %v11114_v33 }
0x111c   :  { %7976 = vmatpush1.bf16.msra.mxu0 %v11256_v38 }
0x111d   :  { %8010 = vmatpush1.bf16.msra.mxu1 %v11257_v61  ;;  %7978 = vmatprep.subr.bf16.mxu0 %v11258_v51 }
0x111e   :  { %8011 = vmatprep.subr.bf16.mxu1 %v11114_v33 }
0x1120   :  { %7980 = vmatpush1.bf16.msra.mxu0 %v11259_v52 }
0x1121   :  { %8013 = vmatpush1.bf16.msra.mxu1 %v11260_v46  ;;  %7982 = vmatprep.subr.bf16.mxu0 %v11261_v49 }
0x1122   :  { %8014 = vmatprep.subr.bf16.mxu1 %v11114_v33 }
0x1124   :  { %7984 = vmatpush1.bf16.msra.mxu0 %v11262_v58 }
0x1125   :  { %8016 = vmatpush1.bf16.msra.mxu1 %v11263_v5  ;;  %7986 = vmatprep.subr.bf16.mxu0 %v11264_v7 }
0x1126   :  { %8017 = vmatprep.subr.bf16.mxu1 %v11114_v33 }
0x1128   :  { %7988 = vmatpush1.bf16.msra.mxu0 %v11265_v9 }
0x1129   :  { %8019 = vmatpush1.bf16.msra.mxu1 %v11266_v10  ;;  %7990 = vmatprep.subr.bf16.mxu0 %v11267_v11 }
0x112a   :  { %8020 = vmatprep.subr.bf16.mxu1 %v11114_v33 }
0x112c   :  { %7992 = vmatpush1.bf16.msra.mxu0 %v11268_v12 }
0x112d   :  { %8022 = vmatpush1.bf16.msra.mxu1 %v11269_v15 }
0x112f   :  { %5950 = vmatmul.mubr.f32.vlgmr.msra.gmra.mrb[32].mxu0 %v5880_v16 }
0x1130   :  { %6021 = vmatmul.mubr.f32.vlgmr.msra.gmra.mrb[86].mxu1 %v5880_v16 }
0x1202   :  { %v5951_v19 = vpop.f32.mrb[32].mxu0 }
0x1203   :  { %8688 = vtanh.f32 %v5951_v19  ;;  %v6022_v20 = vpop.f32.mrb[86].mxu1  ;;  %v5953_v21 = vpop.f32.mrb[33].mxu0 }
0x1204   :  { %8690 = vtanh.f32 %v6022_v20  ;;  %v6024_v22 = vpop.f32.mrb[87].mxu1 }
0x1205   :  { %8692 = vtanh.f32 %v5953_v21 }
0x120d   :  { %v8689_v23 = vpop.eup %8688 }
0x120e   :  { %v8691_v24 = vpop.eup %8690 }
0x120f   :  { %v8693_v31 = vpop.eup %8692  ;;  %v6049_v33 = vrot.slane %v8691_v24, %v10770_v29 }
0x1210   :  { %v6035_v48 = vcombine.low %v8689_v23, %v8693_v31 }
0x1212   :  { %v6042_v45 = vrot.slane %v6035_v48, %v10770_v29 }
0x1214   :  { %v6050_v18 = vcombine.low %v6042_v45, %v6049_v33 }
0x1216   :  { %v6057_v17 = vrot.slane %v6050_v18, %v10770_v29 }
0x1218   :  { %6060 = vst.msk [vmem:[#allocation2 + $0x3] sm:$0x7] %vm10781_vm15, %v6057_v17 }
0x1219   :  { %8760 = shalt.err (!%p8757_p4)
}
0x121a   :  { %s8761_s19 = scalar_lea.hbm %s10982_s9, 96 }
0x121b   :  { %p8762_p5 = scmp.ne.s32.totalorder %s10982_s9, %s8761_s19  ;;  %p8765_p6 = scmp.lt.u32.totalorder %s8761_s19, %s10982_s9 }
0x121d   :  { %p8767_p7 = pnand %p8765_p6, %p8762_p5 }
0x121f   :  { %8770 = shalt.err (!%p8767_p7)
}
0x1220   :  { %s8784_s21 = smov 48   ;;  %s8785_s22 = smov 3  }
0x1221   :  { %6072 = dma.vmem_to_hbm [thread:$0]  %s6067_s16, 96, %s10982_s9, [#allocation3], %s8784_s21, %s8784_s21, %s8785_s22  }
0x1222   :  { %8771 = dma.done.wait [#allocation3], 96  }
0x1223   :  { %8772 = vsyncadd [#allocation3], 4294967200 }
0x1224   :  { %6076 = vsyncpa [#allocation3], 1 }

</bundles_post_ra>
